<compile_context>
chip_gen: v7x
topology: tpu7x:2x2x1
jax: 0.10.0
libtpu: 0.0.40
codegen_flags: <defaults>
</compile_context>

<pallas_src>
import functools

import jax
import jax.numpy as jnp
from jax import lax
from jax.experimental import pallas as pl
from jax.experimental.pallas import tpu as pltpu


def _partial_conv_kernel(x_ref, m_ref, b_ref, wf_ref, bias_ref,
                         out_ref, nm_ref, nb_ref, pad_ref,
                         *, k, stride, padding, H_out, W_out):
    # Block shapes: x/m/b (1, Cin, H, W); wf (2*Cout+1, k*k*(2*Cin+1));
    # bias (Cout, 1); out/nb (1, Cout, HW); nm (1, 1, HW);
    # pad_ref scratch (2*Cin+1, H_pad, W_pad).
    C_in = x_ref.shape[1]
    H, W = x_ref.shape[2], x_ref.shape[3]
    C_out = out_ref.shape[1]
    C_aug = 2 * C_in + 1
    HW = H_out * W_out

    x = x_ref[0]          # (Cin, H, W)
    m = m_ref[0]
    b = b_ref[0]

    # Elementwise pre-mask + channel-sum of the mask (per-plane VALU adds).
    xm = x * m * b
    msum = jnp.sum(m, axis=0, keepdims=True)            # (1, H, W)
    xaug = jnp.concatenate([xm, msum, b], axis=0)        # (C_aug, H, W)

    # Zero-pad in VMEM scratch (no wrapper-side HBM pass).
    if padding > 0:
        pad_ref[...] = jnp.zeros_like(pad_ref)
        pad_ref[:, padding:padding + H, padding:padding + W] = xaug
    else:
        pad_ref[...] = xaug
    xp = pad_ref[...]                                    # (C_aug, H_pad, W_pad)

    # im2col over the augmented channels: row = (kh*k + kw)*C_aug + c.
    cols = []
    for kh in range(k):
        for kw in range(k):
            win = lax.slice(
                xp, (0, kh, kw),
                (C_aug,
                 kh + stride * (H_out - 1) + 1,
                 kw + stride * (W_out - 1) + 1),
                (1, stride, stride))                     # (C_aug, H_out, W_out)
            cols.append(win.reshape(C_aug, HW))
    im2col = jnp.concatenate(cols, axis=0)               # (k*k*C_aug, HW)

    # One fused MXU matmul: rows [0:Cout] input_conv (no bias),
    # row [Cout] mask_conv (all-ones), rows [Cout+1:] bmask_conv.
    res = jnp.dot(wf_ref[...], im2col,
                  preferred_element_type=jnp.float32)    # (2*Cout+1, HW)
    acc = res[:C_out]                                    # (Cout, HW)
    macc = res[C_out:C_out + 1]                          # (1, HW)
    bacc = res[C_out + 1:]                               # (Cout, HW)

    bias = bias_ref[...]                                 # (Cout, 1)
    holes = macc == 0.0                                  # exact: mask is binary
    mask_sum = jnp.where(holes, 1.0, macc)
    out = jnp.where(holes, 0.0, acc / mask_sum + bias)

    out_ref[0] = out                                     # (Cout, HW) lane-dense
    nm_ref[0] = jnp.where(holes, 0.0, 1.0)               # (1, HW) single channel
    nb_ref[0] = jnp.where(bacc == 0.0, 0.0, 1.0)         # (Cout, HW)


def partial_conv(x, mask, bmask, weight, bias, pw_weight, *, stride=1, padding=0):
    """PartialConv forward.

    Args (NCHW, float32, matching PyTorch):
      x, mask, bmask : (N, Cin, H, W)
      weight         : (Cout, Cin, k, k)   input_conv weight
      bias           : (Cout,)             input_conv bias
      pw_weight      : (Cout, Cin, 1, 1)   bmask_conv.pointwise weight
    Returns (output, new_mask, new_bmask), each (N, Cout, H_out, W_out).
    """
    N, C_in, H, W = x.shape
    C_out, _, k, _ = weight.shape
    H_pad, W_pad = H + 2 * padding, W + 2 * padding
    H_out = (H_pad - k) // stride + 1
    W_out = (W_pad - k) // stride + 1
    HW = H_out * W_out
    C_aug = 2 * C_in + 1

    # Fused weight (2*Cout+1, k*k*C_aug); im2col channel order: [xm | msum | bmask].
    w_blk = jnp.zeros((2 * C_out + 1, k, k, C_aug), jnp.float32)
    w_blk = w_blk.at[:C_out, :, :, :C_in].set(
        jnp.transpose(weight, (0, 2, 3, 1)).astype(jnp.float32))
    w_blk = w_blk.at[C_out, :, :, C_in].set(1.0)                       # mask_conv
    # bmask_conv: depthwise weight is the frozen center-tap identity in the
    # module, so only the center tap carries the 1x1 pointwise weight.
    w_blk = w_blk.at[C_out + 1:, k // 2, k // 2, C_in + 1:].set(
        pw_weight[:, :, 0, 0].astype(jnp.float32))
    w_fused = w_blk.reshape(2 * C_out + 1, k * k * C_aug)

    bias2 = bias.reshape(C_out, 1).astype(jnp.float32)

    kernel = functools.partial(_partial_conv_kernel, k=k, stride=stride,
                               padding=padding, H_out=H_out, W_out=W_out)

    img_spec = pl.BlockSpec((1, C_in, H, W), lambda n: (n, 0, 0, 0))

    grid_spec = pltpu.PrefetchScalarGridSpec(
        num_scalar_prefetch=0,
        grid=(N,),
        in_specs=[
            img_spec, img_spec, img_spec,
            pl.BlockSpec((2 * C_out + 1, k * k * C_aug), lambda n: (0, 0)),
            pl.BlockSpec((C_out, 1), lambda n: (0, 0)),
        ],
        out_specs=[
            pl.BlockSpec((1, C_out, HW), lambda n: (n, 0, 0)),
            pl.BlockSpec((1, 1, HW), lambda n: (n, 0, 0)),
            pl.BlockSpec((1, C_out, HW), lambda n: (n, 0, 0)),
        ],
        scratch_shapes=[pltpu.VMEM((C_aug, H_pad, W_pad), jnp.float32)],
    )

    out_f, nm_f, nb_f = pl.pallas_call(
        kernel,
        out_shape=(
            jax.ShapeDtypeStruct((N, C_out, HW), jnp.float32),
            jax.ShapeDtypeStruct((N, 1, HW), jnp.float32),
            jax.ShapeDtypeStruct((N, C_out, HW), jnp.float32),
        ),
        grid_spec=grid_spec,
        compiler_params=pltpu.CompilerParams(dimension_semantics=("parallel",)),
    )(x.astype(jnp.float32), mask.astype(jnp.float32), bmask.astype(jnp.float32),
      w_fused, bias2)

    out = out_f.reshape(N, C_out, H_out, W_out)
    new_mask = jnp.broadcast_to(nm_f, (N, C_out, HW)).reshape(N, C_out, H_out, W_out)
    new_bmask = nb_f.reshape(N, C_out, H_out, W_out)
    return out, new_mask, new_bmask


def _reference(x, mask, bmask, weight, bias, pw_weight, stride, padding):
    """Pure-JAX reference mirroring the PyTorch forward (NCHW)."""
    dn = ('NCHW', 'OIHW', 'NCHW')
    padcfg = [(padding, padding), (padding, padding)]
    conv = lambda a, wt, fg=1: lax.conv_general_dilated(
        a, wt, (stride, stride), padcfg, dimension_numbers=dn,
        feature_group_count=fg)

    C_in = x.shape[1]
    k = weight.shape[2]

    out_bias = bias.reshape(1, -1, 1, 1)
    output = conv(x * mask * bmask, weight) + out_bias
    output_mask = conv(mask, jnp.ones_like(weight))
    dw_w = jnp.zeros((C_in, 1, k, k), jnp.float32).at[:, 0, k // 2, k // 2].set(1.0)
    dw = conv(bmask, dw_w, fg=C_in)
    output_bmask = lax.conv_general_dilated(dw, pw_weight, (1, 1),
                                            [(0, 0), (0, 0)],
                                            dimension_numbers=dn)

    holes = output_mask == 0
    mask_sum = jnp.where(holes, 1.0, output_mask)
    bholes = output_bmask == 0
    out_pre = (output - out_bias) / mask_sum + out_bias
    out = jnp.where(holes, 0.0, out_pre)
    new_mask = jnp.where(holes, 0.0, jnp.ones_like(out))
    new_bmask = jnp.where(bholes, 0.0, jnp.ones_like(out))
    return out, new_mask, new_bmask


if __name__ == "__main__":
    key = jax.random.PRNGKey(0)
    N, C_in, C_out, H, W = 2, 4, 8, 16, 16
    k, stride, padding = 3, 1, 1

    k_x, k_m, k_b, k_w, k_p = jax.random.split(key, 5)

    x = jax.random.normal(k_x, (N, C_in, H, W), jnp.float32)
    mask = (jax.random.uniform(k_m, (N, C_in, H, W)) > 0.4).astype(jnp.float32)
    bmask = (jax.random.uniform(k_b, (N, C_in, H, W)) > 0.3).astype(jnp.float32)

    # input_conv: kaiming-normal weight (fan_in mode), bias init to 0
    fan_in = C_in * k * k
    weight = jax.random.normal(k_w, (C_out, C_in, k, k), jnp.float32) * jnp.sqrt(2.0 / fan_in)
    bias = jnp.zeros((C_out,), jnp.float32)
    # bmask_conv.pointwise: default Conv2d-style uniform init (deterministic here)
    bound = 1.0 / jnp.sqrt(float(C_in))
    pw_weight = jax.random.uniform(k_p, (C_out, C_in, 1, 1), jnp.float32,
                                   minval=-bound, maxval=bound)

    out, new_mask, new_bmask = partial_conv(x, mask, bmask, weight, bias,
                                            pw_weight, stride=stride,
                                            padding=padding)
    jax.block_until_ready((out, new_mask, new_bmask))

    ref_out, ref_nm, ref_nb = _reference(x, mask, bmask, weight, bias,
                                         pw_weight, stride, padding)

    assert out.shape == (N, C_out, H, W)
    assert float(jnp.max(jnp.abs(out - ref_out))) < 1e-3
    assert bool(jnp.array_equal(new_mask, ref_nm))
    assert bool(jnp.array_equal(new_bmask, ref_nb))

    print("KERNEL_OK")
</pallas_src>

<mosaic_0001>
module attributes {stable_mosaic.version = 11 : i64} {
  func.func @_partial_conv_kernel(%arg0: i32, %arg1: memref<1x4x16x16xf32, #tpu.memory_space<vmem>>, %arg2: memref<1x4x16x16xf32, #tpu.memory_space<vmem>>, %arg3: memref<1x4x16x16xf32, #tpu.memory_space<vmem>>, %arg4: memref<17x81xf32, #tpu.memory_space<vmem>>, %arg5: memref<8x1xf32, #tpu.memory_space<vmem>>, %arg6: memref<1x8x256xf32, #tpu.memory_space<vmem>>, %arg7: memref<1x1x256xf32, #tpu.memory_space<vmem>>, %arg8: memref<1x8x256xf32, #tpu.memory_space<vmem>>, %arg9: memref<9x18x18xf32, #tpu.memory_space<vmem>>) attributes {dimension_semantics = [#tpu.dimension_semantics<parallel>], iteration_bounds = array<i64: 2>, scalar_prefetch = 0 : i64, scratch_operands = 1 : i64, tpu.core_type = #tpu.core_type<tc>, window_params = [{transform_indices = @transform_0, window_bounds = array<i64: 1, 4, 16, 16>}, {transform_indices = @transform_1, window_bounds = array<i64: 1, 4, 16, 16>}, {transform_indices = @transform_2, window_bounds = array<i64: 1, 4, 16, 16>}, {pipeline_mode = #tpu.pipeline_mode<synchronous>, transform_indices = @transform_3, window_bounds = array<i64: 17, 81>}, {pipeline_mode = #tpu.pipeline_mode<synchronous>, transform_indices = @transform_4, window_bounds = array<i64: 8, 1>}, {transform_indices = @transform_5, window_bounds = array<i64: 1, 8, 256>}, {transform_indices = @transform_6, window_bounds = array<i64: 1, 1, 256>}, {transform_indices = @transform_7, window_bounds = array<i64: 1, 8, 256>}]} {
    %c0 = arith.constant 0 : index
    %c0_0 = arith.constant 0 : index
    %c0_1 = arith.constant 0 : index
    %c0_2 = arith.constant 0 : index
    %0 = vector.load %arg1[%c0, %c0_0, %c0_1, %c0_2] : memref<1x4x16x16xf32, #tpu.memory_space<vmem>>, vector<1x4x16x16xf32>
    %1 = vector.shape_cast %0 : vector<1x4x16x16xf32> to vector<4x16x16xf32>
    %c0_3 = arith.constant 0 : index
    %c0_4 = arith.constant 0 : index
    %c0_5 = arith.constant 0 : index
    %c0_6 = arith.constant 0 : index
    %2 = vector.load %arg2[%c0_3, %c0_4, %c0_5, %c0_6] : memref<1x4x16x16xf32, #tpu.memory_space<vmem>>, vector<1x4x16x16xf32>
    %3 = vector.shape_cast %2 : vector<1x4x16x16xf32> to vector<4x16x16xf32>
    %c0_7 = arith.constant 0 : index
    %c0_8 = arith.constant 0 : index
    %c0_9 = arith.constant 0 : index
    %c0_10 = arith.constant 0 : index
    %4 = vector.load %arg3[%c0_7, %c0_8, %c0_9, %c0_10] : memref<1x4x16x16xf32, #tpu.memory_space<vmem>>, vector<1x4x16x16xf32>
    %5 = vector.shape_cast %4 : vector<1x4x16x16xf32> to vector<4x16x16xf32>
    %6 = arith.mulf %1, %3 : vector<4x16x16xf32>
    %7 = arith.mulf %6, %5 : vector<4x16x16xf32>
    %cst = arith.constant dense<0.000000e+00> : vector<16x16xf32>
    %8 = vector.multi_reduction <add>, %3, %cst [0] : vector<4x16x16xf32> to vector<16x16xf32>
    %9 = vector.shape_cast %8 : vector<16x16xf32> to vector<1x16x16xf32>
    %10 = tpu.concatenate %7, %9, %5 in 0 : vector<4x16x16xf32>, vector<1x16x16xf32>, vector<4x16x16xf32> -> vector<9x16x16xf32>
    %cst_11 = arith.constant 0.000000e+00 : f32
    %11 = vector.broadcast %cst_11 : f32 to vector<9x18x18xf32>
    %c0_12 = arith.constant 0 : index
    %c0_13 = arith.constant 0 : index
    %c0_14 = arith.constant 0 : index
    %12 = vector.load %arg9[%c0_12, %c0_13, %c0_14] : memref<9x18x18xf32, #tpu.memory_space<vmem>>, vector<9x18x18xf32>
    tpu.vector_store %arg9[%c0_12, %c0_13, %c0_14], %11 {strides = array<i32>} : memref<9x18x18xf32, #tpu.memory_space<vmem>>, vector<9x18x18xf32>,
    %c0_15 = arith.constant 0 : index
    %c1 = arith.constant 1 : index
    %c1_16 = arith.constant 1 : index
    %13 = vector.load %arg9[%c0_15, %c1, %c1_16] : memref<9x18x18xf32, #tpu.memory_space<vmem>>, vector<9x16x16xf32>
    tpu.vector_store %arg9[%c0_15, %c1, %c1_16], %10 {strides = array<i32>} : memref<9x18x18xf32, #tpu.memory_space<vmem>>, vector<9x16x16xf32>,
    %c0_17 = arith.constant 0 : index
    %c0_18 = arith.constant 0 : index
    %c0_19 = arith.constant 0 : index
    %14 = vector.load %arg9[%c0_17, %c0_18, %c0_19] : memref<9x18x18xf32, #tpu.memory_space<vmem>>, vector<9x18x18xf32>
    %15 = vector.extract_strided_slice %14 {offsets = [0, 0, 0], sizes = [9, 16, 16], strides = [1, 1, 1]} : vector<9x18x18xf32> to vector<9x16x16xf32>
    %16 = vector.shape_cast %15 : vector<9x16x16xf32> to vector<9x256xf32>
    %17 = vector.extract_strided_slice %14 {offsets = [0, 0, 1], sizes = [9, 16, 16], strides = [1, 1, 1]} : vector<9x18x18xf32> to vector<9x16x16xf32>
    %18 = vector.shape_cast %17 : vector<9x16x16xf32> to vector<9x256xf32>
    %19 = vector.extract_strided_slice %14 {offsets = [0, 0, 2], sizes = [9, 16, 16], strides = [1, 1, 1]} : vector<9x18x18xf32> to vector<9x16x16xf32>
    %20 = vector.shape_cast %19 : vector<9x16x16xf32> to vector<9x256xf32>
    %21 = vector.extract_strided_slice %14 {offsets = [0, 1, 0], sizes = [9, 16, 16], strides = [1, 1, 1]} : vector<9x18x18xf32> to vector<9x16x16xf32>
    %22 = vector.shape_cast %21 : vector<9x16x16xf32> to vector<9x256xf32>
    %23 = vector.extract_strided_slice %14 {offsets = [0, 1, 1], sizes = [9, 16, 16], strides = [1, 1, 1]} : vector<9x18x18xf32> to vector<9x16x16xf32>
    %24 = vector.shape_cast %23 : vector<9x16x16xf32> to vector<9x256xf32>
    %25 = vector.extract_strided_slice %14 {offsets = [0, 1, 2], sizes = [9, 16, 16], strides = [1, 1, 1]} : vector<9x18x18xf32> to vector<9x16x16xf32>
    %26 = vector.shape_cast %25 : vector<9x16x16xf32> to vector<9x256xf32>
    %27 = vector.extract_strided_slice %14 {offsets = [0, 2, 0], sizes = [9, 16, 16], strides = [1, 1, 1]} : vector<9x18x18xf32> to vector<9x16x16xf32>
    %28 = vector.shape_cast %27 : vector<9x16x16xf32> to vector<9x256xf32>
    %29 = vector.extract_strided_slice %14 {offsets = [0, 2, 1], sizes = [9, 16, 16], strides = [1, 1, 1]} : vector<9x18x18xf32> to vector<9x16x16xf32>
    %30 = vector.shape_cast %29 : vector<9x16x16xf32> to vector<9x256xf32>
    %31 = vector.extract_strided_slice %14 {offsets = [0, 2, 2], sizes = [9, 16, 16], strides = [1, 1, 1]} : vector<9x18x18xf32> to vector<9x16x16xf32>
    %32 = vector.shape_cast %31 : vector<9x16x16xf32> to vector<9x256xf32>
    %33 = tpu.concatenate %16, %18, %20, %22, %24, %26, %28, %30, %32 in 0 : vector<9x256xf32>, vector<9x256xf32>, vector<9x256xf32>, vector<9x256xf32>, vector<9x256xf32>, vector<9x256xf32>, vector<9x256xf32>, vector<9x256xf32>, vector<9x256xf32> -> vector<81x256xf32>
    %c0_20 = arith.constant 0 : index
    %c0_21 = arith.constant 0 : index
    %34 = vector.load %arg4[%c0_20, %c0_21] : memref<17x81xf32, #tpu.memory_space<vmem>>, vector<17x81xf32>
    %cst_22 = arith.constant dense<0.000000e+00> : vector<17x256xf32>
    %35 = tpu.matmul %34, %33, %cst_22 {dimension_numbers = #tpu.dot_dimension_numbers<[1], [0], [0], [1], [0, 0, 1, 1], [], []>} : vector<17x81xf32>, vector<81x256xf32>, vector<17x256xf32> -> vector<17x256xf32>
    %36 = vector.extract_strided_slice %35 {offsets = [0, 0], sizes = [8, 256], strides = [1, 1]} : vector<17x256xf32> to vector<8x256xf32>
    %37 = vector.extract_strided_slice %35 {offsets = [8, 0], sizes = [1, 256], strides = [1, 1]} : vector<17x256xf32> to vector<1x256xf32>
    %38 = vector.extract_strided_slice %35 {offsets = [9, 0], sizes = [8, 256], strides = [1, 1]} : vector<17x256xf32> to vector<8x256xf32>
    %c0_23 = arith.constant 0 : index
    %c0_24 = arith.constant 0 : index
    %39 = vector.load %arg5[%c0_23, %c0_24] : memref<8x1xf32, #tpu.memory_space<vmem>>, vector<8x1xf32>
    %cst_25 = arith.constant 0.000000e+00 : f32
    %40 = vector.broadcast %cst_25 : f32 to vector<1x256xf32>
    %41 = arith.cmpf oeq, %37, %40 : vector<1x256xf32>
    %cst_26 = arith.constant 1.000000e+00 : f32
    %42 = vector.broadcast %cst_26 : f32 to vector<1x256xf32>
    %43 = arith.select %41, %42, %37 : vector<1x256xi1>, vector<1x256xf32>
    %44 = vector.broadcast %43 : vector<1x256xf32> to vector<8x256xf32>
    %45 = arith.divf %36, %44 : vector<8x256xf32>
    %46 = vector.broadcast %39 : vector<8x1xf32> to vector<8x256xf32>
    %47 = arith.addf %45, %46 : vector<8x256xf32>
    %cst_27 = arith.constant 0.000000e+00 : f32
    %48 = vector.shape_cast %41 : vector<1x256xi1> to vector<1x256xi1>
    %49 = vector.broadcast %48 : vector<1x256xi1> to vector<8x256xi1>
    %50 = vector.broadcast %cst_27 : f32 to vector<8x256xf32>
    %51 = arith.select %49, %50, %47 : vector<8x256xi1>, vector<8x256xf32>
    %c0_28 = arith.constant 0 : index
    %c0_29 = arith.constant 0 : index
    %c0_30 = arith.constant 0 : index
    %52 = vector.load %arg6[%c0_28, %c0_29, %c0_30] : memref<1x8x256xf32, #tpu.memory_space<vmem>>, vector<1x8x256xf32>
    %53 = vector.shape_cast %52 : vector<1x8x256xf32> to vector<8x256xf32>
    %54 = vector.shape_cast %51 : vector<8x256xf32> to vector<1x8x256xf32>
    tpu.vector_store %arg6[%c0_28, %c0_29, %c0_30], %54 {strides = array<i32>} : memref<1x8x256xf32, #tpu.memory_space<vmem>>, vector<1x8x256xf32>,
    %cst_31 = arith.constant 0.000000e+00 : f32
    %cst_32 = arith.constant 1.000000e+00 : f32
    %55 = vector.broadcast %cst_31 : f32 to vector<1x256xf32>
    %56 = vector.broadcast %cst_32 : f32 to vector<1x256xf32>
    %57 = arith.select %41, %55, %56 : vector<1x256xi1>, vector<1x256xf32>
    %c0_33 = arith.constant 0 : index
    %c0_34 = arith.constant 0 : index
    %c0_35 = arith.constant 0 : index
    %58 = vector.load %arg7[%c0_33, %c0_34, %c0_35] : memref<1x1x256xf32, #tpu.memory_space<vmem>>, vector<1x1x256xf32>
    %59 = vector.shape_cast %58 : vector<1x1x256xf32> to vector<1x256xf32>
    %60 = vector.shape_cast %57 : vector<1x256xf32> to vector<1x1x256xf32>
    tpu.vector_store %arg7[%c0_33, %c0_34, %c0_35], %60 {strides = array<i32>} : memref<1x1x256xf32, #tpu.memory_space<vmem>>, vector<1x1x256xf32>,
    %cst_36 = arith.constant 0.000000e+00 : f32
    %61 = vector.broadcast %cst_36 : f32 to vector<8x256xf32>
    %62 = arith.cmpf oeq, %38, %61 : vector<8x256xf32>
    %cst_37 = arith.constant 0.000000e+00 : f32
    %cst_38 = arith.constant 1.000000e+00 : f32
    %63 = vector.broadcast %cst_37 : f32 to vector<8x256xf32>
    %64 = vector.broadcast %cst_38 : f32 to vector<8x256xf32>
    %65 = arith.select %62, %63, %64 : vector<8x256xi1>, vector<8x256xf32>
    %c0_39 = arith.constant 0 : index
    %c0_40 = arith.constant 0 : index
    %c0_41 = arith.constant 0 : index
    %66 = vector.load %arg8[%c0_39, %c0_40, %c0_41] : memref<1x8x256xf32, #tpu.memory_space<vmem>>, vector<1x8x256xf32>
    %67 = vector.shape_cast %66 : vector<1x8x256xf32> to vector<8x256xf32>
    %68 = vector.shape_cast %65 : vector<8x256xf32> to vector<1x8x256xf32>
    tpu.vector_store %arg8[%c0_39, %c0_40, %c0_41], %68 {strides = array<i32>} : memref<1x8x256xf32, #tpu.memory_space<vmem>>, vector<1x8x256xf32>,
    return
  }
  func.func @transform_0(%arg0: i32) -> (i32, i32, i32, i32) {
    %c0_i32 = arith.constant 0 : i32
    %c0_i32_0 = arith.constant 0 : i32
    %c0_i32_1 = arith.constant 0 : i32
    %c0_i32_2 = arith.constant 0 : i32
    return %arg0, %c0_i32, %c0_i32_0, %c0_i32_1 : i32, i32, i32, i32
  }
  func.func @transform_1(%arg0: i32) -> (i32, i32, i32, i32) {
    %c0_i32 = arith.constant 0 : i32
    %c0_i32_0 = arith.constant 0 : i32
    %c0_i32_1 = arith.constant 0 : i32
    %c0_i32_2 = arith.constant 0 : i32
    return %arg0, %c0_i32, %c0_i32_0, %c0_i32_1 : i32, i32, i32, i32
  }
  func.func @transform_2(%arg0: i32) -> (i32, i32, i32, i32) {
    %c0_i32 = arith.constant 0 : i32
    %c0_i32_0 = arith.constant 0 : i32
    %c0_i32_1 = arith.constant 0 : i32
    %c0_i32_2 = arith.constant 0 : i32
    return %arg0, %c0_i32, %c0_i32_0, %c0_i32_1 : i32, i32, i32, i32
  }
  func.func @transform_3(%arg0: i32) -> (i32, i32) {
    %c0_i32 = arith.constant 0 : i32
    %c0_i32_0 = arith.constant 0 : i32
    %c0_i32_1 = arith.constant 0 : i32
    return %c0_i32, %c0_i32_0 : i32, i32
  }
  func.func @transform_4(%arg0: i32) -> (i32, i32) {
    %c0_i32 = arith.constant 0 : i32
    %c0_i32_0 = arith.constant 0 : i32
    %c0_i32_1 = arith.constant 0 : i32
    return %c0_i32, %c0_i32_0 : i32, i32
  }
  func.func @transform_5(%arg0: i32) -> (i32, i32, i32) {
    %c0_i32 = arith.constant 0 : i32
    %c0_i32_0 = arith.constant 0 : i32
    %c0_i32_1 = arith.constant 0 : i32
    return %arg0, %c0_i32, %c0_i32_0 : i32, i32, i32
  }
  func.func @transform_6(%arg0: i32) -> (i32, i32, i32) {
    %c0_i32 = arith.constant 0 : i32
    %c0_i32_0 = arith.constant 0 : i32
    %c0_i32_1 = arith.constant 0 : i32
    return %arg0, %c0_i32, %c0_i32_0 : i32, i32, i32
  }
  func.func @transform_7(%arg0: i32) -> (i32, i32, i32) {
    %c0_i32 = arith.constant 0 : i32
    %c0_i32_0 = arith.constant 0 : i32
    %c0_i32_1 = arith.constant 0 : i32
    return %arg0, %c0_i32, %c0_i32_0 : i32, i32, i32
  }
}

</mosaic_0001>

<bundles_post_ra>
// kernel: tpu_custom_call.1
= control target key start
LH: loop header
LB: loop body
LE: loop exit
PB: predicated region body
PF: predicated region fallthrough
CT: control target
= control target key end

     0   :  { %s10984_s0 = inlined_call_operand.hbm [shape: f32[2,4,16,16], index: 0, kind: input, shape index: {}]   ;;  %s10985_s1 = inlined_call_operand.hbm [shape: f32[2,4,16,16], index: 1, kind: input, shape index: {}]   ;;  %s10986_s2 = inlined_call_operand.hbm [shape: f32[2,4,16,16], index: 2, kind: input, shape index: {}]   ;;  %s10987_s3 = inlined_call_operand.hbm [shape: f32[17,81], index: 3, kind: input, shape index: {}]   ;;  %s10988_s4 = inlined_call_operand.vmem [shape: f32[8,1], index: 4, kind: input, shape index: {}]   ;;  %s10989_s5 = inlined_call_operand.hbm [shape: f32[2,8,256], index: 5, kind: output, shape index: {0}]   ;;  %s10990_s6 = inlined_call_operand.hbm [shape: f32[2,1,256], index: 6, kind: output, shape index: {1}]   ;;  %s10991_s7 = inlined_call_operand.hbm [shape: f32[2,8,256], index: 7, kind: output, shape index: {2}]  }
   0x1   :  { %11272 = sst [smem:[#allocation135_spill]] %s10984_s0 }
   0x2   :  { %11273 = sst [smem:[#allocation136_spill]] %s10985_s1 }
   0x3   :  { %11274 = sst [smem:[#allocation137_spill]] %s10989_s5 }
   0x4   :  { %11275 = sst [smem:[#allocation138_spill]] %s10991_s7 }
   0x5   :  { %13 = vsyncpa [#allocation4], 0 }
   0x6   :  { %15 = vsyncpa [#allocation4 + $0x1], 0 }
   0x7   :  { %16 = vsyncpa [#allocation7], 0 }
   0x8   :  { %18 = vsyncpa [#allocation7 + $0x1], 0 }
   0x9   :  { %19 = vsyncpa [#allocation10], 0 }
   0xa   :  { %20 = vsyncpa [#allocation5], 0 }
   0xb   :  { %22 = vsyncpa [#allocation5 + $0x1], 0 }
   0xc   :  { %23 = vsyncpa [#allocation13], 0 }
   0xd   :  { %25 = vsyncpa [#allocation13 + $0x1], 0  ;;  %s7323_s24 = smov 0   ;;  %s7325_s25 = smov 0  }
   0xe   :  { %s7327_s26 = smov 0   ;;  %s7329_s27 = smov 0  }
   0xf LB: > { %11276 = sst [smem:[#allocation20_spill]] %s7244_s24  ;;  %s7344_s28 = sadd.s32 1, %s7256_s27   ;;  %s7256_s27 = sphi %s7329_s27, %s11773_s27   ;;  %s7252_s26 = sphi %s7327_s26, %s11775_s26   ;;  %s7248_s25 = sphi %s7325_s25, %s11777_s25   ;;  %s7244_s24 = sphi %s7323_s24, %s11776_s24  }
  0x10   : > { %11277 = sst [smem:[#allocation21_spill]] %s7252_s26  ;;  %s38_s29 = sadd.s32 1, %s7252_s26 }
  0x11   : > { %11278 = sst [smem:[#allocation22_spill]] %s7256_s27  ;;  %s35_s30 = ssub.s32 %s7256_s27, %s7344_s28 }
  0x12   : > { %11279 = sst [smem:[#allocation23_spill]] %s7344_s28  ;;  %p10992_p0 = scmp.ne.s32.totalorder %s7252_s26, %s7248_s25 }
  0x13   : > { %p36_p1 = scmp.eq.s32.totalorder %s35_s30, 0  ;;  %p46_p2 = scmp.eq.s32.totalorder %s7256_s27, 0 }
  0x14   : > { %p6337_p5 = scmp.lt.s32.totalorder %s7256_s27, 2  ;;  %s10998_s9 = sand.u32 1, %s7252_s26  }
  0x15   : > { %s7353_s8 = scalar_select %p36_p1, %s7252_s26, %s38_s29  }
  0x16   : > { %p47_p3 = por %p46_p2, %p10992_p0  ;;  %s7363_s10 = sshll.u32 %s10998_s9, 6 }
  0x17   : > { %11280 = sst [smem:[#allocation24_spill]] %s7353_s8  ;;  %s7366_s11 = sshll.u32 %s7256_s27, 10 }
  0x18   : > { %p7368_p6 = pnand %p6337_p5, %p47_p3  ;;  %s284_s13 = sand.u32 1, %s7256_s27  }
  0x19   : > { %s11282_s1 = sld [smem:[#allocation136_spill]]  ;;  %s288_s17 = scalar_lea.vmem [#allocation6], %s7363_s10 }
  0x1a   : > { %s11281_s12 = scalar_select %p7368_p6, 1, 0 }
  0x1b   : > { %s295_s18 = sshll.u32 %s288_s17, 4  ;;  %s7382_s19 = scalar_lea.sflag [#allocation7], %s284_s13  ;;  %s7380_s18 = int_to_ptr.vmem [resolvable:$true] %s295_s18 }
  0x1c   : > { %p7388_p8 = pneg %p7368_p6 }
  0x1e   : > { %s11283_s21 = scalar_select %p7388_p8, 1, 0 }
  0x1f   : > { %s7377_s16 = scalar_lea.hbm %s11282_s1, %s7366_s11  ;;  %s7009_s29 = scalar_lea.hbm %s11282_s1, 2048 }
  0x20   : > { %s7004_s20 = scalar_lea.hbm %s7377_s16, 1024  ;;  %p7010_p11 = scmp.lt.u32.totalorder %s7377_s16, %s11282_s1 }
  0x21   : > { %p7005_p7 = scmp.ne.s32.totalorder %s7377_s16, %s7004_s20  ;;  %p7011_p12 = scmp.lt.u32.totalorder %s7009_s29, %s7004_s20 }
  0x22   : > { %p7013_p1 = scmp.lt.u32.totalorder %s7004_s20, %s7377_s16 }
  0x23   : > { %p7007_p9 = pnand %p7388_p8, %p7005_p7  ;;  %p7012_p13 = por %p7011_p12, %p7010_p11 }
  0x25   : > { %p7008_p10 = pneg %p7007_p9  ;;  %p7014_p2 = por %p7013_p1, %p7012_p13 }
  0x27   : > { %p7015_p3 = pnand %p7014_p2, %p7008_p10 }
  0x29   : > { %7018 = shalt.err (!%p7015_p3)
}
  0x2a   : > { %s7019_s13 = scalar_lea.vmem %s7380_s18, 1024  ;;  %s7258_s15 = smov [#allocation6]  }
  0x2b   : > { %p7020_p5 = scmp.ne.s32.totalorder %s7380_s18, %s7019_s13  ;;  %s7024_s17 = sshll.u32 %s7258_s15, 4  ;;  %s7025_s17 = int_to_ptr.vmem [resolvable:$false] %s7024_s17 }
  0x2c   : > { %s7026_s22 = scalar_lea.vmem %s7025_s17, 2048  ;;  %p7027_p4 = scmp.lt.s32.totalorder %s7380_s18, %s7025_s17 }
  0x2d   : > { %p7022_p7 = pnand %p7020_p5, %p7388_p8  ;;  %p7028_p0 = scmp.lt.s32.totalorder %s7026_s22, %s7019_s13 }
  0x2f   : > { %p7023_p9 = pneg %p7022_p7  ;;  %p7029_p11 = por %p7028_p0, %p7027_p4 }
  0x31   : > { %p7030_p12 = pnand %p7029_p11, %p7023_p9 }
  0x33   : > { %7033 = shalt.err (!%p7030_p12)
}
  0x34   : > { %s10994_s20 = smov 128   ;;  %s10996_s23 = smov 8  }
  0x35   : > { %6322 = dma.hbm_to_vmem [thread:$0]  (!%p7368_p6), %s7377_s16, 1024, %s7380_s18, %s7382_s19, %s10994_s20, %s10994_s20, %s10996_s23  }
  0x36   : > { %s7416_s29 = sadd.s32 4294967295, %s7256_s27   ;;  %s10993_s30 = sadd.s32 4294967294, %s7256_s27  }
  0x37   : > { %p51_p0 = scmp.ne.s32.totalorder %s7248_s25, %s7244_s24  ;;  %p11004_p4 = scmp.eq.s32.totalorder %s7416_s29, 0 }
  0x38   : > { %p169_p10 = scmp.eq.s32.totalorder %s7416_s29, 1  ;;  %p175_p13 = scmp.eq.s32.totalorder %s10993_s30, 1 }
  0x39   : > { %p7427_p1 = por %p11004_p4, %p51_p0  ;;  %p6222_p2 = scmp.ge.s32.totalorder %s7256_s27, 1 }
  0x3a   : > { %p11285_p3 = scmp.ne.s32.totalorder %s7252_s26, %s7248_s25  ;;  %p7439_p7 = por %p175_p13, %p51_p0 }
  0x3b   : > { %s11284_s14 = scalar_select %p7427_p1, 1, 0 }
  0x3c   : > { %p7435_p5 = por %p169_p10, %p11285_p3  ;;  %p234_p9 = scmp.lt.s32.totalorder %s7256_s27, 3 }
  0x3d   : > { %s11287_s18 = scalar_select %p7439_p7, 1, 0 }
  0x3e   : > { %s11286_s16 = scalar_select %p7435_p5, 1, 0 }
  0x3f   : > { %11288 = sst [smem:[#allocation25_spill]] %s11287_s18  ;;  %p7444_p11 = pnand %p6222_p2, %p234_p9 }
  0x40   : > { %s7261_s15 = smov [#allocation9]   ;;  %s11290_s0 = sld [smem:[#allocation135_spill]] }
  0x41   : > { %s11289_s13 = scalar_select %p7444_p11, 1, 0 }
  0x42   : > { %s246_s17 = sshll.u32 %s7261_s15, 4  ;;  %p6312_p12 = pneg %p7444_p11  ;;  %s7448_s17 = int_to_ptr.vmem [resolvable:$true] %s246_s17 }
  0x43   : > { %s267_s23 = scalar_lea.vmem [#allocation3], %s7363_s10  ;;  %s11292_s15 = sand.u32 1, %s7252_s26  }
  0x44   : > { %s274_s9 = sshll.u32 %s267_s23, 4  ;;  %p7461_p0 = pnand %p6312_p12, %p11004_p4  ;;  %s7465_s9 = int_to_ptr.vmem [resolvable:$true] %s274_s9 }
  0x45   : > { %s7469_s8 = scalar_lea.sflag [#allocation4], %s11292_s15 }
  0x46   : > { %s7456_s20 = scalar_lea.hbm %s11290_s0, %s7366_s11  ;;  %s7039_s27 = scalar_lea.hbm %s11290_s0, 2048 }
  0x47   : > { %s11291_s1 = scalar_select %p7461_p0, 1, 0 }
  0x48   : > { %s7034_s28 = scalar_lea.hbm %s7456_s20, 1024  ;;  %p7040_p3 = scmp.lt.u32.totalorder %s7456_s20, %s11290_s0 }
  0x49   : > { %p7035_p10 = scmp.ne.s32.totalorder %s7456_s20, %s7034_s28  ;;  %p7041_p9 = scmp.lt.u32.totalorder %s7039_s27, %s7034_s28 }
  0x4a   : > { %p7043_p4 = scmp.lt.u32.totalorder %s7034_s28, %s7456_s20 }
  0x4b   : > { %p7037_p13 = pnand %p7035_p10, %p7388_p8  ;;  %p7042_p12 = por %p7041_p9, %p7040_p3 }
  0x4d   : > { %p7038_p2 = pneg %p7037_p13  ;;  %p7044_p7 = por %p7043_p4, %p7042_p12 }
  0x4f   : > { %p7045_p5 = pnand %p7044_p7, %p7038_p2 }
  0x51   : > { %7048 = shalt.err (!%p7045_p5)
}
  0x52   : > { %s7049_s15 = scalar_lea.vmem %s7465_s9, 1024  ;;  %s7262_s30 = smov [#allocation3]  }
  0x53   : > { %p7050_p10 = scmp.ne.s32.totalorder %s7465_s9, %s7049_s15  ;;  %s7054_s22 = sshll.u32 %s7262_s30, 4  ;;  %s7055_s22 = int_to_ptr.vmem [resolvable:$false] %s7054_s22 }
  0x54   : > { %s7056_s18 = scalar_lea.vmem %s7055_s22, 2048  ;;  %p7057_p11 = scmp.lt.s32.totalorder %s7465_s9, %s7055_s22 }
  0x55   : > { %p7052_p13 = pnand %p7050_p10, %p7388_p8  ;;  %p7058_p0 = scmp.lt.s32.totalorder %s7056_s18, %s7049_s15 }
  0x57   : > { %p7053_p1 = pneg %p7052_p13  ;;  %p7059_p3 = por %p7058_p0, %p7057_p11 }
  0x59   : > { %p7060_p9 = pnand %p7059_p3, %p7053_p1 }
  0x5b   : > { %7063 = shalt.err (!%p7060_p9)
}
  0x5c   : > { %s11293_s27 = smov 8   ;;  %s11294_s28 = smov 128  }
  0x5d   : > { %6319 = dma.hbm_to_vmem [thread:$0]  (!%p7368_p6), %s7456_s20, 1024, %s7465_s9, %s7469_s8, %s11294_s28, %s11294_s28, %s11293_s27  }
  0x5e   : > { %s7500_s0 = scalar_lea.hbm %s10986_s2, %s7366_s11  ;;  %s7064_s18 = scalar_lea.hbm %s10987_s3, 384 }
  0x5f   : > { %p7065_p4 = scmp.ne.s32.totalorder %s10987_s3, %s7064_s18  ;;  %p11295_p1 = scmp.ne.s32.totalorder %s11291_s1, 0 }
  0x60   : > { %p7071_p0 = scmp.lt.u32.totalorder %s7064_s18, %s10987_s3 }
  0x61   : > { %p7066_p5 = pneg %p11295_p1 }
  0x63   : > { %p7067_p7 = pnand %p7066_p5, %p7065_p4 }
  0x65   : > { %p7068_p11 = pneg %p7067_p7 }
  0x67   : > { %p7073_p2 = pnand %p7071_p0, %p7068_p11 }
  0x69   : > { %7076 = shalt.err (!%p7073_p2)
}
  0x6a   : > { %s7077_s8 = scalar_lea.vmem %s7448_s17, 384  ;;  %p7085_p3 = scmp.lt.s32.totalorder %s7448_s17, %s7448_s17 }
  0x6b   : > { %p7078_p12 = scmp.ne.s32.totalorder %s7448_s17, %s7077_s8  ;;  %p7086_p9 = scmp.lt.s32.totalorder %s7077_s8, %s7077_s8 }
  0x6d   : > { %p7080_p10 = pnand %p7078_p12, %p7066_p5  ;;  %p7087_p6 = por %p7086_p9, %p7085_p3 }
  0x6f   : > { %p7081_p13 = pneg %p7080_p10 }
  0x71   : > { %p7088_p8 = pnand %p7087_p6, %p7081_p13 }
  0x73   : > { %7091 = shalt.err (!%p7088_p8)
}
  0x74   : > { %6315 = dma.hbm_to_vmem [thread:$0]  (!%p11295_p1), %s10987_s3, 384, %s7448_s17, [#allocation10], %s11294_s28, %s11294_s28, %s11293_s27  }
  0x75   : > { %s309_s24 = scalar_lea.vmem [#allocation8], %s7363_s10  ;;  %s7092_s9 = scalar_lea.hbm %s7500_s0, 1024 }
  0x76   : > { %s316_s26 = sshll.u32 %s309_s24, 4  ;;  %p7093_p6 = scmp.ne.s32.totalorder %s7500_s0, %s7092_s9  ;;  %s7527_s26 = int_to_ptr.vmem [resolvable:$true] %s316_s26 }
  0x77   : > { %p11296_p8 = scmp.ne.s32.totalorder %s11283_s21, 0  ;;  %s7097_s20 = scalar_lea.hbm %s10986_s2, 2048 }
  0x78   : > { %p7098_p7 = scmp.lt.u32.totalorder %s7500_s0, %s10986_s2  ;;  %p7099_p11 = scmp.lt.u32.totalorder %s7097_s20, %s7092_s9 }
  0x79   : > { %p7095_p4 = pnand %p7093_p6, %p11296_p8  ;;  %p7101_p1 = scmp.lt.u32.totalorder %s7092_s9, %s7500_s0 }
  0x7a   : > { %p7100_p0 = por %p7099_p11, %p7098_p7 }
  0x7b   : > { %p7096_p5 = pneg %p7095_p4 }
  0x7c   : > { %p7102_p2 = por %p7101_p1, %p7100_p0 }
  0x7e   : > { %p7103_p12 = pnand %p7102_p2, %p7096_p5 }
  0x80   : > { %7106 = shalt.err (!%p7103_p12)
}
  0x81   : > { %s7107_s10 = scalar_lea.vmem %s7527_s26, 1024  ;;  %s7263_s17 = smov [#allocation8]  }
  0x82   : > { %p7108_p10 = scmp.ne.s32.totalorder %s7527_s26, %s7107_s10  ;;  %s7112_s15 = sshll.u32 %s7263_s17, 4  ;;  %s7113_s15 = int_to_ptr.vmem [resolvable:$false] %s7112_s15 }
  0x83   : > { %s7114_s22 = scalar_lea.vmem %s7113_s15, 2048  ;;  %p7115_p9 = scmp.lt.s32.totalorder %s7527_s26, %s7113_s15 }
  0x84   : > { %p7110_p13 = pnand %p7108_p10, %p11296_p8  ;;  %p7116_p6 = scmp.lt.s32.totalorder %s7114_s22, %s7107_s10 }
  0x86   : > { %p7111_p3 = pneg %p7110_p13  ;;  %p7117_p4 = por %p7116_p6, %p7115_p9 }
  0x88   : > { %p7118_p7 = pnand %p7117_p4, %p7111_p3 }
  0x8a   : > { %7121 = shalt.err (!%p7118_p7)
}
  0x8b   : > { %p11297_p5 = scmp.ne.s32.totalorder %s11281_s12, 0  ;;  %p11298_p8 = scmp.ne.s32.totalorder %s11289_s13, 0 }
  0x8d   : > { %6325 = dma.hbm_to_vmem [thread:$0]  (!%p11297_p5), %s7500_s0, 1024, %s7527_s26, %s7382_s19, %s11294_s28, %s11294_s28, %s11293_s27  }
  0x8e   : > { %328 = sbr.rel (%p11298_p8) target bundleno = 1303 (0x517), region = 40 }
  0x95   : > { %s7557_s21 = sand.u32 1, %s7248_s25   ;;  %p11299_p11 = scmp.ne.s32.totalorder %s11284_s14, 0 }
  0x96   : > { %s6235_s18 = sshll.u32 %s7557_s21, 6  ;;  %s331_s8 = scalar_lea.sflag [#allocation4], %s7557_s21 }
  0x97   : > { %s7561_s5 = scalar_lea.vmem [#allocation3], %s6235_s18 }
  0x98   : > { %7223 = dma.done.wait (%p11299_p11), %s331_s8, 1024  }
  0x99   : > { %7225 = vsyncadd (%p11299_p11), %s331_s8, 4294966272  ;;  %s339_s0 = sand.u32 1, %s7416_s29   ;;  %s7570_s19 = scalar_lea.vmem [#allocation6], %s6235_s18 }
  0x9a   : > { %s340_s12 = scalar_lea.sflag [#allocation7], %s339_s0 }
  0x9b   : > { %7227 = dma.done.wait (%p11299_p11), %s340_s12, 2048  }
  0x9c   : > { %7229 = vsyncadd (%p11299_p11), %s340_s12, 4294965248  ;;  %s7576_s13 = scalar_lea.vmem [#allocation8], %s6235_s18  ;;  %p11300_p0 = scmp.eq.s32.totalorder %s7416_s29, 0 }
  0x9e   : > { %7231 = dma.done.wait (%p11300_p0), [#allocation10], 384   ;;  %p11301_p1 = pmov %p11300_p0 }
  0x9f   : > { %vm462_vm0 = vcmask 146432   ;;  %v11030_v0 = vmov 0.0   ;;  %vm465_vm1 = vcmask 140288   ;;  %v409_v1 = vld [vmem:[%s7561_s5 + $0x10] sm:$0xff]  ;;  %v407_v5 = vld [vmem:[%s7561_s5] sm:$0xff]  ;;  %v410_v9 = vld [vmem:[%s7561_s5 + $0x18] sm:$0xff] }
  0xa0   : > { %7233 = vsyncadd (%p11301_p1), [#allocation10], 4294966912  ;;  %467 = vst.msk [vmem:[#allocation2 + $0x18] sm:$0xff] %vm462_vm0, %v11030_v0  ;;  %5890 = vmatprep.mubr.f32.mxu1 %v11030_v0  ;;  %5884 = vmatprep.mubr.f32.mxu0 %v11030_v0  ;;  %v417_v2 = vld [vmem:[%s7570_s19 + $0x10] sm:$0xff]  ;;  %v415_v6 = vld [vmem:[%s7570_s19] sm:$0xff]  ;;  %vm447_vm2 = vcmask 130048  }
  0xa1   : > { %468 = vst.msk [vmem:[#allocation2 + $0x20] sm:$0xff] %vm462_vm0, %v11030_v0  ;;  %463 = vst.msk [vmem:[#allocation2] sm:$0xff] %vm462_vm0, %v11030_v0  ;;  %v7632_v3 = vld [vmem:[%s7576_s13 + $0x10] sm:$0xff]  ;;  %v433_v4 = vmul.f32 %v417_v2, %v409_v1  ;;  %v423_v7 = vld [vmem:[%s7576_s13] sm:$0xff]  ;;  %v431_v8 = vmul.f32 %v415_v6, %v407_v5  ;;  %s7265_s14 = smov 1   ;;  %v449_v32 = vsel %vm447_vm2, %v417_v2, 0.0 }
  0xa2   : > { %464 = vst.msk [vmem:[#allocation2 + $0x8] sm:$0xff] %vm462_vm0, %v11030_v0  ;;  %470 = vst.msk [vmem:[#allocation2 + $0x30] sm:$0xff] %vm462_vm0, %v11030_v0  ;;  %v418_v10 = vld [vmem:[%s7570_s19 + $0x18] sm:$0xff]  ;;  %v408_v14 = vld [vmem:[%s7561_s5 + $0x8] sm:$0xff]  ;;  %v448_v33 = vsel %vm447_vm2, %v415_v6, 0.0  ;;  %vm563_vm3 = vcmask 138248  }
  0xa3   : > { %471 = vst.msk [vmem:[#allocation2 + $0x38] sm:$0xff] %vm462_vm0, %v11030_v0  ;;  %473 = vst.msk [vmem:[#allocation2 + $0x48] sm:$0xff] %vm462_vm0, %v11030_v0  ;;  %v426_v11 = vld [vmem:[%s7576_s13 + $0x18] sm:$0xff]  ;;  %v441_v12 = vmul.f32 %v433_v4, %v7632_v3  ;;  %v434_v13 = vmul.f32 %v418_v10, %v410_v9  ;;  %v416_v15 = vld [vmem:[%s7570_s19 + $0x8] sm:$0xff]  ;;  %v439_v17 = vmul.f32 %v431_v8, %v423_v7  ;;  %v456_v25 = vsel %vm447_vm2, %v418_v10, 0.0  ;;  %s7268_s27 = smov 127  }
  0xa4   : > { %474 = vst.msk [vmem:[#allocation2 + $0x50] sm:$0xff] %vm462_vm0, %v11030_v0  ;;  %476 = vst.msk [vmem:[#allocation2 + $0x60] sm:$0xff] %vm462_vm0, %v11030_v0  ;;  %v424_v16 = vld [vmem:[%s7576_s13 + $0x8] sm:$0xff]  ;;  %v432_v18 = vmul.f32 %v416_v15, %v408_v14  ;;  %v411_v23 = vld [vmem:[%s7561_s5 + $0x20] sm:$0xff]  ;;  %v455_v27 = vsel %vm447_vm2, %v416_v15, 0.0  ;;  %v450_v40 = vadd.f32 %v449_v32, %v448_v33  ;;  %vm3982_vm4 = vcmask 1045504  }
  0xa5   : > { %477 = vst.msk [vmem:[#allocation2 + $0x68] sm:$0xff] %vm462_vm0, %v11030_v0  ;;  %479 = vst.msk [vmem:[#allocation2 + $0x78] sm:$0xff] %vm462_vm0, %v11030_v0  ;;  %v412_v19 = vld [vmem:[%s7561_s5 + $0x28] sm:$0xff]  ;;  %513 = vrot.lane.b32.xlu1 %v441_v12, %s7265_s14  ;;  %v442_v21 = vmul.f32 %v434_v13, %v426_v11  ;;  %v419_v24 = vld [vmem:[%s7570_s19 + $0x20] sm:$0xff]  ;;  %509 = vrot.lane.b32.xlu0 %v439_v17, %s7265_s14  ;;  %v457_v39 = vadd.f32 %v456_v25, %v455_v27  ;;  %v11016_v13 = vlaneseq  ;;  %v7267_v15 = vmov 1934713408  }
  0xa6   : > { %480 = vst.msk [vmem:[#allocation2 + $0x80] sm:$0xff] %vm462_vm0, %v11030_v0  ;;  %482 = vst.msk [vmem:[#allocation2 + $0x90] sm:$0xff] %vm462_vm0, %v11030_v0  ;;  %v420_v20 = vld [vmem:[%s7570_s19 + $0x28] sm:$0xff]  ;;  %v440_v26 = vmul.f32 %v432_v18, %v424_v16  ;;  %v435_v29 = vmul.f32 %v419_v24, %v411_v23  ;;  %v414_v30 = vld [vmem:[%s7561_s5 + $0x38] sm:$0xff]  ;;  %v451_v46 = vsel %vm447_vm2, %v419_v24, 0.0  ;;  %vm2280_vm5 = vcmask 1046528  }
  0xa7   : > { %483 = vst.msk [vmem:[#allocation2 + $0x98] sm:$0xff] %vm462_vm0, %v11030_v0  ;;  %485 = vst.msk [vmem:[#allocation2 + $0xa8] sm:$0xff] %vm462_vm0, %v11030_v0  ;;  %v436_v22 = vmul.f32 %v420_v20, %v412_v19  ;;  %v428_v28 = vld [vmem:[%s7576_s13 + $0x28] sm:$0xff]  ;;  %v422_v31 = vld [vmem:[%s7570_s19 + $0x38] sm:$0xff]  ;;  %v458_v44 = vsel %vm447_vm2, %v420_v20, 0.0  ;;  %v452_v51 = vadd.f32 %v451_v46, %v450_v40  ;;  %s7269_s28 = smov 126  }
  0xa8   : > { %486 = vst.msk [vmem:[#allocation2 + $0xb0] sm:$0xff] %vm462_vm0, %v11030_v0  ;;  %488 = vst.msk [vmem:[#allocation2 + $0xc0] sm:$0xff] %vm462_vm0, %v11030_v0  ;;  %v427_v34 = vld [vmem:[%s7576_s13 + $0x20] sm:$0xff]  ;;  %v413_v35 = vld [vmem:[%s7561_s5 + $0x30] sm:$0xff]  ;;  %v438_v38 = vmul.f32 %v422_v31, %v414_v30  ;;  %v459_v48 = vadd.f32 %v458_v44, %v457_v39  ;;  %v460_v50 = vsel %vm447_vm2, %v422_v31, 0.0  ;;  %s7270_s7 = smov 16  }
  0xa9   : > { %489 = vst.msk [vmem:[#allocation2 + $0xc8] sm:$0xff] %vm462_vm0, %v11030_v0  ;;  %v421_v36 = vld [vmem:[%s7570_s19 + $0x30] sm:$0xff]  ;;  %515 = vrot.lane.b32.xlu1 %v442_v21, %s7265_s14  ;;  %v444_v37 = vmul.f32 %v436_v22, %v428_v28  ;;  %511 = vrot.lane.b32.xlu0 %v440_v26, %s7265_s14  ;;  %v443_v41 = vmul.f32 %v435_v29, %v427_v34  ;;  %v430_v42 = vld [vmem:[%s7576_s13 + $0x38] sm:$0xff]  ;;  %v7716_v22 = vshrl.u32 %v11016_v13, 7  ;;  %s7271_s24 = smov 32   ;;  %s7272_s26 = smov 48  }
  0xaa   : > { %469 = vst.msk [vmem:[#allocation2 + $0x28] sm:$0x3] %vm465_vm1, %v11030_v0  ;;  %466 = vst.msk [vmem:[#allocation2 + $0x10] sm:$0x3] %vm465_vm1, %v11030_v0  ;;  %v437_v43 = vmul.f32 %v421_v36, %v413_v35  ;;  %v429_v45 = vld [vmem:[%s7576_s13 + $0x30] sm:$0xff]  ;;  %v446_v47 = vmul.f32 %v438_v38, %v430_v42  ;;  %v453_v52 = vsel %vm447_vm2, %v421_v36, 0.0  ;;  %v461_v53 = vadd.f32 %v460_v50, %v459_v48 }
  0xab   : > { %472 = vst.msk [vmem:[#allocation2 + $0x40] sm:$0x3] %vm465_vm1, %v11030_v0  ;;  %475 = vst.msk [vmem:[#allocation2 + $0x58] sm:$0x3] %vm465_vm1, %v11030_v0  ;;  %v454_v54 = vadd.f32 %v453_v52, %v452_v51  ;;  %s7273_s9 = smov 64   ;;  %s7274_s1 = smov 80  }
  0xac   : > { %478 = vst.msk [vmem:[#allocation2 + $0x70] sm:$0x3] %vm465_vm1, %v11030_v0  ;;  %481 = vst.msk [vmem:[#allocation2 + $0x88] sm:$0x3] %vm465_vm1, %v11030_v0  ;;  %v445_v49 = vmul.f32 %v437_v43, %v429_v45  ;;  %s7275_s11 = smov 96   ;;  %s7276_s20 = smov 112  }
  0xad   : > { %484 = vst.msk [vmem:[#allocation2 + $0xa0] sm:$0x3] %vm465_vm1, %v11030_v0  ;;  %487 = vst.msk [vmem:[#allocation2 + $0xb8] sm:$0x3] %vm465_vm1, %v11030_v0  ;;  %519 = vrot.lane.b32.xlu1 %v444_v37, %s7265_s14  ;;  %517 = vrot.lane.b32.xlu0 %v443_v41, %s7265_s14  ;;  %vm1093_vm6 = vcmask 261120   ;;  %vm1096_vm7 = vcmask 392192  }
  0xae   : > { %490 = vst.msk [vmem:[#allocation2 + $0xd0] sm:$0x3] %vm465_vm1, %v11030_v0  ;;  %11303 = vst [vmem:[#allocation27_spill] sm:$0xff] %v7716_v22  ;;  %vm1099_vm8 = vcmask 523264   ;;  %vm1102_vm9 = vcmask 654336   ;;  %vm1105_vm10 = vcmask 785408  }
  0xaf   : > { %vm1108_vm11 = vcmask 916480   ;;  %vm5688_vm12 = vcmask 1040384   ;;  %vm5718_vm13 = vcmask 1042432   ;;  %vm5703_vm14 = vcmask 1041408   ;;  %s6239_s10 = sshll.u32 %s7557_s21, 4  ;;  %s6240_s17 = sshll.u32 %s7557_s21, 1 }
  0xb0   : > { %vm5733_vm15 = vcmask 1043456   ;;  %vm5748_vm0 = vcmask 1044480   ;;  %vm5804_vm1 = vcmask 662528   ;;  %s6262_s15 = sshll.u32 %s7416_s29, 5  ;;  %s399_s22 = scalar_lea.vmem [#allocation12], %s6240_s17 }
  0xb1   : > { %523 = vrot.lane.b32.xlu1 %v446_v47, %s7265_s14  ;;  %521 = vrot.lane.b32.xlu0 %v445_v49, %s7265_s14  ;;  %s6023_s18 = sshll.u32 %s399_s22, 4  ;;  %s6261_s8 = sshll.u32 %s7416_s29, 8  ;;  %s10859_s18 = int_to_ptr.vmem [resolvable:$true] %s6023_s18 }
  0xb2   : > { %s406_s5 = scalar_lea.vmem [#allocation14], %s6239_s10  ;;  %p11764_p12 = scmp.ne.s32.totalorder %s11286_s16, 0 }
  0xb3   : > { %s6037_s12 = sshll.u32 %s406_s5, 4  ;;  %s10869_s12 = int_to_ptr.vmem [resolvable:$true] %s6037_s12 }
  0xb5   : > { %527 = vrot.lane.b32.xlu1 %v461_v53, %s7265_s14  ;;  %525 = vrot.lane.b32.xlu0 %v454_v54, %s7265_s14 }
  0xb9   : > { %531 = vrot.lane.b32.xlu1 %v424_v16, %s7265_s14  ;;  %529 = vrot.lane.b32.xlu0 %v423_v7, %s7265_s14  ;;  %v676_v16 = vunpack.c.l.s4 %v7267_v15 }
  0xbb   : > { %v677_v31 = vunpack.c.0.s8 %v676_v16 }
  0xbd   : > { %535 = vrot.lane.b32.xlu1 %v426_v11, %s7265_s14  ;;  %533 = vrot.lane.b32.xlu0 %v7632_v3, %s7265_s14  ;;  %v7266_v11 = vmov 1983009808  }
  0xbe   : > { %v612_v12 = vunpack.c.l.s4 %v7266_v11 }
  0xc0   : > { %v613_v21 = vunpack.c.0.s8 %v612_v12 }
  0xc1   : > { %539 = vrot.lane.b32.xlu1 %v428_v28, %s7265_s14  ;;  %537 = vrot.lane.b32.xlu0 %v427_v34, %s7265_s14 }
  0xc2   : > { %v7748_v37 = vsub.s32 %v613_v21, %v7716_v22 }
  0xc4   : > { %11305 = vst [vmem:[#allocation29_spill] sm:$0xff] %v7748_v37 }
  0xc5   : > { %543 = vrot.lane.b32.xlu1 %v430_v42, %s7265_s14  ;;  %541 = vrot.lane.b32.xlu0 %v429_v45, %s7265_s14  ;;  %v7770_v45 = vsub.s32 %v677_v31, %v7716_v22  ;;  %s10857_s14 = scalar_lea.hbm %s10990_s6, %s6262_s15 }
  0xc7   : > { %11306 = vst [vmem:[#allocation30_spill] sm:$0xff] %v7770_v45 }
 0x117   : > { %v514_v55 = vpop.permute.xlu1 %513  ;;  %v510_v56 = vpop.permute.xlu0 %509 }
 0x118   : > { %566 = vst.msk [vmem:[#allocation2 + $0x19] sm:$0xff] %vm563_vm3, %v514_v55  ;;  %564 = vst.msk [vmem:[#allocation2 + $0x1] sm:$0xff] %vm563_vm3, %v510_v56 }
 0x11b   : > { %v516_v57 = vpop.permute.xlu1 %515  ;;  %v512_v58 = vpop.permute.xlu0 %511 }
 0x11c   : > { %567 = vst.msk [vmem:[#allocation2 + $0x21] sm:$0xff] %vm563_vm3, %v516_v57  ;;  %565 = vst.msk [vmem:[#allocation2 + $0x9] sm:$0xff] %vm563_vm3, %v512_v58 }
 0x11f   : > { %v520_v59 = vpop.permute.xlu1 %519  ;;  %v518_v60 = vpop.permute.xlu0 %517  ;;  %v7727_v26 = vld [vmem:[#allocation2 + $0x18] sm:$0xff]  ;;  %v7729_v28 = vld [vmem:[#allocation2] sm:$0xff] }
 0x120   : > { %569 = vst.msk [vmem:[#allocation2 + $0x39] sm:$0xff] %vm563_vm3, %v520_v59  ;;  %568 = vst.msk [vmem:[#allocation2 + $0x31] sm:$0xff] %vm563_vm3, %v518_v60  ;;  %v2286_v42 = vrot.slane %v7727_v26, 1  ;;  %v2281_v12 = vrot.slane %v7729_v28, 1 }
 0x123   : > { %v524_v61 = vpop.permute.xlu1 %523  ;;  %v522_v62 = vpop.permute.xlu0 %521  ;;  %v7690_v63 = vld [vmem:[#allocation2 + $0x8] sm:$0xff]  ;;  %v7692_v1 = vld [vmem:[#allocation2 + $0x10] sm:$0x3]  ;;  %v7755_v38 = vld [vmem:[#allocation2 + $0x20] sm:$0xff] }
 0x124   : > { %571 = vst.msk [vmem:[#allocation2 + $0x51] sm:$0xff] %vm563_vm3, %v524_v61  ;;  %570 = vst.msk [vmem:[#allocation2 + $0x49] sm:$0xff] %vm563_vm3, %v522_v62  ;;  %v11017_v2 = vrot.slane %v7690_v63, 2  ;;  %v3986_v3 = vrot.slane %v7692_v1, 2 }
 0x126   : > { %v7701_v6 = vsel %vm3982_vm4, %v11017_v2, %v3986_v3 }
 0x127   : > { %v528_v4 = vpop.permute.xlu1 %527  ;;  %v526_v5 = vpop.permute.xlu0 %525  ;;  %11302 = vst [vmem:[#allocation26_spill] sm:$0xff] %v7701_v6  ;;  %v7725_v25 = vld [vmem:[#allocation2 + $0x30] sm:$0xff]  ;;  %v7757_v39 = vld [vmem:[#allocation2 + $0x38] sm:$0xff] }
 0x128   : > { %573 = vst.msk [vmem:[#allocation2 + $0x69] sm:$0xff] %vm563_vm3, %v528_v4  ;;  %572 = vst.msk [vmem:[#allocation2 + $0x61] sm:$0xff] %vm563_vm3, %v526_v5  ;;  %v609_v36 = vcombine.low %v7729_v28, %v7725_v25  ;;  %v11025_v48 = vrot.slane %v7757_v39, 1  ;;  %v2291_v49 = vrot.slane %v7725_v25, 1  ;;  %v794_v52 = vcombine.low %v7690_v63, %v7757_v39 }
 0x129   : > { %v795_v11 = vcombine.high %v7690_v63, %v7757_v39 }
 0x12a   : > { %v7781_v51 = vrot.slane %v609_v36, %v7748_v37  ;;  %v802_v15 = vrot.slane %v794_v52, %v7748_v37 }
 0x12b   : > { %v532_v7 = vpop.permute.xlu1 %531  ;;  %v530_v8 = vpop.permute.xlu0 %529  ;;  %v7713_v20 = vld [vmem:[#allocation2 + $0x48] sm:$0xff]  ;;  %v7731_v29 = vld [vmem:[#allocation2 + $0x50] sm:$0xff]  ;;  %v809_v52 = vrot.slane %v795_v11, %v7748_v37 }
 0x12c   : > { %575 = vst.msk [vmem:[#allocation2 + $0x81] sm:$0xff] %vm563_vm3, %v532_v7  ;;  %574 = vst.msk [vmem:[#allocation2 + $0x79] sm:$0xff] %vm563_vm3, %v530_v8  ;;  %v625_v30 = vcombine.low %v7727_v26, %v7713_v20  ;;  %v810_v41 = vcombine.low %v7755_v38, %v7731_v29  ;;  %v811_v59 = vcombine.high %v7755_v38, %v7731_v29  ;;  %v11024_v8 = vrot.slane %v7690_v63, 1 }
 0x12d   : > { %v2296_v21 = vrot.slane %v7713_v20, 1 }
 0x12e   : > { %v7765_v43 = vrot.slane %v625_v30, %v7748_v37  ;;  %v818_v57 = vrot.slane %v810_v41, %v7748_v37  ;;  %v7850_v41 = vsel %vm2280_vm5, %v2281_v12, %v11024_v8 }
 0x12f   : > { %v536_v9 = vpop.permute.xlu1 %535  ;;  %v534_v10 = vpop.permute.xlu0 %533  ;;  %v7759_v40 = vld [vmem:[#allocation2 + $0x60] sm:$0xff]  ;;  %v7778_v50 = vld [vmem:[#allocation2 + $0x68] sm:$0xff]  ;;  %11311 = vst [vmem:[#allocation35_spill] sm:$0xff] %v7850_v41 }
 0x130   : > { %577 = vst.msk [vmem:[#allocation2 + $0x99] sm:$0xff] %vm563_vm3, %v536_v9  ;;  %576 = vst.msk [vmem:[#allocation2 + $0x91] sm:$0xff] %vm563_vm3, %v534_v10  ;;  %v673_v3 = vcombine.low %v7781_v51, %v7765_v43  ;;  %v11020_v9 = vrot.slane %v7755_v38, 1 }
 0x132   : > { %v7842_v30 = vrot.slane %v673_v3, %v7770_v45  ;;  %v859_v3 = vcombine.high %v802_v15, %v818_v57 }
 0x133   : > { %v540_v14 = vpop.permute.xlu1 %539  ;;  %v538_v17 = vpop.permute.xlu0 %537  ;;  %v7709_v18 = vld [vmem:[#allocation2 + $0x80] sm:$0xff]  ;;  %v7711_v19 = vld [vmem:[#allocation2 + $0x78] sm:$0xff] }
 0x134   : > { %579 = vst.msk [vmem:[#allocation2 + $0xb1] sm:$0xff] %vm563_vm3, %v540_v14  ;;  %578 = vst.msk [vmem:[#allocation2 + $0xa9] sm:$0xff] %vm563_vm3, %v538_v17  ;;  %1165 = vrot.lane.b32.xlu1 %v7709_v18, %s7268_s27  ;;  %v11018_v23 = vrot.slane %v7709_v18, 1  ;;  %1163 = vrot.lane.b32.xlu0 %v7711_v19, %s7268_s27  ;;  %v2306_v24 = vrot.slane %v7711_v19, 1  ;;  %v11023_v17 = vrot.slane %v7731_v29, 1 }
 0x135   : > { %11309 = vst [vmem:[#allocation33_spill] sm:$0xff] %v7842_v30 }
 0x136   : > { %v7738_v32 = vsel %vm2280_vm5, %v2306_v24, %v11018_v23  ;;  %v825_v24 = vrot.slane %v811_v59, %v7748_v37 }
 0x137   : > { %v544_v27 = vpop.permute.xlu1 %543  ;;  %11304 = vst [vmem:[#allocation28_spill] sm:$0xff] %v7738_v32  ;;  %v542_v33 = vpop.permute.xlu0 %541  ;;  %v7741_v34 = vld [vmem:[#allocation2 + $0x98] sm:$0xff]  ;;  %v7743_v35 = vld [vmem:[#allocation2 + $0x90] sm:$0xff] }
 0x138   : > { %581 = vst.msk [vmem:[#allocation2 + $0xc9] sm:$0xff] %vm563_vm3, %v544_v27  ;;  %580 = vst.msk [vmem:[#allocation2 + $0xc1] sm:$0xff] %vm563_vm3, %v542_v33  ;;  %1169 = vrot.lane.b32.xlu1 %v7741_v34, %s7268_s27  ;;  %1167 = vrot.lane.b32.xlu0 %v7743_v35, %s7268_s27  ;;  %v641_v44 = vcombine.low %v7759_v40, %v7743_v35  ;;  %v826_v56 = vcombine.low %v7778_v50, %v7741_v34  ;;  %v2311_v13 = vrot.slane %v7743_v35, 1 }
 0x139   : > { %v7839_v27 = vsel %vm2280_vm5, %v2291_v49, %v11025_v48  ;;  %v858_v33 = vcombine.low %v802_v15, %v818_v57  ;;  %v874_v11 = vcombine.low %v809_v52, %v825_v24  ;;  %v875_v12 = vcombine.high %v809_v52, %v825_v24 }
 0x13a   : > { %v7803_v61 = vrot.slane %v641_v44, %v7748_v37  ;;  %v834_v16 = vrot.slane %v826_v56, %v7748_v37  ;;  %11308 = vst [vmem:[#allocation32_spill] sm:$0xff] %v7839_v27  ;;  %v7855_v44 = vsel %vm2280_vm5, %v2286_v42, %v11020_v9  ;;  %v2301_v42 = vrot.slane %v7759_v40, 1 }
 0x13b   : > { %v7772_v46 = vld [vmem:[#allocation2 + $0xb0] sm:$0xff]  ;;  %v7774_v47 = vld [vmem:[#allocation2 + $0xa8] sm:$0xff]  ;;  %11312 = vst [vmem:[#allocation36_spill] sm:$0xff] %v7855_v44  ;;  %v827_v56 = vcombine.high %v7778_v50, %v7741_v34  ;;  %v7876_v59 = vrot.slane %v858_v33, %v7770_v45  ;;  %v873_v33 = vrot.slane %v859_v3, %v7770_v45  ;;  %v882_v52 = vrot.slane %v874_v11, %v7770_v45 }
 0x13c   : > { %1173 = vrot.lane.b32.xlu1 %v7772_v46, %s7268_s27  ;;  %v11019_v53 = vrot.slane %v7772_v46, 1  ;;  %1171 = vrot.lane.b32.xlu0 %v7774_v47, %s7268_s27  ;;  %v2316_v54 = vrot.slane %v7774_v47, 1  ;;  %v657_v55 = vcombine.low %v7711_v19, %v7774_v47  ;;  %v842_v58 = vcombine.low %v7709_v18, %v7772_v46 }
 0x13d   : > { %v843_v60 = vcombine.high %v7709_v18, %v7772_v46  ;;  %11314 = vst [vmem:[#allocation38_spill] sm:$0xff] %v7876_v59  ;;  %v841_v24 = vrot.slane %v827_v56, %v7748_v37  ;;  %v889_v23 = vrot.slane %v875_v12, %v7770_v45 }
 0x13e   : > { %v7806_v62 = vrot.slane %v657_v55, %v7748_v37  ;;  %v7813_v4 = vsel %vm2280_vm5, %v2316_v54, %v11019_v53  ;;  %v850_v10 = vrot.slane %v842_v58, %v7748_v37  ;;  %v2344_v54 = vcombine.low %v7850_v41, %v7839_v27 }
 0x13f   : > { %11307 = vst [vmem:[#allocation31_spill] sm:$0xff] %v7813_v4  ;;  %v7815_v5 = vld [vmem:[#allocation2 + $0xc8] sm:$0xff]  ;;  %v7817_v7 = vld [vmem:[#allocation2 + $0xc0] sm:$0xff]  ;;  %v11021_v55 = vrot.slane %v7778_v50, 1  ;;  %v7873_v58 = vsel %vm2280_vm5, %v2296_v21, %v11023_v17  ;;  %v857_v2 = vrot.slane %v843_v60, %v7748_v37 }
 0x140   : > { %1177 = vrot.lane.b32.xlu1 %v7815_v5, %s7268_s27  ;;  %1175 = vrot.lane.b32.xlu0 %v7817_v7, %s7268_s27  ;;  %v705_v14 = vcombine.low %v7803_v61, %v7806_v62  ;;  %v890_v36 = vcombine.low %v834_v16, %v850_v10  ;;  %11313 = vst [vmem:[#allocation37_spill] sm:$0xff] %v7873_v58  ;;  %v2321_v3 = vrot.slane %v7817_v7, 1 }
 0x141   : > { %v7890_v57 = vrot.slane %v7815_v5, %v7748_v37  ;;  %v2360_v15 = vcombine.low %v7855_v44, %v7873_v58  ;;  %v7898_v60 = vrot.slane %v2344_v54, %v7748_v37  ;;  %v906_v9 = vcombine.low %v841_v24, %v857_v2 }
 0x142   : > { %v7845_v31 = vrot.slane %v705_v14, %v7770_v45  ;;  %v11022_v14 = vrot.slane %v7741_v34, 1  ;;  %v7881_v49 = vrot.slane %v890_v36, %v7770_v45  ;;  %v891_v36 = vcombine.high %v834_v16, %v850_v10 }
 0x143   : > { %11316 = vst [vmem:[#allocation40_spill] sm:$0xff] %v7898_v60  ;;  %v945_v53 = vcombine.high %v7890_v57, %v11030_v0  ;;  %v7908_v21 = vsel %vm2280_vm5, %v2301_v42, %v11021_v55  ;;  %v930_v56 = vcombine.high %v7815_v5, %v11030_v0  ;;  %v7924_v42 = vrot.slane %v2360_v15, %v7748_v37 }
 0x144   : > { %11310 = vst [vmem:[#allocation34_spill] sm:$0xff] %v7845_v31  ;;  %1729 = vrot.lane.b32.xlu1 %v7709_v18, %s7269_s28  ;;  %1727 = vrot.lane.b32.xlu0 %v7711_v19, %s7269_s28  ;;  %11315 = vst [vmem:[#allocation39_spill] sm:$0xff] %v7881_v49  ;;  %v7913_v54 = vsel %vm2280_vm5, %v2311_v13, %v11022_v14  ;;  %v905_v16 = vrot.slane %v891_v36, %v7770_v45 }
 0x145   : > { %11317 = vst [vmem:[#allocation41_spill] sm:$0xff] %v7908_v21  ;;  %11318 = vst [vmem:[#allocation42_spill] sm:$0xff] %v7913_v54  ;;  %v959_v13 = vrot.slane %v945_v53, %v7770_v45  ;;  %v914_v11 = vrot.slane %v906_v9, %v7770_v45  ;;  %v907_v12 = vcombine.high %v841_v24, %v857_v2 }
 0x146   : > { %11319 = vst [vmem:[#allocation43_spill] sm:$0xff] %v7924_v42  ;;  %v924_v55 = vcombine.low %v873_v33, %v905_v16  ;;  %v944_v14 = vrot.slane %v930_v56, %v7748_v37  ;;  %v2376_v17 = vcombine.low %v7908_v21, %v7913_v54  ;;  %v2392_v36 = vcombine.low %v7738_v32, %v7813_v4 }
 0x147   : > { %v925_v8 = vcombine.high %v873_v33, %v905_v16  ;;  %v976_v15 = vcombine.high %v959_v13, %v11030_v0  ;;  %v926_v48 = vcombine.low %v882_v52, %v914_v11  ;;  %v921_v10 = vrot.slane %v907_v12, %v7770_v45 }
 0x148   : > { %1733 = vrot.lane.b32.xlu1 %v7741_v34, %s7269_s28  ;;  %1731 = vrot.lane.b32.xlu0 %v7743_v35, %s7269_s28  ;;  %v7940_v2 = vpack.i.bf16 %v959_v13, %v924_v55  ;;  %v967_v53 = vrot.slane %v944_v14, %v7770_v45  ;;  %v960_v9 = vcombine.high %v944_v14, %v11030_v0  ;;  %v11322_v56 = vrot.slane %v7815_v5, 1 }
 0x149   : > { %v7944_v24 = vpack.i.bf16 %v976_v15, %v925_v8  ;;  %v927_v33 = vcombine.high %v882_v52, %v914_v11  ;;  %v928_v16 = vcombine.low %v889_v23, %v921_v10  ;;  %v7956_v13 = vrot.slane %v2392_v36, %v7748_v37  ;;  %v7974_v36 = vld [vmem:[#allocation2 + $0x58] sm:$0x3] }
 0x14a   : > { %11320 = vst [vmem:[#allocation44_spill] sm:$0xff] %v7940_v2  ;;  %v7949_v12 = vsel %vm2280_vm5, %v2321_v3, %v11322_v56  ;;  %v977_v22 = vcombine.high %v967_v53, %v11030_v0  ;;  %v7952_v21 = vpack.i.bf16 %v967_v53, %v926_v48  ;;  %v974_v55 = vrot.slane %v960_v9, %v7770_v45  ;;  %v7958_v2 = vld [vmem:[#allocation2 + $0x40] sm:$0x3]  ;;  %v7985_v9 = vld [vmem:[#allocation2 + $0xb8] sm:$0x3] }
 0x14b   : > { %11321 = vst [vmem:[#allocation45_spill] sm:$0xff] %v7944_v24  ;;  %11323 = vst [vmem:[#allocation46_spill] sm:$0xff] %v7949_v12  ;;  %v929_v8 = vcombine.high %v889_v23, %v921_v10  ;;  %v7961_v14 = vrot.slane %v2376_v17, %v7748_v37  ;;  %v2408_v52 = vcombine.low %v7898_v60, %v7924_v42  ;;  %v7978_v17 = vld [vmem:[#allocation2 + $0x28] sm:$0x3]  ;;  %v2294_v10 = vrot.slane %v7958_v2, 1 }
 0x14c   : > { %1737 = vrot.lane.b32.xlu1 %v7772_v46, %s7269_s28  ;;  %1735 = vrot.lane.b32.xlu0 %v7774_v47, %s7269_s28  ;;  %11324 = vst [vmem:[#allocation47_spill] sm:$0xff] %v7952_v21  ;;  %v7969_v48 = vpack.i.bf16 %v977_v22, %v927_v33  ;;  %v978_v3 = vcombine.high %v974_v55, %v11030_v0  ;;  %v7983_v53 = vld [vmem:[#allocation2 + $0xa0] sm:$0x3]  ;;  %v599_v56 = vld [vmem:[#allocation2 + $0x88] sm:$0x3]  ;;  %v2299_v0 = vrot.slane %v7974_v36, 1 }
 0x14d   : > { %11325 = vst [vmem:[#allocation48_spill] sm:$0xff] %v7961_v14  ;;  %v7972_v11 = vpack.i.bf16 %v974_v55, %v928_v16  ;;  %v2440_v23 = vcombine.low %v7961_v14, %v7956_v13  ;;  %v7988_v22 = vrot.slane %v2408_v52, %v7770_v45  ;;  %v7993_v16 = vld [vmem:[#allocation2 + $0x70] sm:$0x3]  ;;  %v2284_v55 = vrot.slane %v7692_v1, 1 }
 0x14e   : > { %11326 = vst [vmem:[#allocation49_spill] sm:$0xff] %v7969_v48  ;;  %v7981_v15 = vpack.i.bf16 %v978_v3, %v929_v8  ;;  %v2289_v8 = vrot.slane %v7978_v17, 1  ;;  %v11331_v3 = vrot.slane %v7757_v39, 1  ;;  %v2314_v1 = vrot.slane %v7983_v53, 1 }
 0x14f   : > { %11327 = vst [vmem:[#allocation50_spill] sm:$0xff] %v7972_v11  ;;  %11329 = vst [vmem:[#allocation52_spill] sm:$0xff] %v7988_v22  ;;  %v7991_v33 = vrot.slane %v2440_v23, %v7770_v45  ;;  %v2319_v11 = vrot.slane %v7985_v9, 1  ;;  %v2309_v21 = vrot.slane %v599_v56, 1  ;;  %v11333_v48 = vrot.slane %v7690_v63, 1 }
 0x150   : > { %1741 = vrot.lane.b32.xlu1 %v7815_v5, %s7269_s28  ;;  %1739 = vrot.lane.b32.xlu0 %v7817_v7, %s7269_s28  ;;  %11328 = vst [vmem:[#allocation51_spill] sm:$0xff] %v7981_v15  ;;  %v8007_v23 = vsel %vm2280_vm5, %v11331_v3, %v2294_v10  ;;  %v2304_v15 = vrot.slane %v7993_v16, 1  ;;  %v11335_v60 = vrot.slane %v7731_v29, 1  ;;  %v11337_v3 = vrot.slane %v7755_v38, 1 }
 0x151   : > { %11330 = vst [vmem:[#allocation53_spill] sm:$0xff] %v7991_v33  ;;  %11332 = vst [vmem:[#allocation54_spill] sm:$0xff] %v8007_v23  ;;  %v8015_v24 = vsel %vm2280_vm5, %v11333_v48, %v2284_v55  ;;  %v11339_v48 = vrot.slane %v7741_v34, 1  ;;  %v11343_v33 = vrot.slane %v7778_v50, 1  ;;  %v3989_v12 = vrot.slane %v7755_v38, 2 }
 0x152   : > { %11334 = vst [vmem:[#allocation55_spill] sm:$0xff] %v8015_v24  ;;  %v8020_v52 = vsel %vm2280_vm5, %v11335_v60, %v2299_v0  ;;  %v2529_v10 = vcombine.low %v8015_v24, %v8007_v23  ;;  %v8031_v22 = vsel %vm2280_vm5, %v11337_v3, %v2289_v8  ;;  %v11341_v0 = vrot.slane %v7772_v46, 1 }
 0x153   : > { %11336 = vst [vmem:[#allocation56_spill] sm:$0xff] %v8020_v52  ;;  %11338 = vst [vmem:[#allocation57_spill] sm:$0xff] %v8031_v22  ;;  %v8036_v55 = vsel %vm2280_vm5, %v11339_v48, %v2314_v1  ;;  %v8046_v42 = vsel %vm2280_vm5, %v11343_v33, %v2304_v15  ;;  %v11345_v24 = vrot.slane %v7709_v18, 1  ;;  %v2545_v3 = vcombine.low %v8031_v22, %v8020_v52 }
 0x154   : > { %1145 = vrot.lane.b32.xlu1 %v7690_v63, %s7268_s27  ;;  %1143 = vrot.lane.b32.xlu0 %v7729_v28, %s7268_s27  ;;  %11340 = vst [vmem:[#allocation58_spill] sm:$0xff] %v8036_v55  ;;  %v8041_v60 = vsel %vm2280_vm5, %v11341_v0, %v2319_v11  ;;  %11344 = vst [vmem:[#allocation60_spill] sm:$0xff] %v8046_v42  ;;  %v2561_v1 = vcombine.low %v8046_v42, %v8036_v55  ;;  %v4009_v23 = vrot.slane %v7709_v18, 2 }
 0x155   : > { %11342 = vst [vmem:[#allocation59_spill] sm:$0xff] %v8041_v60  ;;  %v8051_v8 = vsel %vm2280_vm5, %v11345_v24, %v2309_v21  ;;  %v8064_v15 = vrot.slane %v2529_v10, %v7748_v37  ;;  %v8067_v21 = vrot.slane %v2545_v3, %v7748_v37  ;;  %v706_v18 = vcombine.high %v7803_v61, %v7806_v62 }
 0x156   : > { %11346 = vst [vmem:[#allocation61_spill] sm:$0xff] %v8051_v8  ;;  %v2577_v11 = vcombine.low %v8051_v8, %v8041_v60  ;;  %v8070_v24 = vrot.slane %v2561_v1, %v7748_v37  ;;  %v658_v1 = vcombine.high %v7711_v19, %v7774_v47  ;;  %v4008_v14 = vrot.slane %v7711_v19, 2 }
 0x157   : > { %11347 = vst [vmem:[#allocation62_spill] sm:$0xff] %v8064_v15  ;;  %11348 = vst [vmem:[#allocation63_spill] sm:$0xff] %v8067_v21  ;;  %v2593_v48 = vcombine.low %v8064_v15, %v8067_v21  ;;  %v626_v15 = vcombine.high %v7727_v26, %v7713_v20  ;;  %v720_v52 = vrot.slane %v706_v18, %v7770_v45 }
 0x158   : > { %1149 = vrot.lane.b32.xlu1 %v7755_v38, %s7268_s27  ;;  %1147 = vrot.lane.b32.xlu0 %v7727_v26, %s7268_s27  ;;  %11349 = vst [vmem:[#allocation64_spill] sm:$0xff] %v8070_v24  ;;  %v8073_v33 = vrot.slane %v2577_v11, %v7748_v37  ;;  %v672_v21 = vrot.slane %v658_v1, %v7748_v37  ;;  %v4011_v11 = vrot.slane %v599_v56, 2  ;;  %v4021_v1 = vrot.slane %v7985_v9, 2 }
 0x159   : > { %v8084_v10 = vrot.slane %v2593_v48, %v7770_v45  ;;  %v642_v48 = vcombine.high %v7759_v40, %v7743_v35  ;;  %v11353_v56 = vmov 0.0   ;;  %v674_v9 = vcombine.high %v7781_v51, %v7765_v43 }
 0x15a   : > { %11350 = vst [vmem:[#allocation65_spill] sm:$0xff] %v8073_v33  ;;  %v2625_v0 = vcombine.low %v8070_v24, %v8073_v33  ;;  %v11064_v33 = vrot.slane %v7772_v46, 2  ;;  %v745_v42 = vcombine.high %v7817_v7, %v11353_v56  ;;  %v4016_v43 = vrot.slane %v7983_v53, 2 }
 0x15b   : > { %11351 = vst [vmem:[#allocation66_spill] sm:$0xff] %v8084_v10  ;;  %v640_v10 = vrot.slane %v626_v15, %v7748_v37  ;;  %v656_v24 = vrot.slane %v642_v48, %v7748_v37  ;;  %v8121_v15 = vsel %vm3982_vm4, %v4009_v23, %v4011_v11 }
 0x15c   : > { %1153 = vrot.lane.b32.xlu1 %v7757_v39, %s7268_s27  ;;  %1151 = vrot.lane.b32.xlu0 %v7725_v25, %s7268_s27  ;;  %v8087_v3 = vrot.slane %v2625_v0, %v7770_v45  ;;  %v610_v0 = vcombine.high %v7729_v28, %v7725_v25  ;;  %11354 = vst [vmem:[#allocation68_spill] sm:$0xff] %v8121_v15 }
 0x15d   : > { %v721_v22 = vcombine.low %v656_v24, %v672_v21  ;;  %v8136_v11 = vsel %vm3982_vm4, %v11064_v33, %v4021_v1  ;;  %v759_v60 = vrot.slane %v745_v42, %v7748_v37  ;;  %v722_v61 = vcombine.high %v656_v24, %v672_v21 }
 0x15e   : > { %11352 = vst [vmem:[#allocation67_spill] sm:$0xff] %v8087_v3  ;;  %v752_v3 = vrot.slane %v7817_v7, %v7748_v37  ;;  %v624_v55 = vrot.slane %v610_v0, %v7748_v37  ;;  %11356 = vst [vmem:[#allocation70_spill] sm:$0xff] %v8136_v11  ;;  %v3988_v0 = vrot.slane %v7727_v26, 2  ;;  %v11357_v42 = vrot.slane %v7741_v34, 2 }
 0x15f   : > { %v729_v51 = vrot.slane %v721_v22, %v7770_v45  ;;  %v782_v18 = vrot.slane %v759_v60, %v7770_v45 }
 0x160   : > { %1157 = vrot.lane.b32.xlu1 %v7731_v29, %s7268_s27  ;;  %1155 = vrot.lane.b32.xlu0 %v7713_v20, %s7268_s27  ;;  %v8131_v62 = vrot.slane %v752_v3, %v7770_v45  ;;  %v689_v48 = vcombine.low %v624_v55, %v640_v10  ;;  %v760_v8 = vcombine.high %v752_v3, %v11353_v56  ;;  %v3991_v3 = vrot.slane %v7978_v17, 2 }
 0x161   : > { %v8155_v53 = vsel %vm3982_vm4, %v11357_v42, %v4016_v43  ;;  %v690_v21 = vcombine.high %v624_v55, %v640_v10  ;;  %v8168_v43 = vsel %vm3982_vm4, %v3988_v0, %v3989_v12  ;;  %v8171_v42 = vsel %vm3982_vm4, %v4008_v14, %v4009_v23 }
 0x162   : > { %11355 = vst [vmem:[#allocation69_spill] sm:$0xff] %v8131_v62  ;;  %11358 = vst [vmem:[#allocation71_spill] sm:$0xff] %v8155_v53  ;;  %v790_v19 = vcombine.high %v8131_v62, %v11353_v56  ;;  %v697_v22 = vrot.slane %v689_v48, %v7770_v45  ;;  %v774_v1 = vrot.slane %v760_v8, %v7770_v45  ;;  %v3996_v10 = vrot.slane %v7958_v2, 2 }
 0x163   : > { %11359 = vst [vmem:[#allocation72_spill] sm:$0xff] %v8168_v43  ;;  %11360 = vst [vmem:[#allocation73_spill] sm:$0xff] %v8171_v42  ;;  %v775_v55 = vcombine.high %v759_v60, %v11353_v56  ;;  %v8179_v8 = vsel %vm3982_vm4, %v3989_v12, %v3991_v3  ;;  %v704_v14 = vrot.slane %v690_v21, %v7770_v45  ;;  %v3994_v23 = vrot.slane %v7757_v39, 2  ;;  %v8187_v60 = vld [vmem:[#allocation2 + $0xd0] sm:$0x3] }
 0x164   : > { %1709 = vrot.lane.b32.xlu1 %v7690_v63, %s7269_s28  ;;  %1707 = vrot.lane.b32.xlu0 %v7729_v28, %s7269_s28  ;;  %v741_v17 = vcombine.low %v697_v22, %v729_v51  ;;  %11361 = vst [vmem:[#allocation74_spill] sm:$0xff] %v8179_v8  ;;  %v792_v62 = vcombine.high %v782_v18, %v11353_v56  ;;  %v3999_v2 = vrot.slane %v7731_v29, 2 }
 0x166   : > { %v6406_v12 = vpack.i.bf16 %v782_v18, %v741_v17 }
 0x168   : > { %1713 = vrot.lane.b32.xlu1 %v7755_v38, %s7269_s28  ;;  %1711 = vrot.lane.b32.xlu0 %v7727_v26, %s7269_s28  ;;  %v688_v26 = vrot.slane %v674_v9, %v7770_v45  ;;  %v738_v38 = vcombine.high %v7842_v30, %v7845_v31  ;;  %v8165_v9 = vrot.slane %v722_v61, %v7770_v45  ;;  %v4018_v61 = vrot.slane %v7774_v47, 2 }
 0x169   : > { %v791_v31 = vcombine.high %v774_v1, %v11353_v56  ;;  %v742_v30 = vcombine.high %v697_v22, %v729_v51  ;;  %v4001_v47 = vrot.slane %v7974_v36, 2  ;;  %v3993_v51 = vrot.slane %v7725_v25, 2 }
 0x16a   : > { %v739_v24 = vcombine.low %v688_v26, %v720_v52  ;;  %v6391_v48 = vpack.i.bf16 %v790_v19, %v738_v38  ;;  %v740_v0 = vcombine.high %v688_v26, %v720_v52  ;;  %v743_v3 = vcombine.low %v704_v14, %v8165_v9 }
 0x16b   : > { %v8197_v52 = vrot.slane %v7890_v57, %v7770_v45  ;;  %v11363_v26 = vrot.slane %v7772_v46, 2  ;;  %v3998_v36 = vrot.slane %v7713_v20, 2  ;;  %v4013_v38 = vrot.slane %v7743_v35, 2 }
 0x16c   : > { %1717 = vrot.lane.b32.xlu1 %v7757_v39, %s7269_s28  ;;  %1715 = vrot.lane.b32.xlu0 %v7725_v25, %s7269_s28  ;;  %v6396_v33 = vpack.i.bf16 %v774_v1, %v739_v24  ;;  %v789_v39 = vrot.slane %v775_v55, %v7770_v45  ;;  %v4024_v19 = vrot.slane %v7815_v5, 2  ;;  %v6401_v22 = vpack.i.bf16 %v791_v31, %v740_v0 }
 0x16d   : > { %11362 = vst [vmem:[#allocation75_spill] sm:$0xff] %v8197_v52  ;;  %v6411_v21 = vpack.i.bf16 %v792_v62, %v742_v30  ;;  %v923_v57 = vcombine.high %v7876_v59, %v7881_v49  ;;  %v4023_v25 = vrot.slane %v7817_v7, 2  ;;  %v8213_v46 = vsel %vm3982_vm4, %v3999_v2, %v4001_v47 }
 0x16e   : > { %11365 = vst [vmem:[#allocation77_spill] sm:$0xff] %v8213_v46  ;;  %v4004_v24 = vrot.slane %v7778_v50, 2  ;;  %v4003_v35 = vrot.slane %v7759_v40, 2  ;;  %v744_v30 = vcombine.high %v704_v14, %v8165_v9  ;;  %v3983_v31 = vrot.slane %v7729_v28, 2 }
 0x16f   : > { %v8226_v62 = vsel %vm3982_vm4, %v4023_v25, %v4024_v19  ;;  %v11369_v1 = vrot.slane %v7741_v34, 2  ;;  %v6416_v28 = vpack.i.bf16 %v789_v39, %v743_v3  ;;  %v4247_v17 = vcombine.low %v8179_v8, %v8213_v46 }
 0x170   : > { %1721 = vrot.lane.b32.xlu1 %v7731_v29, %s7269_s28  ;;  %1719 = vrot.lane.b32.xlu0 %v7713_v20, %s7269_s28  ;;  %v8203_v29 = vsel %vm3982_vm4, %v4018_v61, %v11363_v26  ;;  %v4006_v20 = vrot.slane %v7993_v16, 2  ;;  %11367 = vst [vmem:[#allocation79_spill] sm:$0xff] %v8226_v62  ;;  %v8232_v16 = vsel %vm3982_vm4, %v3998_v36, %v3999_v2  ;;  %v11375_v47 = vrot.slane %v7690_v63, 2  ;;  %v11411_v62 = vld [vmem:[#allocation65_spill] sm:$0xff] }
 0x171   : > { %11364 = vst [vmem:[#allocation76_spill] sm:$0xff] %v8203_v29  ;;  %11368 = vst [vmem:[#allocation80_spill] sm:$0xff] %v8232_v16  ;;  %v8237_v18 = vsel %vm3982_vm4, %v4013_v38, %v11369_v1  ;;  %v4279_v9 = vcombine.low %v8121_v15, %v8136_v11  ;;  %v4094_v55 = vcombine.low %v8171_v42, %v8203_v29  ;;  %v11416_v42 = vld [vmem:[#allocation63_spill] sm:$0xff] }
 0x172   : > { %11370 = vst [vmem:[#allocation81_spill] sm:$0xff] %v8237_v18  ;;  %v8246_v61 = vsel %vm3982_vm4, %v3994_v23, %v3996_v10  ;;  %v8252_v34 = vsel %vm3982_vm4, %v3993_v51, %v3994_v23  ;;  %v8255_v0 = vsel %vm3982_vm4, %v4003_v35, %v4004_v24  ;;  %v4062_v10 = vcombine.low %v8168_v43, %v8232_v16 }
 0x173   : > { %11371 = vst [vmem:[#allocation82_spill] sm:$0xff] %v8246_v61  ;;  %11373 = vst [vmem:[#allocation84_spill] sm:$0xff] %v8252_v34  ;;  %v2393_v2 = vcombine.high %v7738_v32, %v7813_v4  ;;  %v4231_v51 = vcombine.low %v7701_v6, %v8246_v61  ;;  %v8275_v26 = vrot.slane %v4279_v9, %v7748_v37  ;;  %v11388_v9 = vld [vmem:[#allocation43_spill] sm:$0xff] }
 0x174   : > { %1161 = vrot.lane.b32.xlu1 %v7778_v50, %s7268_s27  ;;  %1159 = vrot.lane.b32.xlu0 %v7759_v40, %s7268_s27  ;;  %11374 = vst [vmem:[#allocation85_spill] sm:$0xff] %v8255_v0  ;;  %v8280_v38 = vrot.slane %v4094_v55, %v7748_v37  ;;  %v2361_v63 = vcombine.high %v7855_v44, %v7873_v58  ;;  %v11389_v55 = vld [vmem:[#allocation40_spill] sm:$0xff] }
 0x175   : > { %11377 = vst [vmem:[#allocation87_spill] sm:$0xff] %v8275_v26  ;;  %v8297_v25 = vrot.slane %v4062_v10, %v7748_v37 }
 0x176   : > { %11378 = vst [vmem:[#allocation88_spill] sm:$0xff] %v8280_v38 }
 0x177   : > { %11382 = vst [vmem:[#allocation91_spill] sm:$0xff] %v8297_v25 }
 0x178   : > { %1725 = vrot.lane.b32.xlu1 %v7778_v50, %s7269_s28  ;;  %1723 = vrot.lane.b32.xlu0 %v7759_v40, %s7269_s28  ;;  %v975_v50 = vcombine.high %v8197_v52, %v11353_v56  ;;  %v793_v40 = vcombine.high %v789_v39, %v11353_v56  ;;  %v8270_v39 = vsel %vm3982_vm4, %v3983_v31, %v11375_v47 }
 0x179   : > { %11376 = vst [vmem:[#allocation86_spill] sm:$0xff] %v8270_v39  ;;  %v4046_v36 = vcombine.low %v8270_v39, %v8252_v34  ;;  %v11419_v34 = vld [vmem:[#allocation66_spill] sm:$0xff] }
 0x17a   : > { %v6426_v23 = vpack.i.bf16 %v975_v50, %v923_v57  ;;  %v6421_v3 = vpack.i.bf16 %v793_v40, %v744_v30  ;;  %v11385_v30 = vld [vmem:[#allocation46_spill] sm:$0xff]  ;;  %v2407_v50 = vrot.slane %v2393_v2, %v7748_v37  ;;  %v8308_v40 = vrot.slane %v4231_v51, %v7748_v37 }
 0x17b   : > { %v2487_v31 = vrot.slane %v11385_v30, %v7748_v37 }
 0x17c   : > { %6392 = vrot.lane.b32.xlu0 %v6391_v48, %s7270_s7  ;;  %6397 = vrot.lane.b32.xlu1 %v6396_v33, %s7271_s24  ;;  %v4026_v33 = vrot.slane %v8187_v60, 2  ;;  %v8249_v48 = vsel %vm3982_vm4, %v4004_v24, %v4006_v20  ;;  %v11384_v20 = vld [vmem:[#allocation48_spill] sm:$0xff] }
 0x17d   : > { %11372 = vst [vmem:[#allocation83_spill] sm:$0xff] %v8249_v48  ;;  %v4263_v14 = vcombine.low %v8249_v48, %v8155_v53  ;;  %v2441_v35 = vcombine.high %v11384_v20, %v7956_v13  ;;  %11386 = vst [vmem:[#allocation48_spill] sm:$0xff] %v8308_v40  ;;  %v2409_v13 = vcombine.high %v11389_v55, %v11388_v9  ;;  %v2324_v9 = vrot.slane %v8187_v60, 1 }
 0x17e   : > { %v8223_v7 = vsel %vm3982_vm4, %v4024_v19, %v4026_v33  ;;  %v2345_v19 = vcombine.high %v7850_v41, %v7839_v27  ;;  %v11379_v33 = vld [vmem:[#allocation41_spill] sm:$0xff] }
 0x17f   : > { %11366 = vst [vmem:[#allocation78_spill] sm:$0xff] %v8223_v7  ;;  %v8294_v57 = vrot.slane %v4263_v14, %v7748_v37  ;;  %v2375_v14 = vrot.slane %v2361_v63, %v7748_v37  ;;  %v2495_v63 = vcombine.high %v2487_v31, %v11353_v56  ;;  %v11412_v7 = vld [vmem:[#allocation64_spill] sm:$0xff] }
 0x180   : > { %6402 = vrot.lane.b32.xlu0 %v6401_v22, %s7272_s26  ;;  %6407 = vrot.lane.b32.xlu1 %v6406_v12, %s7273_s9  ;;  %v4078_v12 = vcombine.low %v8255_v0, %v8237_v18  ;;  %v2377_v22 = vcombine.high %v11379_v33, %v7913_v54  ;;  %v2359_v2 = vrot.slane %v2345_v19, %v7748_v37 }
 0x181   : > { %11381 = vst [vmem:[#allocation90_spill] sm:$0xff] %v8294_v57  ;;  %v4327_v1 = vcombine.low %v8294_v57, %v8275_v26  ;;  %v11408_v57 = vld [vmem:[#allocation57_spill] sm:$0xff] }
 0x182   : > { %v8300_v24 = vrot.slane %v4078_v12, %v7748_v37  ;;  %v2391_v10 = vrot.slane %v2377_v22, %v7748_v37  ;;  %v2480_v12 = vcombine.high %v11385_v30, %v11353_v56  ;;  %v8335_v22 = vrot.slane %v2487_v31, %v7770_v45  ;;  %v11396_v31 = vld [vmem:[#allocation47_spill] sm:$0xff] }
 0x183   : > { %v8339_v55 = vrot.slane %v4327_v1, %v7770_v45 }
 0x184   : > { %6412 = vrot.lane.b32.xlu0 %v6411_v21, %s7274_s1  ;;  %6417 = vrot.lane.b32.xlu1 %v6416_v28, %s7275_s11  ;;  %v8289_v21 = vrot.slane %v4247_v17, %v7748_v37  ;;  %11383 = vst [vmem:[#allocation92_spill] sm:$0xff] %v8300_v24  ;;  %v8313_v28 = vrot.slane %v4046_v36, %v7748_v37  ;;  %11392 = vst [vmem:[#allocation43_spill] sm:$0xff] %v8335_v22 }
 0x185   : > { %v4142_v17 = vcombine.low %v8300_v24, %v8280_v38  ;;  %v2455_v36 = vrot.slane %v2441_v35, %v7770_v45  ;;  %v2456_v20 = vcombine.low %v2391_v10, %v2407_v50  ;;  %11393 = vst [vmem:[#allocation40_spill] sm:$0xff] %v8339_v55  ;;  %v2494_v24 = vrot.slane %v2480_v12, %v7748_v37  ;;  %v11395_v38 = vld [vmem:[#allocation49_spill] sm:$0xff] }
 0x186   : > { %11380 = vst [vmem:[#allocation89_spill] sm:$0xff] %v8289_v21  ;;  %11387 = vst [vmem:[#allocation93_spill] sm:$0xff] %v8313_v28  ;;  %v4295_v47 = vcombine.low %v8308_v40, %v8289_v21  ;;  %v4110_v51 = vcombine.low %v8313_v28, %v8297_v25  ;;  %v2457_v35 = vcombine.high %v2391_v10, %v2407_v50  ;;  %v11399_v10 = vld [vmem:[#allocation53_spill] sm:$0xff] }
 0x187   : > { %v8342_v19 = vrot.slane %v4142_v17, %v7770_v45  ;;  %v2425_v28 = vcombine.high %v2359_v2, %v2375_v14  ;;  %v2525_v12 = vcombine.high %v8335_v22, %v11353_v56  ;;  %v2464_v50 = vrot.slane %v2456_v20, %v7770_v45  ;;  %v11403_v22 = vld [vmem:[#allocation51_spill] sm:$0xff] }
 0x188   : > { %6427 = vrot.lane.b32.xlu1 %v6426_v23, %s7270_s7  ;;  %6422 = vrot.lane.b32.xlu0 %v6421_v3, %s7276_s20  ;;  %v11390_v23 = vld [vmem:[#allocation45_spill] sm:$0xff]  ;;  %v11391_v3 = vld [vmem:[#allocation44_spill] sm:$0xff]  ;;  %v8351_v60 = vrot.slane %v4295_v47, %v7770_v45  ;;  %v8354_v1 = vrot.slane %v4110_v51, %v7770_v45  ;;  %v2471_v20 = vrot.slane %v2457_v35, %v7770_v45 }
 0x189   : > { %11394 = vst [vmem:[#allocation45_spill] sm:$0xff] %v8342_v19  ;;  %v11406_v35 = vld [vmem:[#allocation61_spill] sm:$0xff] }
 0x18a   : > { %11397 = vst [vmem:[#allocation44_spill] sm:$0xff] %v8351_v60  ;;  %11398 = vst [vmem:[#allocation49_spill] sm:$0xff] %v8354_v1  ;;  %v11405_v60 = vld [vmem:[#allocation59_spill] sm:$0xff] }
 0x18b   : > { %v2578_v55 = vcombine.high %v11406_v35, %v11405_v60 }
 0x18c   : > { %6437 = vrot.lane.b32.xlu1 %v11390_v23, %s7272_s26  ;;  %6432 = vrot.lane.b32.xlu0 %v11391_v3, %s7271_s24  ;;  %v2423_v23 = vrot.slane %v2409_v13, %v7770_v45  ;;  %v2424_v3 = vcombine.low %v2359_v2, %v2375_v14  ;;  %v2509_v13 = vrot.slane %v2495_v63, %v7770_v45 }
 0x18d   : > { %v2517_v63 = vrot.slane %v2494_v24, %v7770_v45  ;;  %v2439_v2 = vrot.slane %v2425_v28, %v7770_v45  ;;  %v11407_v28 = vld [vmem:[#allocation56_spill] sm:$0xff] }
 0x18e   : > { %v2474_v17 = vcombine.low %v2423_v23, %v2455_v36  ;;  %v2432_v51 = vrot.slane %v2424_v3, %v7770_v45  ;;  %v2526_v19 = vcombine.high %v2509_v13, %v11353_v56  ;;  %v2475_v40 = vcombine.high %v2423_v23, %v2455_v36 }
 0x18f   : > { %v2626_v36 = vcombine.high %v11412_v7, %v11411_v62 }
 0x190   : > { %6447 = vrot.lane.b32.xlu1 %v11395_v38, %s7274_s1  ;;  %6442 = vrot.lane.b32.xlu0 %v11396_v31, %s7273_s9  ;;  %v11400_v38 = vld [vmem:[#allocation52_spill] sm:$0xff]  ;;  %v11401_v31 = vrot.slane %v7815_v5, 1  ;;  %v11404_v5 = vld [vmem:[#allocation50_spill] sm:$0xff]  ;;  %v6466_v1 = vpack.i.bf16 %v2509_v13, %v2474_v17  ;;  %v2477_v21 = vcombine.high %v2432_v51, %v2464_v50  ;;  %v2546_v17 = vcombine.high %v11408_v57, %v11407_v28 }
 0x191   : > { %v2473_v25 = vcombine.high %v11400_v38, %v11399_v10 }
 0x192   : > { %v8365_v14 = vsel %vm2280_vm5, %v11401_v31, %v2324_v9  ;;  %v2510_v9 = vcombine.high %v2494_v24, %v11353_v56  ;;  %v2476_v31 = vcombine.low %v2432_v51, %v2464_v50  ;;  %v11413_v50 = vld [vmem:[#allocation54_spill] sm:$0xff]  ;;  %v11414_v51 = vld [vmem:[#allocation55_spill] sm:$0xff]  ;;  %v2560_v62 = vrot.slane %v2546_v17, %v7748_v37 }
 0x193   : > { %11402 = vst [vmem:[#allocation47_spill] sm:$0xff] %v8365_v14  ;;  %v2672_v47 = vrot.slane %v8365_v14, %v7748_v37  ;;  %v6461_v3 = vpack.i.bf16 %v2525_v12, %v2473_v25  ;;  %v11409_v25 = vld [vmem:[#allocation58_spill] sm:$0xff]  ;;  %v11410_v12 = vld [vmem:[#allocation60_spill] sm:$0xff]  ;;  %v2530_v18 = vcombine.high %v11414_v51, %v11413_v50  ;;  %v2665_v29 = vcombine.high %v8365_v14, %v11353_v56 }
 0x194   : > { %6457 = vrot.lane.b32.xlu1 %v11403_v22, %s7276_s20  ;;  %6452 = vrot.lane.b32.xlu0 %v11404_v5, %s7275_s11  ;;  %v2478_v22 = vcombine.low %v2439_v2, %v2471_v20  ;;  %v2527_v5 = vcombine.high %v2517_v63, %v11353_v56  ;;  %v2524_v24 = vrot.slane %v2510_v9, %v7770_v45 }
 0x195   : > { %v2562_v13 = vcombine.high %v11410_v12, %v11409_v25  ;;  %v6476_v26 = vpack.i.bf16 %v2517_v63, %v2476_v31  ;;  %v2680_v23 = vcombine.high %v2672_v47, %v11353_v56  ;;  %v2592_v9 = vrot.slane %v2578_v55, %v7748_v37  ;;  %v11417_v63 = vld [vmem:[#allocation62_spill] sm:$0xff] }
 0x196   : > { %v6481_v0 = vpack.i.bf16 %v2527_v5, %v2477_v21  ;;  %v2594_v31 = vcombine.high %v11417_v63, %v11416_v42  ;;  %v6486_v7 = vpack.i.bf16 %v2524_v24, %v2478_v22  ;;  %v2640_v55 = vrot.slane %v2626_v36, %v7770_v45  ;;  %v11418_v5 = vld [vmem:[#allocation67_spill] sm:$0xff] }
 0x197   : > { %v2544_v21 = vrot.slane %v2530_v18, %v7748_v37  ;;  %v2658_v42 = vcombine.high %v11419_v34, %v11418_v5  ;;  %v2679_v22 = vrot.slane %v2665_v29, %v7748_v37  ;;  %v2479_v17 = vcombine.high %v2439_v2, %v2471_v20 }
 0x198   : > { %6467 = vrot.lane.b32.xlu1 %v6466_v1, %s7271_s24  ;;  %6462 = vrot.lane.b32.xlu0 %v6461_v3, %s7270_s7  ;;  %v6471_v1 = vpack.i.bf16 %v2526_v19, %v2475_v40  ;;  %v8399_v3 = vrot.slane %v2672_v47, %v7770_v45  ;;  %v2576_v40 = vrot.slane %v2562_v13, %v7748_v37 }
 0x199   : > { %v2528_v19 = vcombine.high %v2524_v24, %v11353_v56  ;;  %v2694_v47 = vrot.slane %v2680_v23, %v7770_v45  ;;  %v2608_v13 = vrot.slane %v2594_v31, %v7770_v45  ;;  %v2609_v24 = vcombine.low %v2544_v21, %v2560_v62 }
 0x19a   : > { %11415 = vst [vmem:[#allocation51_spill] sm:$0xff] %v8399_v3  ;;  %v2695_v34 = vcombine.high %v2679_v22, %v11353_v56 }
 0x19b   : > { %v6491_v36 = vpack.i.bf16 %v2528_v19, %v2479_v17  ;;  %v2711_v18 = vcombine.high %v2694_v47, %v11353_v56  ;;  %v2659_v23 = vcombine.low %v2608_v13, %v2640_v55  ;;  %v2660_v29 = vcombine.high %v2608_v13, %v2640_v55 }
 0x19c   : > { %6477 = vrot.lane.b32.xlu1 %v6476_v26, %s7273_s9  ;;  %6472 = vrot.lane.b32.xlu0 %v6471_v1, %s7272_s26  ;;  %v2710_v26 = vcombine.high %v8399_v3, %v11353_v56  ;;  %v2641_v1 = vcombine.low %v2576_v40, %v2592_v9  ;;  %v2702_v3 = vrot.slane %v2679_v22, %v7770_v45 }
 0x19d   : > { %v2617_v2 = vrot.slane %v2609_v24, %v7770_v45  ;;  %v6506_v20 = vpack.i.bf16 %v2711_v18, %v2660_v29  ;;  %v6501_v31 = vpack.i.bf16 %v2694_v47, %v2659_v23  ;;  %v2709_v22 = vrot.slane %v2695_v34, %v7770_v45 }
 0x19e   : > { %v6496_v63 = vpack.i.bf16 %v2710_v26, %v2658_v42  ;;  %v2649_v5 = vrot.slane %v2641_v1, %v7770_v45  ;;  %v2712_v42 = vcombine.high %v2702_v3, %v11353_v56  ;;  %v2610_v1 = vcombine.high %v2544_v21, %v2560_v62 }
 0x1a0   : > { %6487 = vrot.lane.b32.xlu1 %v6486_v7, %s7275_s11  ;;  %6482 = vrot.lane.b32.xlu0 %v6481_v0, %s7274_s1  ;;  %v2642_v0 = vcombine.high %v2576_v40, %v2592_v9  ;;  %v2661_v26 = vcombine.low %v2617_v2, %v2649_v5  ;;  %v2662_v55 = vcombine.high %v2617_v2, %v2649_v5 }
 0x1a1   : > { %v2624_v24 = vrot.slane %v2610_v1, %v7770_v45 }
 0x1a2   : > { %v2656_v17 = vrot.slane %v2642_v0, %v7770_v45  ;;  %v6516_v47 = vpack.i.bf16 %v2712_v42, %v2662_v55  ;;  %v6511_v13 = vpack.i.bf16 %v2702_v3, %v2661_v26 }
 0x1a4   : > { %6497 = vrot.lane.b32.xlu1 %v6496_v63, %s7270_s7  ;;  %6492 = vrot.lane.b32.xlu0 %v6491_v36, %s7276_s20  ;;  %v2713_v36 = vcombine.high %v2709_v22, %v11353_v56  ;;  %v2664_v34 = vcombine.high %v2624_v24, %v2656_v17  ;;  %v2663_v62 = vcombine.low %v2624_v24, %v2656_v17 }
 0x1a6   : > { %v8429_v7 = vpop.permute.xlu1 %1165  ;;  %v8431_v19 = vpop.permute.xlu0 %1163  ;;  %v6526_v18 = vpack.i.bf16 %v2713_v36, %v2664_v34  ;;  %v6521_v23 = vpack.i.bf16 %v2709_v22, %v2663_v62 }
 0x1a8   : > { %6507 = vrot.lane.b32.xlu1 %v6506_v20, %s7272_s26  ;;  %6502 = vrot.lane.b32.xlu0 %v6501_v31, %s7271_s24 }
 0x1aa   : > { %v8438_v9 = vpop.permute.xlu1 %1169  ;;  %v8440_v40 = vpop.permute.xlu0 %1167 }
 0x1ac   : > { %6517 = vrot.lane.b32.xlu1 %v6516_v47, %s7274_s1  ;;  %6512 = vrot.lane.b32.xlu0 %v6511_v13, %s7273_s9 }
 0x1ae   : > { %v8446_v21 = vpop.permute.xlu1 %1173  ;;  %v8448_v5 = vpop.permute.xlu0 %1171 }
 0x1af   : > { %v1245_v43 = vcombine.low %v8431_v19, %v8448_v5 }
 0x1b0   : > { %6527 = vrot.lane.b32.xlu1 %v6526_v18, %s7276_s20  ;;  %6522 = vrot.lane.b32.xlu0 %v6521_v23, %s7275_s11 }
 0x1b1   : > { %v8568_v11 = vrot.slane %v1245_v43, %v7748_v37 }
 0x1b2   : > { %v8452_v3 = vpop.permute.xlu1 %1177  ;;  %v8454_v63 = vpop.permute.xlu0 %1175 }
 0x1b3   : > { %v1340_v48 = vrot.slane %v8454_v63, %v7748_v37 }
 0x1b4   : > { %2856 = vrot.lane.b32.xlu1 %v11414_v51, %s7268_s27  ;;  %2854 = vrot.lane.b32.xlu0 %v7850_v41, %s7268_s27 }
 0x1b6   : > { %v8460_v29 = vpop.permute.xlu1 %1729  ;;  %v8462_v2 = vpop.permute.xlu0 %1727 }
 0x1b8   : > { %2860 = vrot.lane.b32.xlu1 %v11408_v57, %s7268_s27  ;;  %2858 = vrot.lane.b32.xlu0 %v7855_v44, %s7268_s27 }
 0x1ba   : > { %v8468_v0 = vpop.permute.xlu1 %1733  ;;  %v8470_v20 = vpop.permute.xlu0 %1731 }
 0x1bc   : > { %2864 = vrot.lane.b32.xlu1 %v11413_v50, %s7268_s27  ;;  %2862 = vrot.lane.b32.xlu0 %v7839_v27, %s7268_s27 }
 0x1be   : > { %v8476_v31 = vpop.permute.xlu1 %1737  ;;  %v8478_v42 = vpop.permute.xlu0 %1735 }
 0x1bf   : > { %v1994_v15 = vcombine.low %v8460_v29, %v8476_v31 }
 0x1c0   : > { %2868 = vrot.lane.b32.xlu1 %v11407_v28, %s7268_s27  ;;  %2866 = vrot.lane.b32.xlu0 %v7873_v58, %s7268_s27 }
 0x1c2   : > { %v8484_v26 = vpop.permute.xlu1 %1741  ;;  %v8486_v1 = vpop.permute.xlu0 %1739 }
 0x1c4   : > { %2872 = vrot.lane.b32.xlu1 %v11410_v12, %s7268_s27  ;;  %2870 = vrot.lane.b32.xlu0 %v11379_v33, %s7268_s27 }
 0x1c6   : > { %v8492_v22 = vpop.permute.xlu1 %1145  ;;  %v8494_v55 = vpop.permute.xlu0 %1143 }
 0x1c8   : > { %2876 = vrot.lane.b32.xlu1 %v11406_v35, %s7268_s27  ;;  %2874 = vrot.lane.b32.xlu0 %v7738_v32, %s7268_s27 }
 0x1ca   : > { %v8500_v17 = vpop.permute.xlu1 %1149  ;;  %v8502_v47 = vpop.permute.xlu0 %1147 }
 0x1cc   : > { %2880 = vrot.lane.b32.xlu1 %v11409_v25, %s7268_s27  ;;  %2878 = vrot.lane.b32.xlu0 %v7913_v54, %s7268_s27  ;;  %v8617_v25 = vrot.slane %v1994_v15, %v7748_v37 }
 0x1ce   : > { %v8508_v13 = vpop.permute.xlu1 %1153  ;;  %v8510_v24 = vpop.permute.xlu0 %1151  ;;  %11424 = vst [vmem:[#allocation64_spill] sm:$0xff] %v8617_v25 }
 0x1cf   : > { %v1382_v53 = vcombine.low %v8492_v22, %v8508_v13  ;;  %v1197_v59 = vcombine.low %v8494_v55, %v8510_v24 }
 0x1d0   : > { %2884 = vrot.lane.b32.xlu1 %v11405_v60, %s7268_s27  ;;  %2882 = vrot.lane.b32.xlu0 %v7813_v4, %s7268_s27 }
 0x1d1   : > { %v8585_v43 = vrot.slane %v1382_v53, %v7748_v37  ;;  %v1205_v8 = vrot.slane %v1197_v59, %v7748_v37 }
 0x1d2   : > { %v8516_v36 = vpop.permute.xlu1 %1157  ;;  %v8518_v34 = vpop.permute.xlu0 %1155 }
 0x1d3   : > { %v1213_v10 = vcombine.low %v8502_v47, %v8518_v34 }
 0x1d4   : > { %2888 = vrot.lane.b32.xlu1 %v8365_v14, %s7268_s27  ;;  %2886 = vrot.lane.b32.xlu0 %v11385_v30, %s7268_s27 }
 0x1d6   : > { %v8524_v62 = vpop.permute.xlu1 %1709  ;;  %v8526_v18 = vpop.permute.xlu0 %1707 }
 0x1d7   : > { %11420 = vst [vmem:[#allocation50_spill] sm:$0xff] %v8524_v62 }
 0x1d8   : > { %3424 = vrot.lane.b32.xlu1 %v11408_v57, %s7269_s28  ;;  %3420 = vrot.lane.b32.xlu0 %v11414_v51, %s7269_s28  ;;  %v1430_v51 = vcombine.low %v8429_v7, %v8446_v21 }
 0x1da   : > { %v8532_v23 = vpop.permute.xlu1 %1713  ;;  %v8534_v16 = vpop.permute.xlu0 %1711  ;;  %v8565_v52 = vrot.slane %v1430_v51, %v7748_v37  ;;  %v1809_v51 = vcombine.low %v8462_v2, %v8478_v42 }
 0x1db   : > { %11421 = vst [vmem:[#allocation56_spill] sm:$0xff] %v8532_v23 }
 0x1dc   : > { %3432 = vrot.lane.b32.xlu1 %v11407_v28, %s7269_s28  ;;  %3428 = vrot.lane.b32.xlu0 %v11413_v50, %s7269_s28  ;;  %v1398_v28 = vcombine.low %v8500_v17, %v8516_v36  ;;  %v1246_v50 = vcombine.high %v8431_v19, %v8448_v5  ;;  %v8620_v60 = vrot.slane %v1809_v51, %v7748_v37 }
 0x1dd   : > { %v1198_v51 = vcombine.high %v8494_v55, %v8510_v24 }
 0x1de   : > { %v8540_v14 = vpop.permute.xlu1 %1717  ;;  %v8542_v30 = vpop.permute.xlu0 %1715  ;;  %v8571_v19 = vrot.slane %v1398_v28, %v7748_v37  ;;  %v8574_v5 = vrot.slane %v1246_v50, %v7748_v37  ;;  %v1221_v28 = vrot.slane %v1213_v10, %v7748_v37 }
 0x1df   : > { %11422 = vst [vmem:[#allocation57_spill] sm:$0xff] %v8540_v14  ;;  %v1946_v54 = vcombine.low %v8524_v62, %v8540_v14  ;;  %v1761_v33 = vcombine.low %v8526_v18, %v8542_v30 }
 0x1e0   : > { %v1446_v10 = vcombine.low %v8585_v43, %v8571_v19  ;;  %v1261_v12 = vcombine.low %v1205_v8, %v1221_v28 }
 0x1e2   : > { %v8544_v39 = vpop.permute.xlu1 %1721  ;;  %v8546_v57 = vpop.permute.xlu0 %1719  ;;  %v8658_v55 = vrot.slane %v1261_v12, %v7770_v45 }
 0x1e3   : > { %v1962_v61 = vcombine.low %v8532_v23, %v8544_v39  ;;  %v1777_v50 = vcombine.low %v8534_v16, %v8546_v57 }
 0x1e5   : > { %v8609_v27 = vrot.slane %v1962_v61, %v7748_v37  ;;  %v8623_v35 = vrot.slane %v1777_v50, %v7748_v37  ;;  %v8642_v50 = vrot.slane %v1761_v33, %v7748_v37 }
 0x1e6   : > { %v8560_v38 = vpop.permute.xlu1 %1161  ;;  %v1160_v49 = vpop.permute.xlu0 %1159 }
 0x1e7   : > { %v1414_v4 = vcombine.low %v8560_v38, %v8438_v9  ;;  %v1229_v53 = vcombine.low %v1160_v49, %v8440_v40  ;;  %11423 = vst [vmem:[#allocation65_spill] sm:$0xff] %v8609_v27  ;;  %v1230_v41 = vcombine.high %v1160_v49, %v8440_v40  ;;  %v8632_v49 = vrot.slane %v1946_v54, %v7748_v37 }
 0x1e8   : > { %v8649_v54 = vrot.slane %v1446_v10, %v7770_v45  ;;  %v1825_v33 = vcombine.low %v8642_v50, %v8623_v35 }
 0x1e9   : > { %v8612_v58 = vrot.slane %v1414_v4, %v7748_v37  ;;  %v1237_v44 = vrot.slane %v1229_v53, %v7748_v37  ;;  %v1214_v4 = vcombine.high %v8502_v47, %v8518_v34  ;;  %11427 = vst [vmem:[#allocation63_spill] sm:$0xff] %v8632_v49  ;;  %v2010_v47 = vcombine.low %v8632_v49, %v8609_v27 }
 0x1ea   : > { %v8590_v46 = vpop.permute.xlu1 %1725  ;;  %v8592_v6 = vpop.permute.xlu0 %1723  ;;  %v1244_v34 = vrot.slane %v1230_v41, %v7748_v37  ;;  %v8691_v27 = vrot.slane %v1340_v48, %v7770_v45 }
 0x1eb   : > { %v1978_v32 = vcombine.low %v8590_v46, %v8468_v0  ;;  %v1793_v59 = vcombine.low %v8592_v6, %v8470_v20  ;;  %v1478_v15 = vcombine.low %v8612_v58, %v8565_v52  ;;  %v1293_v53 = vcombine.low %v1237_v44, %v8568_v11 }
 0x1ec   : > { %v1294_v24 = vcombine.high %v1237_v44, %v8568_v11  ;;  %v1228_v41 = vrot.slane %v1214_v4, %v7748_v37  ;;  %v1348_v44 = vcombine.high %v1340_v48, %v11353_v56  ;;  %v1262_v11 = vcombine.high %v1205_v8, %v1221_v28  ;;  %11433 = vst [vmem:[#allocation98_spill] sm:$0xff] %v8691_v27 }
 0x1ed   : > { %v8637_v40 = vrot.slane %v1978_v32, %v7748_v37  ;;  %v8654_v32 = vrot.slane %v1478_v15, %v7770_v45  ;;  %v1333_v15 = vcombine.high %v8454_v63, %v11353_v56  ;;  %v8684_v63 = vrot.slane %v2010_v47, %v7770_v45 }
 0x1ee   : > { %v8625_v62 = vpop.permute.xlu1 %6397  ;;  %v8627_v61 = vpop.permute.xlu0 %6392  ;;  %v1309_v4 = vcombine.low %v1244_v34, %v8574_v5  ;;  %v8694_v8 = vrot.slane %v1825_v33, %v7770_v45  ;;  %v1308_v28 = vrot.slane %v1294_v24, %v7770_v45  ;;  %v1310_v48 = vcombine.high %v1244_v34, %v8574_v5 }
 0x1ef   : > { %11425 = vst [vmem:[#allocation54_spill] sm:$0xff] %v8625_v62  ;;  %11426 = vst [vmem:[#allocation55_spill] sm:$0xff] %v8627_v61  ;;  %v8646_v62 = vrot.slane %v1793_v59, %v7748_v37  ;;  %v8664_v59 = vrot.slane %v1293_v53, %v7770_v45  ;;  %v2042_v49 = vcombine.low %v8637_v40, %v8617_v25 }
 0x1f0   : > { %11428 = vst [vmem:[#allocation62_spill] sm:$0xff] %v8637_v40  ;;  %v1276_v25 = vrot.slane %v1262_v11, %v7770_v45  ;;  %v1347_v24 = vrot.slane %v1333_v15, %v7748_v37  ;;  %v1317_v14 = vrot.slane %v1309_v4, %v7770_v45  ;;  %v1431_v34 = vcombine.high %v8429_v7, %v8446_v21 }
 0x1f1   : > { %11429 = vst [vmem:[#allocation94_spill] sm:$0xff] %v8664_v59  ;;  %v8688_v12 = vrot.slane %v2042_v49, %v7770_v45  ;;  %v1326_v49 = vcombine.high %v8658_v55, %v8664_v59  ;;  %v1525_v4 = vrot.slane %v8452_v3, %v7748_v37  ;;  %v1399_v7 = vcombine.high %v8500_v17, %v8516_v36 }
 0x1f2   : > { %v8666_v10 = vpop.permute.xlu1 %6407  ;;  %v8668_v61 = vpop.permute.xlu0 %6402  ;;  %v1327_v23 = vcombine.low %v1276_v25, %v1308_v28  ;;  %v1479_v17 = vcombine.high %v8612_v58, %v8565_v52 }
 0x1f3   : > { %11430 = vst [vmem:[#allocation95_spill] sm:$0xff] %v8666_v10  ;;  %11431 = vst [vmem:[#allocation96_spill] sm:$0xff] %v8668_v61  ;;  %v1857_v10 = vcombine.low %v8646_v62, %v8620_v60  ;;  %v1212_v61 = vrot.slane %v1198_v51, %v7748_v37 }
 0x1f4   : > { %11432 = vst [vmem:[#allocation97_spill] sm:$0xff] %v8688_v12 }
 0x1f5   : > { %v8698_v53 = vrot.slane %v1857_v10, %v7770_v45  ;;  %v1277_v40 = vcombine.low %v1212_v61, %v1228_v41  ;;  %v1362_v10 = vrot.slane %v1348_v44, %v7770_v45  ;;  %v1415_v44 = vcombine.high %v8560_v38, %v8438_v9 }
 0x1f6   : > { %v8700_v51 = vpop.permute.xlu1 %6417  ;;  %v8702_v47 = vpop.permute.xlu0 %6412  ;;  %v1328_v38 = vcombine.high %v1276_v25, %v1308_v28  ;;  %v1518_v25 = vcombine.high %v8452_v3, %v11353_v56  ;;  %v1533_v28 = vcombine.high %v1525_v4, %v11353_v56 }
 0x1f7   : > { %11434 = vst [vmem:[#allocation99_spill] sm:$0xff] %v8700_v51  ;;  %11435 = vst [vmem:[#allocation100_spill] sm:$0xff] %v8702_v47  ;;  %v1378_v51 = vcombine.high %v8691_v27, %v11353_v56  ;;  %v1278_v47 = vcombine.high %v1212_v61, %v1228_v41  ;;  %v1285_v15 = vrot.slane %v1277_v40, %v7770_v45 }
 0x1f8   : > { %v1324_v61 = vrot.slane %v1310_v48, %v7770_v45  ;;  %v6536_v41 = vpack.i.bf16 %v1362_v10, %v1327_v23  ;;  %v1363_v27 = vcombine.high %v1347_v24, %v11353_v56  ;;  %v1379_v59 = vcombine.high %v1362_v10, %v11353_v56 }
 0x1f9   : > { %v6531_v33 = vpack.i.bf16 %v1378_v51, %v1326_v49  ;;  %v1292_v21 = vrot.slane %v1278_v47, %v7770_v45  ;;  %v1445_v40 = vrot.slane %v1431_v34, %v7748_v37  ;;  %v1383_v51 = vcombine.high %v8492_v22, %v8508_v13 }
 0x1fa   : > { %v8717_v11 = vpop.permute.xlu1 %6427  ;;  %v8719_v5 = vpop.permute.xlu0 %6422  ;;  %6537 = vrot.lane.b32.xlu1 %v6536_v41, %s7271_s24  ;;  %v1429_v49 = vrot.slane %v1415_v44, %v7748_v37  ;;  %v6541_v47 = vpack.i.bf16 %v1379_v59, %v1328_v38  ;;  %v1377_v10 = vrot.slane %v1363_v27, %v7770_v45  ;;  %v1413_v22 = vrot.slane %v1399_v7, %v7748_v37 }
 0x1fb   : > { %11436 = vst [vmem:[#allocation101_spill] sm:$0xff] %v8717_v11  ;;  %11437 = vst [vmem:[#allocation102_spill] sm:$0xff] %v8719_v5  ;;  %v1370_v11 = vrot.slane %v1347_v24, %v7770_v45  ;;  %v1329_v5 = vcombine.low %v1285_v15, %v1317_v14  ;;  %6532 = vrot.lane.b32.xlu0 %v6531_v33, %s7270_s7  ;;  %v1331_v48 = vcombine.low %v1292_v21, %v1324_v61 }
 0x1fc   : > { %v1330_v24 = vcombine.high %v1285_v15, %v1317_v14  ;;  %v8751_v33 = vrot.slane %v1525_v4, %v7770_v45  ;;  %v1447_v13 = vcombine.high %v8585_v43, %v8571_v19  ;;  %v1397_v3 = vrot.slane %v1383_v51, %v7748_v37 }
 0x1fd   : > { %v6546_v36 = vpack.i.bf16 %v1370_v11, %v1329_v5  ;;  %v1380_v58 = vcombine.high %v1370_v11, %v11353_v56  ;;  %v1493_v59 = vrot.slane %v1479_v17, %v7770_v45  ;;  %v1494_v27 = vcombine.low %v1429_v49, %v1445_v40 }
 0x1fe   : > { %v8737_v9 = vpop.permute.xlu1 %6437  ;;  %v8739_v23 = vpop.permute.xlu0 %6432  ;;  %v6556_v5 = vpack.i.bf16 %v1377_v10, %v1331_v48  ;;  %v1511_v19 = vcombine.high %v8649_v54, %v8654_v32  ;;  %v1332_v43 = vcombine.high %v1292_v21, %v1324_v61  ;;  %v1532_v15 = vrot.slane %v1518_v25, %v7748_v37 }
 0x1ff   : > { %6547 = vrot.lane.b32.xlu1 %v6546_v36, %s7273_s9  ;;  %6542 = vrot.lane.b32.xlu0 %v6541_v47, %s7272_s26  ;;  %v6551_v34 = vpack.i.bf16 %v1380_v58, %v1330_v24  ;;  %v1547_v44 = vrot.slane %v1533_v28, %v7770_v45  ;;  %v1563_v11 = vcombine.high %v8751_v33, %v11353_v56 }
 0x200   : > { %v1461_v4 = vrot.slane %v1447_v13, %v7770_v45  ;;  %v1462_v41 = vcombine.low %v1397_v3, %v1413_v22  ;;  %v1381_v7 = vcombine.high %v1377_v10, %v11353_v56  ;;  %v1495_v61 = vcombine.high %v1429_v49, %v1445_v40 }
 0x201   : > { %v1502_v21 = vrot.slane %v1494_v27, %v7770_v45  ;;  %v1794_v17 = vcombine.high %v8592_v6, %v8470_v20  ;;  %v6566_v36 = vpack.i.bf16 %v1563_v11, %v1511_v19  ;;  %v1548_v25 = vcombine.high %v1532_v15, %v11353_v56 }
 0x202   : > { %v8760_v52 = vpop.permute.xlu1 %6447  ;;  %v8762_v14 = vpop.permute.xlu0 %6442  ;;  %v6561_v47 = vpack.i.bf16 %v1381_v7, %v1332_v43  ;;  %v1513_v48 = vcombine.high %v1461_v4, %v1493_v59  ;;  %v1512_v24 = vcombine.low %v1461_v4, %v1493_v59  ;;  %v1555_v28 = vrot.slane %v1532_v15, %v7770_v45 }
 0x203   : > { %6557 = vrot.lane.b32.xlu1 %v6556_v5, %s7275_s11  ;;  %6552 = vrot.lane.b32.xlu0 %v6551_v34, %s7274_s1  ;;  %v1810_v10 = vcombine.high %v8462_v2, %v8478_v42  ;;  %v1564_v13 = vcombine.high %v1547_v44, %v11353_v56  ;;  %v1463_v58 = vcombine.high %v1397_v3, %v1413_v22 }
 0x204   : > { %v1470_v40 = vrot.slane %v1462_v41, %v7770_v45  ;;  %v1778_v49 = vcombine.high %v8534_v16, %v8546_v57  ;;  %v1762_v59 = vcombine.high %v8526_v18, %v8542_v30  ;;  %v1509_v2 = vrot.slane %v1495_v61, %v7770_v45 }
 0x205   : > { %v1808_v42 = vrot.slane %v1794_v17, %v7748_v37  ;;  %v1858_v22 = vcombine.high %v8646_v62, %v8620_v60  ;;  %v6576_v3 = vpack.i.bf16 %v1564_v13, %v1513_v48  ;;  %v6571_v16 = vpack.i.bf16 %v1547_v44, %v1512_v24 }
 0x206   : > { %v8776_v38 = vpop.permute.xlu1 %6457  ;;  %v8778_v51 = vpop.permute.xlu0 %6452  ;;  %v1515_v57 = vcombine.high %v1470_v40, %v1502_v21  ;;  %v1514_v27 = vcombine.low %v1470_v40, %v1502_v21  ;;  %v1562_v5 = vrot.slane %v1548_v25, %v7770_v45  ;;  %v1824_v34 = vrot.slane %v1810_v10, %v7748_v37 }
 0x207   : > { %6567 = vrot.lane.b32.xlu1 %v6566_v36, %s7270_s7  ;;  %6562 = vrot.lane.b32.xlu0 %v6561_v47, %s7276_s20  ;;  %v1904_v19 = vrot.slane %v8486_v1, %v7748_v37  ;;  %v1565_v30 = vcombine.high %v1555_v28, %v11353_v56  ;;  %v1477_v18 = vrot.slane %v1463_v58, %v7770_v45 }
 0x208   : > { %v1792_v43 = vrot.slane %v1778_v49, %v7748_v37  ;;  %v1826_v60 = vcombine.high %v8642_v50, %v8623_v35  ;;  %v1776_v44 = vrot.slane %v1762_v59, %v7748_v37  ;;  %v1872_v11 = vrot.slane %v1858_v22, %v7770_v45 }
 0x209   : > { %v1873_v4 = vcombine.low %v1808_v42, %v1824_v34  ;;  %v6586_v41 = vpack.i.bf16 %v1565_v30, %v1515_v57  ;;  %v6581_v7 = vpack.i.bf16 %v1555_v28, %v1514_v27  ;;  %v1517_v61 = vcombine.high %v1477_v18, %v1509_v2 }
 0x20a   : > { %v8793_v6 = vpop.permute.xlu1 %6467  ;;  %v8795_v20 = vpop.permute.xlu0 %6462  ;;  %v1516_v21 = vcombine.low %v1477_v18, %v1509_v2  ;;  %v1897_v35 = vcombine.high %v8486_v1, %v11353_v56  ;;  %v1912_v50 = vcombine.high %v1904_v19, %v11353_v56  ;;  %v1566_v17 = vcombine.high %v1562_v5, %v11353_v56 }
 0x20b   : > { %11438 = vst [vmem:[#allocation103_spill] sm:$0xff] %v8793_v6  ;;  %11439 = vst [vmem:[#allocation104_spill] sm:$0xff] %v8795_v20  ;;  %6577 = vrot.lane.b32.xlu1 %v6576_v3, %s7272_s26  ;;  %6572 = vrot.lane.b32.xlu0 %v6571_v16, %s7271_s24  ;;  %v8825_v36 = vrot.slane %v1904_v19, %v7770_v45  ;;  %v1840_v47 = vrot.slane %v1826_v60, %v7770_v45 }
 0x20c   : > { %v1841_v48 = vcombine.low %v1776_v44, %v1792_v43  ;;  %v1874_v28 = vcombine.high %v1808_v42, %v1824_v34  ;;  %v1881_v1 = vrot.slane %v1873_v4, %v7770_v45  ;;  %v6596_v10 = vpack.i.bf16 %v1566_v17, %v1517_v61  ;;  %v11446_v4 = vld [vmem:[#allocation56_spill] sm:$0xff]  ;;  %v11450_v61 = vld [vmem:[#allocation50_spill] sm:$0xff] }
 0x20d   : > { %v6591_v13 = vpack.i.bf16 %v1562_v5, %v1516_v21  ;;  %v1891_v58 = vcombine.low %v1840_v47, %v1872_v11  ;;  %v1890_v40 = vcombine.high %v8694_v8, %v8698_v53  ;;  %v1911_v49 = vrot.slane %v1897_v35, %v7748_v37 }
 0x20e   : > { %v8814_v62 = vpop.permute.xlu1 %6477  ;;  %v8816_v15 = vpop.permute.xlu0 %6472  ;;  %v1926_v59 = vrot.slane %v1912_v50, %v7770_v45  ;;  %v1942_v2 = vcombine.high %v8825_v36, %v11353_v56  ;;  %v1842_v22 = vcombine.high %v1776_v44, %v1792_v43  ;;  %v1849_v3 = vrot.slane %v1841_v48, %v7770_v45  ;;  %v11452_v50 = vld [vmem:[#allocation62_spill] sm:$0xff] }
 0x20f   : > { %11440 = vst [vmem:[#allocation105_spill] sm:$0xff] %v8814_v62  ;;  %11441 = vst [vmem:[#allocation106_spill] sm:$0xff] %v8816_v15  ;;  %6587 = vrot.lane.b32.xlu1 %v6586_v41, %s7274_s1  ;;  %6582 = vrot.lane.b32.xlu0 %v6581_v7, %s7273_s9  ;;  %v1995_v57 = vcombine.high %v8460_v29, %v8476_v31  ;;  %v1979_v27 = vcombine.high %v8590_v46, %v8468_v0  ;;  %v11449_v7 = vld [vmem:[#allocation57_spill] sm:$0xff] }
 0x210   : > { %v1888_v5 = vrot.slane %v1874_v28, %v7770_v45  ;;  %v6606_v34 = vpack.i.bf16 %v1926_v59, %v1891_v58  ;;  %v6601_v19 = vpack.i.bf16 %v1942_v2, %v1890_v40  ;;  %v1893_v30 = vcombine.low %v1849_v3, %v1881_v1  ;;  %v11453_v2 = vld [vmem:[#allocation65_spill] sm:$0xff] }
 0x211   : > { %v1892_v18 = vcombine.high %v1840_v47, %v1872_v11  ;;  %v2089_v43 = vrot.slane %v8484_v26, %v7748_v37  ;;  %v1927_v60 = vcombine.high %v1911_v49, %v11353_v56  ;;  %v1934_v44 = vrot.slane %v1911_v49, %v7770_v45 }
 0x212   : > { %v8830_v24 = vpop.permute.xlu1 %6487  ;;  %v8832_v25 = vpop.permute.xlu0 %6482  ;;  %v1963_v41 = vcombine.high %v11446_v4, %v8544_v39  ;;  %v1856_v29 = vrot.slane %v1842_v22, %v7770_v45  ;;  %v1943_v46 = vcombine.high %v1926_v59, %v11353_v56  ;;  %v2009_v11 = vrot.slane %v1995_v57, %v7748_v37  ;;  %v11451_v39 = vld [vmem:[#allocation64_spill] sm:$0xff]  ;;  %v11454_v22 = vld [vmem:[#allocation63_spill] sm:$0xff] }
 0x213   : > { %11442 = vst [vmem:[#allocation107_spill] sm:$0xff] %v8830_v24  ;;  %11443 = vst [vmem:[#allocation108_spill] sm:$0xff] %v8832_v25  ;;  %6597 = vrot.lane.b32.xlu1 %v6596_v10, %s7276_s20  ;;  %6592 = vrot.lane.b32.xlu0 %v6591_v13, %s7275_s11  ;;  %v1947_v21 = vcombine.high %v11450_v61, %v11449_v7  ;;  %v1993_v35 = vrot.slane %v1979_v27, %v7748_v37 }
 0x214   : > { %v2043_v17 = vcombine.high %v11452_v50, %v11451_v39  ;;  %v6616_v47 = vpack.i.bf16 %v1934_v44, %v1893_v30  ;;  %v6611_v48 = vpack.i.bf16 %v1943_v46, %v1892_v18  ;;  %v1895_v28 = vcombine.low %v1856_v29, %v1888_v5 }
 0x215   : > { %v1894_v10 = vcombine.high %v1849_v3, %v1881_v1  ;;  %v2082_v13 = vcombine.high %v8484_v26, %v11353_v56  ;;  %v2097_v58 = vcombine.high %v2089_v43, %v11353_v56  ;;  %v8877_v40 = vrot.slane %v2089_v43, %v7770_v45 }
 0x216   : > { %v8844_v42 = vpop.permute.xlu1 %6497  ;;  %v8846_v16 = vpop.permute.xlu0 %6492  ;;  %v1941_v49 = vrot.slane %v1927_v60, %v7770_v45  ;;  %v1977_v59 = vrot.slane %v1963_v41, %v7748_v37  ;;  %v2011_v57 = vcombine.high %v11454_v22, %v11453_v2  ;;  %v1944_v1 = vcombine.high %v1934_v44, %v11353_v56 }
 0x217   : > { %11444 = vst [vmem:[#allocation109_spill] sm:$0xff] %v8844_v42  ;;  %11445 = vst [vmem:[#allocation110_spill] sm:$0xff] %v8846_v16  ;;  %6607 = vrot.lane.b32.xlu1 %v6606_v34, %s7271_s24  ;;  %6602 = vrot.lane.b32.xlu0 %v6601_v19, %s7270_s7  ;;  %v1961_v27 = vrot.slane %v1947_v21, %v7748_v37  ;;  %v2057_v34 = vrot.slane %v2043_v17, %v7770_v45 }
 0x218   : > { %v2058_v19 = vcombine.low %v1993_v35, %v2009_v11  ;;  %v6626_v30 = vpack.i.bf16 %v1941_v49, %v1895_v28  ;;  %v6621_v18 = vpack.i.bf16 %v1944_v1, %v1894_v10  ;;  %v2075_v43 = vcombine.high %v8684_v63, %v8688_v12  ;;  %v11527_v12 = vld [vmem:[#allocation52_spill] sm:$0xff] }
 0x219   : > { %v1896_v60 = vcombine.high %v1856_v29, %v1888_v5  ;;  %v2096_v4 = vrot.slane %v2082_v13, %v7748_v37  ;;  %v2111_v41 = vrot.slane %v2097_v58, %v7770_v45  ;;  %v2127_v44 = vcombine.high %v8877_v40, %v11353_v56 }
 0x21a   : > { %v8863_v0 = vpop.permute.xlu1 %6507  ;;  %v8865_v31 = vpop.permute.xlu0 %6502  ;;  %v2025_v46 = vrot.slane %v2011_v57, %v7770_v45  ;;  %v2026_v7 = vcombine.low %v1961_v27, %v1977_v59  ;;  %v1945_v61 = vcombine.high %v1941_v49, %v11353_v56  ;;  %v2059_v5 = vcombine.high %v1993_v35, %v2009_v11 }
 0x21b   : > { %11447 = vst [vmem:[#allocation56_spill] sm:$0xff] %v8863_v0  ;;  %11448 = vst [vmem:[#allocation111_spill] sm:$0xff] %v8865_v31  ;;  %6617 = vrot.lane.b32.xlu1 %v6616_v47, %s7273_s9  ;;  %6612 = vrot.lane.b32.xlu0 %v6611_v48, %s7272_s26  ;;  %v2066_v29 = vrot.slane %v2058_v19, %v7770_v45  ;;  %v6636_v50 = vpack.i.bf16 %v2127_v44, %v2075_v43 }
 0x21c   : > { %v6631_v17 = vpack.i.bf16 %v1945_v61, %v1896_v60  ;;  %v2077_v47 = vcombine.high %v2025_v46, %v2057_v34  ;;  %v2076_v48 = vcombine.low %v2025_v46, %v2057_v34  ;;  %v2112_v28 = vcombine.high %v2096_v4, %v11353_v56 }
 0x21d   : > { %v2119_v10 = vrot.slane %v2096_v4, %v7770_v45  ;;  %v2027_v13 = vcombine.high %v1961_v27, %v1977_v59  ;;  %v2034_v58 = vrot.slane %v2026_v7, %v7770_v45  ;;  %v2128_v49 = vcombine.high %v2111_v41, %v11353_v56 }
 0x21e   : > { %v8886_v3 = vpop.permute.xlu1 %6517  ;;  %v8888_v26 = vpop.permute.xlu0 %6512  ;;  %v2073_v2 = vrot.slane %v2059_v5, %v7770_v45  ;;  %v6641_v57 = vpack.i.bf16 %v2111_v41, %v2076_v48  ;;  %v2126_v59 = vrot.slane %v2112_v28, %v7770_v45 }
 0x21f   : > { %11455 = vst [vmem:[#allocation57_spill] sm:$0xff] %v8886_v3  ;;  %11456 = vst [vmem:[#allocation50_spill] sm:$0xff] %v8888_v26  ;;  %6627 = vrot.lane.b32.xlu1 %v6626_v30, %s7275_s11  ;;  %6622 = vrot.lane.b32.xlu0 %v6621_v18, %s7274_s1  ;;  %v6646_v22 = vpack.i.bf16 %v2128_v49, %v2077_v47  ;;  %v2079_v1 = vcombine.high %v2034_v58, %v2066_v29 }
 0x220   : > { %v2078_v34 = vcombine.low %v2034_v58, %v2066_v29  ;;  %v2041_v27 = vrot.slane %v2027_v13, %v7770_v45  ;;  %v2129_v19 = vcombine.high %v2119_v10, %v11353_v56  ;;  %v2130_v44 = vcombine.high %v2126_v59, %v11353_v56 }
 0x222   : > { %v8902_v21 = vpop.permute.xlu1 %6527  ;;  %v8904_v39 = vpop.permute.xlu0 %6522  ;;  %v6656_v43 = vpack.i.bf16 %v2129_v19, %v2079_v1  ;;  %v6651_v60 = vpack.i.bf16 %v2119_v10, %v2078_v34  ;;  %v2081_v4 = vcombine.high %v2041_v27, %v2073_v2  ;;  %v2080_v41 = vcombine.low %v2041_v27, %v2073_v2 }
 0x223   : > { %11457 = vst [vmem:[#allocation64_spill] sm:$0xff] %v8902_v21  ;;  %11458 = vst [vmem:[#allocation62_spill] sm:$0xff] %v8904_v39  ;;  %6637 = vrot.lane.b32.xlu1 %v6636_v50, %s7270_s7  ;;  %6632 = vrot.lane.b32.xlu0 %v6631_v17, %s7276_s20  ;;  %v6434_v39 = vunpack.i.l.bf16 %v8739_v23 }
 0x224   : > { %v6666_v61 = vpack.i.bf16 %v2130_v44, %v2081_v4  ;;  %v6661_v5 = vpack.i.bf16 %v2126_v59, %v2080_v41 }
 0x226   : > { %v8913_v11 = vpop.permute.xlu1 %2856  ;;  %v8915_v35 = vpop.permute.xlu0 %2854 }
 0x227   : > { %11459 = vst [vmem:[#allocation65_spill] sm:$0xff] %v8913_v11  ;;  %11460 = vst [vmem:[#allocation63_spill] sm:$0xff] %v8915_v35  ;;  %6647 = vrot.lane.b32.xlu1 %v6646_v22, %s7272_s26  ;;  %6642 = vrot.lane.b32.xlu0 %v6641_v57, %s7271_s24 }
 0x22a   : > { %v8923_v30 = vpop.permute.xlu1 %2860  ;;  %v8925_v18 = vpop.permute.xlu0 %2858 }
 0x22b   : > { %11461 = vst [vmem:[#allocation112_spill] sm:$0xff] %v8923_v30  ;;  %11462 = vst [vmem:[#allocation113_spill] sm:$0xff] %v8925_v18  ;;  %6657 = vrot.lane.b32.xlu1 %v6656_v43, %s7274_s1  ;;  %6652 = vrot.lane.b32.xlu0 %v6651_v60, %s7273_s9 }
 0x22e   : > { %v8930_v46 = vpop.permute.xlu1 %2864  ;;  %v8932_v7 = vpop.permute.xlu0 %2862 }
 0x22f   : > { %11463 = vst [vmem:[#allocation114_spill] sm:$0xff] %v8930_v46  ;;  %11464 = vst [vmem:[#allocation115_spill] sm:$0xff] %v8932_v7  ;;  %v3093_v29 = vcombine.low %v8913_v11, %v8930_v46  ;;  %6667 = vrot.lane.b32.xlu1 %v6666_v61, %s7276_s20  ;;  %6662 = vrot.lane.b32.xlu0 %v6661_v5, %s7275_s11  ;;  %v2908_v1 = vcombine.low %v8915_v35, %v8932_v7  ;;  %v11508_v7 = vld [vmem:[#allocation33_spill] sm:$0xff] }
 0x231   : > { %v3101_v48 = vrot.slane %v3093_v29, %v7748_v37  ;;  %v2916_v60 = vrot.slane %v2908_v1, %v7748_v37 }
 0x232   : > { %v8938_v50 = vpop.permute.xlu1 %2868  ;;  %v8942_v47 = vpop.permute.xlu0 %2866 }
 0x233   : > { %11465 = vst [vmem:[#allocation116_spill] sm:$0xff] %v8938_v50  ;;  %v3109_v17 = vcombine.low %v8923_v30, %v8938_v50  ;;  %11466 = vst [vmem:[#allocation117_spill] sm:$0xff] %v8942_v47  ;;  %v2924_v22 = vcombine.low %v8925_v18, %v8942_v47 }
 0x235   : > { %v3117_v28 = vrot.slane %v3109_v17, %v7748_v37  ;;  %v2932_v59 = vrot.slane %v2924_v22, %v7748_v37 }
 0x236   : > { %v8946_v10 = vpop.permute.xlu1 %2872  ;;  %v8948_v58 = vpop.permute.xlu0 %2870 }
 0x237   : > { %11467 = vst [vmem:[#allocation118_spill] sm:$0xff] %v8946_v10  ;;  %v3157_v13 = vcombine.low %v3101_v48, %v3117_v28  ;;  %11468 = vst [vmem:[#allocation119_spill] sm:$0xff] %v8948_v58  ;;  %v3158_v61 = vcombine.high %v3101_v48, %v3117_v28  ;;  %v2972_v5 = vcombine.low %v2916_v60, %v2932_v59 }
 0x238   : > { %v2973_v22 = vcombine.high %v2916_v60, %v2932_v59 }
 0x239   : > { %v8983_v35 = vrot.slane %v3158_v61, %v7770_v45  ;;  %v8986_v48 = vrot.slane %v2972_v5, %v7770_v45  ;;  %v9002_v60 = vrot.slane %v3157_v13, %v7770_v45 }
 0x23a   : > { %v8950_v49 = vpop.permute.xlu1 %2876  ;;  %v8952_v2 = vpop.permute.xlu0 %2874  ;;  %v2987_v59 = vrot.slane %v2973_v22, %v7770_v45 }
 0x23b   : > { %11469 = vst [vmem:[#allocation120_spill] sm:$0xff] %v8950_v49  ;;  %11470 = vst [vmem:[#allocation121_spill] sm:$0xff] %v8952_v2 }
 0x23c   : > { %11476 = vst [vmem:[#allocation127_spill] sm:$0xff] %v8983_v35  ;;  %11477 = vst [vmem:[#allocation128_spill] sm:$0xff] %v8986_v48 }
 0x23d   : > { %11481 = vst [vmem:[#allocation132_spill] sm:$0xff] %v9002_v60 }
 0x23e   : > { %v8956_v57 = vpop.permute.xlu1 %2880  ;;  %v8960_v34 = vpop.permute.xlu0 %2878 }
 0x23f   : > { %11471 = vst [vmem:[#allocation122_spill] sm:$0xff] %v8956_v57  ;;  %11472 = vst [vmem:[#allocation123_spill] sm:$0xff] %v8960_v34  ;;  %v3125_v27 = vcombine.low %v8946_v10, %v8956_v57  ;;  %v2940_v19 = vcombine.low %v8948_v58, %v8960_v34 }
 0x241   : > { %v3133_v29 = vrot.slane %v3125_v27, %v7748_v37  ;;  %v2948_v58 = vrot.slane %v2940_v19, %v7748_v37 }
 0x242   : > { %v8967_v43 = vpop.permute.xlu1 %2884  ;;  %v8972_v41 = vpop.permute.xlu0 %2882 }
 0x243   : > { %11473 = vst [vmem:[#allocation124_spill] sm:$0xff] %v8967_v43  ;;  %v3141_v4 = vcombine.low %v8950_v49, %v8967_v43  ;;  %11474 = vst [vmem:[#allocation125_spill] sm:$0xff] %v8972_v41  ;;  %v2956_v44 = vcombine.low %v8952_v2, %v8972_v41  ;;  %v11507_v2 = vld [vmem:[#allocation69_spill] sm:$0xff] }
 0x245   : > { %v3149_v17 = vrot.slane %v3141_v4, %v7748_v37  ;;  %v2964_v34 = vrot.slane %v2956_v44, %v7748_v37 }
 0x246   : > { %v8980_v47 = vpop.permute.xlu0 %2886 }
 0x247   : > { %v3189_v1 = vcombine.low %v3133_v29, %v3149_v17  ;;  %v3190_v10 = vcombine.high %v3133_v29, %v3149_v17  ;;  %v3004_v57 = vcombine.low %v2948_v58, %v2964_v34  ;;  %v3005_v18 = vcombine.high %v2948_v58, %v2964_v34  ;;  %11475 = vst [vmem:[#allocation126_spill] sm:$0xff] %v8980_v47 }
 0x248   : > { %v3051_v34 = vrot.slane %v8980_v47, %v7748_v37  ;;  %v11505_v47 = vld [vmem:[#allocation26_spill] sm:$0xff] }
 0x249   : > { %v8989_v28 = vrot.slane %v3190_v10, %v7770_v45  ;;  %v8993_v27 = vrot.slane %v3189_v1, %v7770_v45  ;;  %v8996_v19 = vrot.slane %v3004_v57, %v7770_v45  ;;  %v3019_v58 = vrot.slane %v3005_v18, %v7770_v45  ;;  %v11486_v10 = vld [vmem:[#allocation60_spill] sm:$0xff] }
 0x24a   : > { %v3059_v57 = vcombine.high %v3051_v34, %v11353_v56  ;;  %v9012_v18 = vrot.slane %v3051_v34, %v7770_v45  ;;  %v11484_v34 = vld [vmem:[#allocation61_spill] sm:$0xff] }
 0x24b   : > { %11478 = vst [vmem:[#allocation129_spill] sm:$0xff] %v8989_v28  ;;  %11479 = vst [vmem:[#allocation130_spill] sm:$0xff] %v8993_v27  ;;  %v3038_v4 = vcombine.low %v2987_v59, %v3019_v58  ;;  %v3223_v44 = vcombine.low %v8983_v35, %v8989_v28  ;;  %v3037_v61 = vcombine.high %v8986_v48, %v8996_v19 }
 0x24c   : > { %11480 = vst [vmem:[#allocation131_spill] sm:$0xff] %v8996_v19  ;;  %11482 = vst [vmem:[#allocation133_spill] sm:$0xff] %v9012_v18  ;;  %v9017_v29 = vrot.slane %v3059_v57, %v7770_v45  ;;  %v3089_v17 = vcombine.high %v9012_v18, %v11353_v56  ;;  %v11504_v18 = vld [vmem:[#allocation54_spill] sm:$0xff] }
 0x24d   : > { %v6676_v5 = vpack.i.bf16 %v3223_v44, %v3038_v4  ;;  %v3039_v4 = vcombine.high %v2987_v59, %v3019_v58  ;;  %v9041_v58 = vpop.permute.xlu1 %2888  ;;  %v6400_v19 = vunpack.i.h.bf16 %v11504_v18  ;;  %v11520_v45 = vld [vmem:[#allocation102_spill] sm:$0xff] }
 0x24e   : > { %11483 = vst [vmem:[#allocation134_spill] sm:$0xff] %v9017_v29  ;;  %v6671_v22 = vpack.i.bf16 %v3089_v17, %v3037_v61  ;;  %v3090_v44 = vcombine.high %v9017_v29, %v11353_v56  ;;  %v11488_v61 = vld [vmem:[#allocation58_spill] sm:$0xff]  ;;  %v11489_v17 = vld [vmem:[#allocation36_spill] sm:$0xff]  ;;  %11490 = vst [vmem:[#allocation60_spill] sm:$0xff] %v9041_v58  ;;  %v6425_v56 = vunpack.i.h.bf16 %v11520_v45  ;;  %v6435_v58 = vunpack.i.h.bf16 %v8739_v23 }
 0x24f   : > { %6677 = vrot.lane.b32.xlu1 %v6676_v5, %s7271_s24  ;;  %v11487_v5 = vld [vmem:[#allocation59_spill] sm:$0xff]  ;;  %v6474_v23 = vunpack.i.l.bf16 %v8816_v15 }
 0x250   : > { %6672 = vrot.lane.b32.xlu0 %v6671_v22, %s7270_s7  ;;  %v9029_v57 = vpack.i.bf16 %v3090_v44, %v3039_v4  ;;  %v11491_v22 = vld [vmem:[#allocation35_spill] sm:$0xff]  ;;  %v11494_v4 = vld [vmem:[#allocation28_spill] sm:$0xff] }
 0x251   : > { %v9051_v44 = vpop.permute.xlu1 %3424 }
 0x252   : > { %11485 = vst [vmem:[#allocation61_spill] sm:$0xff] %v9029_v57  ;;  %11495 = vst [vmem:[#allocation59_spill] sm:$0xff] %v9051_v44  ;;  %v11516_v57 = vld [vmem:[#allocation68_spill] sm:$0xff] }
 0x253   : > { %3440 = vrot.lane.b32.xlu1 %v11484_v34, %s7269_s28  ;;  %v11492_v34 = vld [vmem:[#allocation37_spill] sm:$0xff] }
 0x254   : > { %3436 = vrot.lane.b32.xlu0 %v11486_v10, %s7269_s28  ;;  %v11493_v10 = vld [vmem:[#allocation32_spill] sm:$0xff] }
 0x257   : > { %3448 = vrot.lane.b32.xlu1 %v11487_v5, %s7269_s28  ;;  %v9053_v5 = vpop.permute.xlu0 %3420 }
 0x258   : > { %3444 = vrot.lane.b32.xlu0 %v11488_v61, %s7269_s28  ;;  %11496 = vst [vmem:[#allocation58_spill] sm:$0xff] %v9053_v5  ;;  %v11497_v61 = vld [vmem:[#allocation41_spill] sm:$0xff]  ;;  %v11512_v5 = vld [vmem:[#allocation94_spill] sm:$0xff] }
 0x25b   : > { %3422 = vrot.lane.b32.xlu1 %v11489_v17, %s7269_s28  ;;  %v11498_v17 = vld [vmem:[#allocation31_spill] sm:$0xff]  ;;  %v9061_v59 = vpop.permute.xlu0 %3428 }
 0x25c   : > { %3418 = vrot.lane.b32.xlu0 %v11491_v22, %s7269_s28  ;;  %v9059_v22 = vpop.permute.xlu1 %3432  ;;  %11500 = vst [vmem:[#allocation35_spill] sm:$0xff] %v9061_v59  ;;  %v11513_v59 = vcombine.low %v8658_v55, %v11512_v5  ;;  %v11518_v5 = vld [vmem:[#allocation101_spill] sm:$0xff] }
 0x25d   : > { %11499 = vst [vmem:[#allocation36_spill] sm:$0xff] %v9059_v22 }
 0x25f   : > { %3430 = vrot.lane.b32.xlu1 %v11492_v34, %s7269_s28  ;;  %v11501_v34 = vld [vmem:[#allocation42_spill] sm:$0xff] }
 0x260   : > { %3426 = vrot.lane.b32.xlu0 %v11493_v10, %s7269_s28  ;;  %v11502_v10 = vld [vmem:[#allocation74_spill] sm:$0xff] }
 0x263   : > { %3438 = vrot.lane.b32.xlu1 %v11494_v4, %s7269_s28  ;;  %v11503_v4 = vld [vmem:[#allocation55_spill] sm:$0xff] }
 0x264   : > { %3434 = vrot.lane.b32.xlu0 %v11497_v61, %s7269_s28  ;;  %v6395_v1 = vunpack.i.h.bf16 %v11503_v4  ;;  %v6394_v13 = vunpack.i.l.bf16 %v11503_v4  ;;  %v6399_v61 = vunpack.i.l.bf16 %v11504_v18  ;;  %v11509_v4 = vld [vmem:[#allocation34_spill] sm:$0xff]  ;;  %v11511_v18 = vld [vmem:[#allocation96_spill] sm:$0xff] }
 0x265   : > { %v11510_v49 = vcombine.low %v11508_v7, %v11509_v4  ;;  %v6405_v11 = vunpack.i.h.bf16 %v11511_v18  ;;  %v6404_v50 = vunpack.i.l.bf16 %v11511_v18  ;;  %v11515_v18 = vld [vmem:[#allocation82_spill] sm:$0xff] }
 0x266   : > { %v1092_v41 = vsel %vm447_vm2, %v11507_v2, %v6395_v1  ;;  %v11514_v1 = vld [vmem:[#allocation95_spill] sm:$0xff] }
 0x267   : > { %3446 = vrot.lane.b32.xlu1 %v11498_v17, %s7269_s28  ;;  %v1091_v43 = vsel %vm447_vm2, %v11510_v49, %v6394_v13  ;;  %v6410_v7 = vunpack.i.h.bf16 %v11514_v1  ;;  %v6409_v49 = vunpack.i.l.bf16 %v11514_v1  ;;  %v1095_v4 = vsel %vm1093_vm6, %v1092_v41, %v6400_v19  ;;  %v11519_v41 = vld [vmem:[#allocation99_spill] sm:$0xff] }
 0x268   : > { %3442 = vrot.lane.b32.xlu0 %v11501_v34, %s7269_s28  ;;  %v11506_v34 = vld [vmem:[#allocation77_spill] sm:$0xff]  ;;  %v1094_v13 = vsel %vm1093_vm6, %v1091_v43, %v6399_v61  ;;  %v1098_v55 = vsel %vm1096_vm7, %v1095_v4, %v6405_v11  ;;  %v6430_v1 = vunpack.i.h.bf16 %v11518_v5  ;;  %v6420_v19 = vunpack.i.h.bf16 %v11519_v41 }
 0x269   : > { %v6429_v61 = vunpack.i.l.bf16 %v11518_v5  ;;  %v1097_v27 = vsel %vm1096_vm7, %v1094_v13, %v6404_v50  ;;  %v6419_v11 = vunpack.i.l.bf16 %v11519_v41  ;;  %v1101_v29 = vsel %vm1099_vm8, %v1098_v55, %v6410_v7  ;;  %v11522_v50 = vld [vmem:[#allocation70_spill] sm:$0xff] }
 0x26a   : > { %v6464_v5 = vunpack.i.l.bf16 %v8795_v20  ;;  %v6424_v13 = vunpack.i.l.bf16 %v11520_v45 }
 0x26b   : > { %4562 = vrot.lane.b32.xlu1 %v11502_v10, %s7268_s27 }
 0x26c   : > { %v9071_v17 = vpop.permute.xlu1 %6537  ;;  %4558 = vrot.lane.b32.xlu0 %v11505_v47, %s7268_s27 }
 0x26d   : > { %v9073_v48 = vpop.permute.xlu0 %6532  ;;  %v6539_v30 = vunpack.i.l.bf16 %v9071_v17 }
 0x26e   : > { %v6534_v46 = vunpack.i.l.bf16 %v9073_v48 }
 0x26f   : > { %4570 = vrot.lane.b32.xlu1 %v11506_v34, %s7268_s27 }
 0x270   : > { %v1679_v2 = vsel %vm447_vm2, %v11513_v59, %v6534_v46  ;;  %4566 = vrot.lane.b32.xlu0 %v11515_v18, %s7268_s27  ;;  %v11517_v46 = vld [vmem:[#allocation100_spill] sm:$0xff] }
 0x271   : > { %v9097_v44 = vpop.permute.xlu1 %6547  ;;  %v9099_v22 = vpop.permute.xlu0 %6542  ;;  %v6415_v59 = vunpack.i.h.bf16 %v11517_v46  ;;  %v1681_v35 = vsel %vm1093_vm6, %v1679_v2, %v6539_v30  ;;  %v6414_v4 = vunpack.i.l.bf16 %v11517_v46  ;;  %v11521_v30 = vld [vmem:[#allocation83_spill] sm:$0xff]  ;;  %v11524_v46 = vld [vmem:[#allocation38_spill] sm:$0xff] }
 0x272   : > { %v6544_v43 = vunpack.i.l.bf16 %v9099_v22  ;;  %v6549_v28 = vunpack.i.l.bf16 %v9097_v44  ;;  %v11523_v2 = vld [vmem:[#allocation75_spill] sm:$0xff] }
 0x273   : > { %4578 = vrot.lane.b32.xlu1 %v11516_v57, %s7268_s27  ;;  %v1112_v7 = vsel %vm447_vm2, %v11523_v2, %v6430_v1  ;;  %v6469_v1 = vunpack.i.l.bf16 %v8793_v6  ;;  %v6479_v6 = vunpack.i.l.bf16 %v8814_v62 }
 0x274   : > { %v1683_v60 = vsel %vm1096_vm7, %v1681_v35, %v6544_v43  ;;  %4574 = vrot.lane.b32.xlu0 %v11521_v30, %s7268_s27  ;;  %v1104_v35 = vsel %vm1102_vm9, %v1101_v29, %v6415_v59  ;;  %v11525_v43 = vld [vmem:[#allocation39_spill] sm:$0xff]  ;;  %v6440_v29 = vunpack.i.h.bf16 %v8737_v9  ;;  %v6439_v59 = vunpack.i.l.bf16 %v8737_v9  ;;  %v11531_v9 = vld [vmem:[#allocation72_spill] sm:$0xff] }
 0x275   : > { %v9121_v37 = vpop.permute.xlu1 %6557  ;;  %v9123_v21 = vpop.permute.xlu0 %6552  ;;  %v11526_v41 = vcombine.low %v11524_v46, %v11525_v43  ;;  %v1114_v2 = vsel %vm1093_vm6, %v1112_v7, %v6435_v58  ;;  %v11528_v46 = vld [vmem:[#allocation53_spill] sm:$0xff] }
 0x276   : > { %v6554_v55 = vunpack.i.l.bf16 %v9123_v21  ;;  %v6559_v30 = vunpack.i.l.bf16 %v9121_v37  ;;  %v11529_v43 = vcombine.low %v11527_v12, %v11528_v46  ;;  %v6444_v46 = vunpack.i.l.bf16 %v8762_v14 }
 0x277   : > { %4586 = vrot.lane.b32.xlu1 %v11522_v50, %s7268_s27  ;;  %v1111_v20 = vsel %vm447_vm2, %v11526_v41, %v6429_v61  ;;  %v1685_v50 = vsel %vm1099_vm8, %v1683_v60, %v6549_v28  ;;  %v11530_v60 = vld [vmem:[#allocation71_spill] sm:$0xff] }
 0x278   : > { %v1687_v45 = vsel %vm1102_vm9, %v1685_v50, %v6554_v55  ;;  %v2826_v61 = vsel %vm447_vm2, %v11529_v43, %v6464_v5  ;;  %4582 = vrot.lane.b32.xlu0 %v11530_v60, %s7268_s27  ;;  %v1100_v50 = vsel %vm1099_vm8, %v1097_v27, %v6409_v49  ;;  %v1113_v55 = vsel %vm1093_vm6, %v1111_v20, %v6434_v39  ;;  %v11532_v20 = vld [vmem:[#allocation86_spill] sm:$0xff]  ;;  %v11533_v39 = vld [vmem:[#allocation80_spill] sm:$0xff] }
 0x279   : > { %v9151_v41 = vpop.permute.xlu1 %6567  ;;  %v9153_v28 = vpop.permute.xlu0 %6562  ;;  %v1103_v7 = vsel %vm1102_vm9, %v1100_v50, %v6414_v4  ;;  %v1689_v15 = vsel %vm1105_vm10, %v1687_v45, %v6559_v30  ;;  %v2828_v27 = vsel %vm1093_vm6, %v2826_v61, %v6469_v1  ;;  %v1107_v1 = vsel %vm1105_vm10, %v1104_v35, %v6420_v19 }
 0x27a   : > { %v6564_v5 = vunpack.i.l.bf16 %v9153_v28  ;;  %v6569_v43 = vunpack.i.l.bf16 %v9151_v41  ;;  %v2830_v58 = vsel %vm1096_vm7, %v2828_v27, %v6474_v23  ;;  %v1106_v30 = vsel %vm1105_vm10, %v1103_v7, %v6419_v11 }
 0x27b   : > { %4560 = vrot.lane.b32.xlu1 %v11531_v9, %s7268_s27  ;;  %v1109_v23 = vsel %vm1108_vm11, %v1106_v30, %v6424_v13  ;;  %v1110_v50 = vsel %vm1108_vm11, %v1107_v1, %v6425_v56  ;;  %v11534_v27 = vcombine.low %v8649_v54, %v8654_v32  ;;  %v6445_v35 = vunpack.i.h.bf16 %v8762_v14  ;;  %v11535_v14 = vld [vmem:[#allocation84_spill] sm:$0xff] }
 0x27c   : > { %v9171_v49 = vsel %vm1108_vm11, %v1689_v15, %v6564_v5  ;;  %4556 = vrot.lane.b32.xlu0 %v11532_v20, %s7268_s27  ;;  %v6484_v15 = vunpack.i.l.bf16 %v8832_v25  ;;  %v6535_v5 = vunpack.i.h.bf16 %v9073_v48  ;;  %v1115_v7 = vsel %vm1096_vm7, %v1113_v55, %v6439_v59  ;;  %v11536_v59 = vld [vmem:[#allocation73_spill] sm:$0xff] }
 0x27d   : > { %v9174_v12 = vpop.permute.xlu1 %6577  ;;  %v9176_v4 = vpop.permute.xlu0 %6572  ;;  %v11198_v45 = vrot.slane %v9171_v49, 7  ;;  %v1693_v62 = vsel %vm447_vm2, %v11534_v27, %v6569_v43  ;;  %v1116_v48 = vsel %vm1096_vm7, %v1114_v2, %v6440_v29  ;;  %v1117_v54 = vsel %vm1099_vm8, %v1115_v7, %v6444_v46  ;;  %v11537_v46 = vld [vmem:[#allocation98_spill] sm:$0xff] }
 0x27e   : > { %v6574_v61 = vunpack.i.l.bf16 %v9176_v4  ;;  %v6579_v11 = vunpack.i.l.bf16 %v9174_v12  ;;  %v6489_v32 = vunpack.i.l.bf16 %v8830_v24  ;;  %v2832_v43 = vsel %vm1099_vm8, %v2830_v58, %v6479_v6 }
 0x27f   : > { %4568 = vrot.lane.b32.xlu1 %v11533_v39, %s7268_s27  ;;  %v5787_v19 = vsel %vm5688_vm12, %v1110_v50, %v11198_v45  ;;  %v6499_v29 = vunpack.i.l.bf16 %v8844_v42  ;;  %v6540_v2 = vunpack.i.h.bf16 %v9071_v17  ;;  %v1680_v6 = vsel %vm447_vm2, %v11537_v46, %v6535_v5 }
 0x280   : > { %v1695_v13 = vsel %vm1093_vm6, %v1693_v62, %v6574_v61  ;;  %v9201_v56 = vpack.c.bf16 %v5787_v19, %v1109_v23  ;;  %4564 = vrot.lane.b32.xlu0 %v11535_v14, %s7268_s27  ;;  %v2834_v62 = vsel %vm1102_vm9, %v2832_v43, %v6484_v15  ;;  %v6545_v58 = vunpack.i.h.bf16 %v9099_v22 }
 0x281   : > { %v9207_v30 = vpop.permute.xlu1 %6587  ;;  %v9209_v1 = vpop.permute.xlu0 %6582  ;;  %v1697_v23 = vsel %vm1096_vm7, %v1695_v13, %v6579_v11  ;;  %v1118_v50 = vsel %vm1099_vm8, %v1116_v48, %v6445_v35  ;;  %v6460_v27 = vunpack.i.h.bf16 %v8776_v38  ;;  %v6494_v15 = vunpack.i.l.bf16 %v8846_v16  ;;  %v11538_v11 = vld [vmem:[#allocation85_spill] sm:$0xff]  ;;  %v11539_v35 = vld [vmem:[#allocation76_spill] sm:$0xff] }
 0x282   : > { %v6584_v55 = vunpack.i.l.bf16 %v9209_v1  ;;  %v6589_v61 = vunpack.i.l.bf16 %v9207_v30  ;;  %v6459_v17 = vunpack.i.l.bf16 %v8776_v38  ;;  %v6455_v7 = vunpack.i.h.bf16 %v8778_v51 }
 0x283   : > { %4576 = vrot.lane.b32.xlu1 %v11536_v59, %s7268_s27  ;;  %v6454_v5 = vunpack.i.l.bf16 %v8778_v51  ;;  %v2836_v22 = vsel %vm1105_vm10, %v2834_v62, %v6489_v32  ;;  %v6550_v13 = vunpack.i.h.bf16 %v9097_v44  ;;  %v1682_v38 = vsel %vm1093_vm6, %v1680_v6, %v6540_v2  ;;  %v11541_v32 = vld [vmem:[#allocation67_spill] sm:$0xff] }
 0x284   : > { %v1699_v19 = vsel %vm1099_vm8, %v1697_v23, %v6584_v55  ;;  %4572 = vrot.lane.b32.xlu0 %v11538_v11, %s7268_s27  ;;  %v11540_v55 = vld [vmem:[#allocation66_spill] sm:$0xff]  ;;  %v1684_v45 = vsel %vm1096_vm7, %v1682_v38, %v6545_v58  ;;  %v6555_v16 = vunpack.i.h.bf16 %v9123_v21  ;;  %v9252_v25 = vsel %vm1108_vm11, %v2836_v22, %v6494_v15  ;;  %v11546_v21 = vld [vmem:[#allocation81_spill] sm:$0xff] }
 0x285   : > { %v9232_v43 = vpop.permute.xlu1 %6597  ;;  %v9234_v46 = vpop.permute.xlu0 %6592  ;;  %v11542_v62 = vcombine.low %v11540_v55, %v11541_v32  ;;  %v1701_v24 = vsel %vm1102_vm9, %v1699_v19, %v6589_v61  ;;  %11543 = vst [vmem:[#allocation37_spill] sm:$0xff] %v9252_v25  ;;  %v11544_v2 = vunpack.i.l.bf16 %v8760_v52  ;;  %v11545_v42 = vunpack.i.h.bf16 %v8760_v52 }
 0x286   : > { %v6599_v48 = vunpack.i.l.bf16 %v9232_v43  ;;  %v6594_v51 = vunpack.i.l.bf16 %v9234_v46  ;;  %v6560_v52 = vunpack.i.h.bf16 %v9121_v37  ;;  %v6565_v37 = vunpack.i.h.bf16 %v9153_v28 }
 0x287   : > { %4584 = vrot.lane.b32.xlu1 %v11539_v35, %s7268_s27  ;;  %v2840_v23 = vsel %vm447_vm2, %v11542_v62, %v6499_v29  ;;  %v1119_v6 = vsel %vm1102_vm9, %v1117_v54, %v11544_v2  ;;  %v1120_v55 = vsel %vm1102_vm9, %v1118_v50, %v11545_v42  ;;  %v6504_v29 = vunpack.i.l.bf16 %v8865_v31  ;;  %v11547_v54 = vld [vmem:[#allocation46_spill] sm:$0xff] }
 0x288   : > { %v1703_v44 = vsel %vm1105_vm10, %v1701_v24, %v6594_v51  ;;  %4580 = vrot.lane.b32.xlu0 %v11546_v21, %s7268_s27  ;;  %v1121_v61 = vsel %vm1105_vm10, %v1119_v6, %v6454_v5  ;;  %v1122_v15 = vsel %vm1105_vm10, %v1120_v55, %v6455_v7  ;;  %v1686_v42 = vsel %vm1099_vm8, %v1684_v45, %v6550_v13 }
 0x289   : > { %v6608_v58 = vpop.permute.xlu1 %6607  ;;  %v6603_v38 = vpop.permute.xlu0 %6602  ;;  %v9267_v24 = vsel %vm1108_vm11, %v1703_v44, %v6599_v48  ;;  %v1688_v22 = vsel %vm1102_vm9, %v1686_v42, %v6555_v16  ;;  %v6570_v7 = vunpack.i.h.bf16 %v9151_v41  ;;  %v1123_v62 = vsel %vm1108_vm11, %v1121_v61, %v6459_v17 }
 0x28a   : > { %v6610_v50 = vunpack.i.h.bf16 %v6608_v58  ;;  %v6605_v19 = vunpack.i.h.bf16 %v6603_v38  ;;  %v6609_v51 = vunpack.i.l.bf16 %v6608_v58  ;;  %v6604_v32 = vunpack.i.l.bf16 %v6603_v38 }
 0x28b   : > { %3450 = vrot.lane.b32.xlu1 %v11547_v54, %s7269_s28  ;;  %v5690_v5 = vrot.slane %v9267_v24, 7  ;;  %v1124_v44 = vsel %vm1108_vm11, %v1122_v15, %v6460_v27  ;;  %v6575_v45 = vunpack.i.h.bf16 %v9176_v4  ;;  %v11548_v16 = vcombine.low %v8694_v8, %v8698_v53 }
 0x28c   : > { %v2244_v48 = vsel %vm447_vm2, %v8825_v36, %v6605_v19  ;;  %v11549_v36 = vld [vmem:[#allocation47_spill] sm:$0xff]  ;;  %v1690_v28 = vsel %vm1105_vm10, %v1688_v22, %v6560_v52  ;;  %v1694_v38 = vsel %vm447_vm2, %v8751_v33, %v6570_v7  ;;  %v6580_v61 = vunpack.i.h.bf16 %v9174_v12 }
 0x28d   : > { %v2243_v13 = vsel %vm447_vm2, %v11548_v16, %v6604_v32  ;;  %v6618_v2 = vpop.permute.xlu1 %6617  ;;  %v6613_v6 = vpop.permute.xlu0 %6612  ;;  %v5788_v41 = vsel %vm5688_vm12, %v1124_v44, %v5690_v5  ;;  %3452 = vrot.lane.b32.xlu0 %v11549_v36, %s7269_s28  ;;  %v2246_v53 = vsel %vm1093_vm6, %v2244_v48, %v6610_v50  ;;  %v6509_v52 = vunpack.i.l.bf16 %v8863_v0 }
 0x28e   : > { %v6615_v4 = vunpack.i.h.bf16 %v6613_v6  ;;  %v6614_v27 = vunpack.i.l.bf16 %v6613_v6  ;;  %v6620_v8 = vunpack.i.h.bf16 %v6618_v2  ;;  %v6619_v17 = vunpack.i.l.bf16 %v6618_v2 }
 0x28f   : > { %5126 = vrot.lane.b32.xlu1 %v11502_v10, %s7269_s28  ;;  %v2245_v55 = vsel %vm1093_vm6, %v2243_v13, %v6609_v51  ;;  %v6264_v58 = vpack.c.bf16 %v5788_v41, %v1123_v62  ;;  %v1692_v42 = vsel %vm1108_vm11, %v1690_v28, %v6565_v37  ;;  %v1696_v50 = vsel %vm1093_vm6, %v1694_v38, %v6575_v45 }
 0x290   : > { %v2247_v15 = vsel %vm1096_vm7, %v2245_v55, %v6614_v27  ;;  %v2248_v54 = vsel %vm1096_vm7, %v2246_v53, %v6615_v4  ;;  %v6585_v19 = vunpack.i.h.bf16 %v9209_v1  ;;  %v2842_v33 = vsel %vm1093_vm6, %v2840_v23, %v6504_v29 }
 0x291   : > { %6265 = vmatprep.subr.bf16.mxu0 %v6264_v58  ;;  %6284 = vmatprep.subr.bf16.mxu1 %v6264_v58  ;;  %v6628_v22 = vpop.permute.xlu1 %6627  ;;  %v6623_v51 = vpop.permute.xlu0 %6622  ;;  %v6514_v12 = vunpack.i.l.bf16 %v8888_v26  ;;  %v2249_v44 = vsel %vm1099_vm8, %v2247_v15, %v6619_v17  ;;  %v2250_v1 = vsel %vm1099_vm8, %v2248_v54, %v6620_v8  ;;  %v5691_v23 = vrot.slane %v1692_v42, 7 }
 0x292   : > { %6267 = vmatpush1.bf16.msra.mxu0 %v9201_v56  ;;  %6290 = vmatpush1.bf16.msra.mxu1 %v9201_v56  ;;  %v6625_v32 = vunpack.i.h.bf16 %v6623_v51  ;;  %v6624_v7 = vunpack.i.l.bf16 %v6623_v51  ;;  %v6630_v48 = vunpack.i.h.bf16 %v6628_v22  ;;  %v6629_v62 = vunpack.i.l.bf16 %v6628_v22  ;;  %v11551_v51 = vld [vmem:[#allocation97_spill] sm:$0xff] }
 0x293   : > { %5122 = vrot.lane.b32.xlu0 %v11505_v47, %s7269_s28  ;;  %5134 = vrot.lane.b32.xlu1 %v11506_v34, %s7269_s28  ;;  %v1698_v29 = vsel %vm1096_vm7, %v1696_v50, %v6580_v61  ;;  %v11203_v45 = vrot.slane %v9252_v25, 5  ;;  %v2844_v16 = vsel %vm1096_vm7, %v2842_v33, %v6509_v52  ;;  %v6590_v13 = vunpack.i.h.bf16 %v9207_v30 }
 0x294   : > { %v2251_v56 = vsel %vm1102_vm9, %v2249_v44, %v6624_v7  ;;  %v2252_v37 = vsel %vm1102_vm9, %v2250_v1, %v6625_v32  ;;  %v1700_v2 = vsel %vm1099_vm8, %v1698_v29, %v6585_v19  ;;  %v6519_v53 = vunpack.i.l.bf16 %v8886_v3  ;;  %v11596_v3 = vld [vmem:[#allocation121_spill] sm:$0xff] }
 0x295   : > { %v6638_v6 = vpop.permute.xlu1 %6637  ;;  %v6633_v41 = vpop.permute.xlu0 %6632  ;;  %v2846_v8 = vsel %vm1099_vm8, %v2844_v16, %v6514_v12  ;;  %v2253_v17 = vsel %vm1105_vm10, %v2251_v56, %v6629_v62  ;;  %v2254_v55 = vsel %vm1105_vm10, %v2252_v37, %v6630_v48  ;;  %v11550_v38 = vrot.slane %v9171_v49, 7  ;;  %v11554_v62 = vld [vmem:[#allocation70_spill] sm:$0xff] }
 0x296   : > { %v6640_v36 = vunpack.i.h.bf16 %v6638_v6  ;;  %v6639_v28 = vunpack.i.l.bf16 %v6638_v6  ;;  %v6635_v4 = vunpack.i.h.bf16 %v6633_v41  ;;  %v6634_v27 = vunpack.i.l.bf16 %v6633_v41  ;;  %v11555_v56 = vld [vmem:[#allocation62_spill] sm:$0xff] }
 0x297   : > { %5130 = vrot.lane.b32.xlu0 %v11515_v18, %s7269_s28  ;;  %5142 = vrot.lane.b32.xlu1 %v11516_v57, %s7269_s28  ;;  %v5692_v61 = vsel %vm5688_vm12, %v11550_v38, %v5691_v23  ;;  %v6595_v15 = vunpack.i.h.bf16 %v9234_v46  ;;  %v1702_v54 = vsel %vm1102_vm9, %v1700_v2, %v6590_v13  ;;  %v11552_v33 = vcombine.low %v8684_v63, %v11551_v51  ;;  %v11553_v46 = vld [vmem:[#allocation83_spill] sm:$0xff] }
 0x298   : > { %v2255_v30 = vsel %vm1108_vm11, %v2253_v17, %v6634_v27  ;;  %v2256_v58 = vsel %vm1108_vm11, %v2254_v55, %v6635_v4  ;;  %v2258_v22 = vsel %vm447_vm2, %v8877_v40, %v6640_v36  ;;  %v6600_v40 = vunpack.i.h.bf16 %v9232_v43  ;;  %v11556_v55 = vld [vmem:[#allocation64_spill] sm:$0xff] }
 0x299   : > { %v5704_v52 = vrot.slane %v2255_v30, 6  ;;  %v5706_v42 = vrot.slane %v2256_v58, 6  ;;  %v6648_v50 = vpop.permute.xlu1 %6647  ;;  %v6643_v19 = vpop.permute.xlu0 %6642  ;;  %v2257_v12 = vsel %vm447_vm2, %v11552_v33, %v6639_v28  ;;  %v6524_v37 = vunpack.i.l.bf16 %v11555_v56  ;;  %v11557_v33 = vld [vmem:[#allocation78_spill] sm:$0xff]  ;;  %v11595_v56 = vld [vmem:[#allocation125_spill] sm:$0xff] }
 0x29a   : > { %v6645_v32 = vunpack.i.h.bf16 %v6643_v19  ;;  %v6644_v49 = vunpack.i.l.bf16 %v6643_v19  ;;  %v6650_v7 = vunpack.i.h.bf16 %v6648_v50  ;;  %v6649_v48 = vunpack.i.l.bf16 %v6648_v50 }
 0x29b   : > { %5138 = vrot.lane.b32.xlu0 %v11553_v46, %s7269_s28  ;;  %5150 = vrot.lane.b32.xlu1 %v11554_v62, %s7269_s28  ;;  %v5707_v44 = vsel %vm5703_vm14, %v5704_v52, %v5706_v42  ;;  %v5789_v1 = vsel %vm5703_vm14, %v5692_v61, %v5704_v52  ;;  %v1704_v16 = vsel %vm1105_vm10, %v1702_v54, %v6595_v15  ;;  %v6529_v30 = vunpack.i.l.bf16 %v11556_v55  ;;  %v11594_v55 = vld [vmem:[#allocation119_spill] sm:$0xff] }
 0x29c   : > { %v2260_v63 = vsel %vm1093_vm6, %v2258_v22, %v6645_v32  ;;  %v2259_v23 = vsel %vm1093_vm6, %v2257_v12, %v6644_v49  ;;  %v5791_v29 = vsel %vm5718_vm13, %v5707_v44, %v11203_v45  ;;  %v2848_v41 = vsel %vm1102_vm9, %v2846_v8, %v6519_v53 }
 0x29d   : > { %v6658_v13 = vpop.permute.xlu1 %6657  ;;  %v6653_v2 = vpop.permute.xlu0 %6652  ;;  %v6270_v6 = vpack.c.bf16 %v5791_v29, %v5789_v1  ;;  %v2261_v27 = vsel %vm1096_vm7, %v2259_v23, %v6649_v48  ;;  %v2262_v17 = vsel %vm1096_vm7, %v2260_v63, %v6650_v7  ;;  %v1706_v58 = vsel %vm1108_vm11, %v1704_v16, %v6600_v40  ;;  %v11560_v16 = vld [vmem:[#allocation60_spill] sm:$0xff] }
 0x29e   : > { %v6655_v36 = vunpack.i.h.bf16 %v6653_v2  ;;  %v6654_v28 = vunpack.i.l.bf16 %v6653_v2  ;;  %v6660_v43 = vunpack.i.h.bf16 %v6658_v13  ;;  %v6659_v4 = vunpack.i.l.bf16 %v6658_v13 }
 0x29f   : > { %5146 = vrot.lane.b32.xlu0 %v11530_v60, %s7269_s28  ;;  %5120 = vrot.lane.b32.xlu1 %v11532_v20, %s7269_s28  ;;  %v2850_v38 = vsel %vm1105_vm10, %v2848_v41, %v6524_v37  ;;  %v5693_v19 = vrot.slane %v1706_v58, 7  ;;  %v11559_v37 = vld [vmem:[#allocation29_spill] sm:$0xff]  ;;  %v11561_v24 = vmov 0.0   ;;  %v11566_v58 = vld [vmem:[#allocation132_spill] sm:$0xff] }
 0x2a0   : > { %v2263_v53 = vsel %vm1099_vm8, %v2261_v27, %v6654_v28  ;;  %v2264_v8 = vsel %vm1099_vm8, %v2262_v17, %v6655_v36  ;;  %v9378_v49 = vsel %vm1108_vm11, %v2850_v38, %v6529_v30  ;;  %v3236_v13 = vrot.slane %v11560_v16, %v11559_v37  ;;  %v11562_v36 = vld [vmem:[#allocation79_spill] sm:$0xff]  ;;  %v11563_v28 = vld [vmem:[#allocation30_spill] sm:$0xff] }
 0x2a1   : > { %v6668_v61 = vpop.permute.xlu1 %6667  ;;  %v6663_v15 = vpop.permute.xlu0 %6662  ;;  %v2265_v22 = vsel %vm1102_vm9, %v2263_v53, %v6659_v4  ;;  %v2266_v51 = vsel %vm1102_vm9, %v2264_v8, %v6660_v43  ;;  %11558 = vst [vmem:[#allocation32_spill] sm:$0xff] %v9378_v49  ;;  %v5694_v40 = vsel %vm5688_vm12, %v5690_v5, %v5693_v19  ;;  %v11204_v63 = vrot.slane %v9378_v49, 5  ;;  %v11565_v27 = vld [vmem:[#allocation134_spill] sm:$0xff] }
 0x2a2   : > { %v6670_v54 = vunpack.i.h.bf16 %v6668_v61  ;;  %v6669_v52 = vunpack.i.l.bf16 %v6668_v61  ;;  %v6665_v42 = vunpack.i.h.bf16 %v6663_v15  ;;  %v6664_v50 = vunpack.i.l.bf16 %v6663_v15  ;;  %v11567_v53 = vld [vmem:[#allocation130_spill] sm:$0xff]  ;;  %v11569_v61 = vld [vmem:[#allocation127_spill] sm:$0xff]  ;;  %v11570_v15 = vld [vmem:[#allocation129_spill] sm:$0xff] }
 0x2a3   : > { %4590 = vrot.lane.b32.xlu0 %v11557_v33, %s7268_s27  ;;  %5128 = vrot.lane.b32.xlu1 %v11535_v14, %s7269_s28  ;;  %v3244_v5 = vcombine.high %v3236_v13, %v11561_v24  ;;  %v9407_v43 = vrot.slane %v3236_v13, %v11563_v28  ;;  %v11568_v8 = vcombine.high %v11566_v58, %v11567_v53  ;;  %v11589_v58 = vld [vmem:[#allocation113_spill] sm:$0xff] }
 0x2a4   : > { %v2267_v12 = vsel %vm1105_vm10, %v2265_v22, %v6664_v50  ;;  %v2268_v32 = vsel %vm1105_vm10, %v2266_v51, %v6665_v42  ;;  %v11572_v42 = vld [vmem:[#allocation61_spill] sm:$0xff] }
 0x2a5   : > { %v2270_v7 = vsel %vm1108_vm11, %v2268_v32, %v6670_v54  ;;  %v2269_v48 = vsel %vm1108_vm11, %v2267_v12, %v6669_v52  ;;  %11564 = vst [vmem:[#allocation28_spill] sm:$0xff] %v9407_v43  ;;  %v3258_v4 = vrot.slane %v3244_v5, %v11563_v28  ;;  %v11571_v54 = vcombine.high %v11569_v61, %v11570_v15  ;;  %v11575_v32 = vld [vmem:[#allocation36_spill] sm:$0xff] }
 0x2a6   : > { %v5708_v44 = vrot.slane %v2270_v7, 6  ;;  %v5705_v1 = vrot.slane %v2269_v48, 6  ;;  %v11576_v7 = vld [vmem:[#allocation59_spill] sm:$0xff] }
 0x2a7   : > { %5124 = vrot.lane.b32.xlu0 %v11531_v9, %s7269_s28  ;;  %5136 = vrot.lane.b32.xlu1 %v11538_v11, %s7269_s28  ;;  %v6686_v17 = vpack.i.bf16 %v11565_v27, %v3258_v4  ;;  %v3275_v30 = vcombine.high %v3258_v4, %v11561_v24  ;;  %v3673_v48 = vcombine.low %v11576_v7, %v11575_v32 }
 0x2a8   : > { %v5709_v23 = vsel %vm5703_vm14, %v5705_v1, %v5708_v44  ;;  %v5790_v29 = vsel %vm5703_vm14, %v5694_v40, %v5705_v1  ;;  %v11577_v44 = vld [vmem:[#allocation35_spill] sm:$0xff]  ;;  %v11578_v1 = vld [vmem:[#allocation58_spill] sm:$0xff] }
 0x2a9   : > { %v5792_v2 = vsel %vm5718_vm13, %v5709_v23, %v11204_v63  ;;  %v6696_v52 = vpack.i.bf16 %v3275_v30, %v11571_v54  ;;  %v3657_v40 = vcombine.low %v11578_v1, %v11577_v44  ;;  %v11579_v30 = vld [vmem:[#allocation116_spill] sm:$0xff]  ;;  %v11581_v54 = vld [vmem:[#allocation114_spill] sm:$0xff]  ;;  %v11586_v63 = vld [vmem:[#allocation115_spill] sm:$0xff] }
 0x2aa   : > { %v6268_v41 = vpack.c.bf16 %v5792_v2, %v5790_v29  ;;  %v9452_v2 = vrot.slane %v3673_v48, %v11559_v37  ;;  %v11583_v48 = vld [vmem:[#allocation124_spill] sm:$0xff] }
 0x2ab   : > { %5132 = vrot.lane.b32.xlu0 %v11533_v39, %s7269_s28  ;;  %5144 = vrot.lane.b32.xlu1 %v11546_v21, %s7269_s28 }
 0x2ac   : > { %6269 = vmatprep.subr.bf16.mxu0 %v6268_v41  ;;  %6285 = vmatprep.subr.bf16.mxu1 %v6268_v41  ;;  %v9455_v41 = vrot.slane %v3657_v40, %v11559_v37  ;;  %v11584_v40 = vld [vmem:[#allocation120_spill] sm:$0xff] }
 0x2ad   : > { %6271 = vmatpush1.bf16.msra.mxu0 %v6270_v6  ;;  %6291 = vmatpush1.bf16.msra.mxu1 %v6270_v6  ;;  %v3274_v6 = vcombine.high %v9407_v43, %v11561_v24 }
 0x2ae   : > { %v3721_v61 = vcombine.low %v9455_v41, %v9452_v2 }
 0x2af   : > { %5140 = vrot.lane.b32.xlu0 %v11536_v59, %s7269_s28  ;;  %4588 = vrot.lane.b32.xlu1 %v11562_v36, %s7268_s27  ;;  %v6681_v38 = vpack.i.bf16 %v3274_v6, %v11568_v8  ;;  %v11580_v8 = vld [vmem:[#allocation112_spill] sm:$0xff] }
 0x2b3   : > { %5148 = vrot.lane.b32.xlu0 %v11539_v35, %s7269_s28  ;;  %5152 = vrot.lane.b32.xlu1 %v11562_v36, %s7269_s28 }
 0x2b7   : > { %5154 = vrot.lane.b32.xlu0 %v11557_v33, %s7269_s28  ;;  %6687 = vrot.lane.b32.xlu1 %v6686_v17, %s7271_s24 }
 0x2bb   : > { %6682 = vrot.lane.b32.xlu0 %v6681_v38, %s7270_s7  ;;  %6697 = vrot.lane.b32.xlu1 %v6696_v52, %s7272_s26  ;;  %v3110_v38 = vcombine.high %v11580_v8, %v11579_v30  ;;  %v11582_v52 = vld [vmem:[#allocation65_spill] sm:$0xff] }
 0x2bc   : > { %v11588_v8 = vld [vmem:[#allocation117_spill] sm:$0xff] }
 0x2bd   : > { %v9475_v30 = vrot.slane %v3110_v38, %v11559_v37  ;;  %v2925_v43 = vcombine.high %v11589_v58, %v11588_v8  ;;  %v3229_v38 = vcombine.high %v11560_v16, %v11561_v24  ;;  %v11593_v8 = vld [vmem:[#allocation123_spill] sm:$0xff]  ;;  %v2957_v58 = vcombine.high %v11596_v3, %v11595_v56 }
 0x2be   : > { %v2941_v16 = vcombine.high %v11594_v55, %v11593_v8 }
 0x2bf   : > { %6707 = vrot.lane.b32.xlu1 %v11572_v42, %s7272_s26  ;;  %v3094_v42 = vcombine.high %v11582_v52, %v11581_v54  ;;  %v9482_v52 = vrot.slane %v3721_v61, %v11563_v28 }
 0x2c1   : > { %v9431_v50 = vpop.permute.xlu1 %6677  ;;  %11592 = vst [vmem:[#allocation74_spill] sm:$0xff] %v9482_v52 }
 0x2c2   : > { %11573 = vst [vmem:[#allocation41_spill] sm:$0xff] %v9431_v50  ;;  %v9433_v19 = vpop.permute.xlu0 %6672  ;;  %v11590_v50 = vld [vmem:[#allocation122_spill] sm:$0xff] }
 0x2c3   : > { %11574 = vst [vmem:[#allocation31_spill] sm:$0xff] %v9433_v19  ;;  %v11591_v19 = vld [vmem:[#allocation118_spill] sm:$0xff] }
 0x2c4   : > { %v3126_v54 = vcombine.high %v11591_v19, %v11590_v50 }
 0x2c5   : > { %v9435_v22 = vpop.permute.xlu1 %3440 }
 0x2c6   : > { %v9437_v51 = vpop.permute.xlu0 %3436 }
 0x2c9   : > { %v9439_v12 = vpop.permute.xlu1 %3448 }
 0x2ca   : > { %v3705_v23 = vcombine.low %v9435_v22, %v9439_v12  ;;  %v9447_v29 = vpop.permute.xlu0 %3444  ;;  %v3706_v55 = vcombine.high %v9435_v22, %v9439_v12  ;;  %v3658_v22 = vcombine.high %v11578_v1, %v11577_v44 }
 0x2cb   : > { %v3689_v4 = vcombine.low %v9437_v51, %v9447_v29  ;;  %v3690_v3 = vcombine.high %v9437_v51, %v9447_v29  ;;  %v3722_v51 = vcombine.high %v9455_v41, %v9452_v2 }
 0x2cc   : > { %v3713_v5 = vrot.slane %v3705_v23, %v11559_v37  ;;  %v3142_v23 = vcombine.high %v11584_v40, %v11583_v48  ;;  %v9486_v40 = vrot.slane %v3094_v42, %v11559_v37  ;;  %v9501_v42 = vrot.slane %v2925_v43, %v11559_v37 }
 0x2cd   : > { %v9449_v13 = vpop.permute.xlu1 %3422  ;;  %v3697_v6 = vrot.slane %v3689_v4, %v11559_v37  ;;  %v11587_v4 = vld [vmem:[#allocation63_spill] sm:$0xff]  ;;  %v9515_v43 = vrot.slane %v3229_v38, %v11559_v37 }
 0x2ce   : > { %v3419_v27 = vpop.permute.xlu0 %3418  ;;  %v2909_v25 = vcombine.high %v11587_v4, %v11586_v63  ;;  %v9489_v63 = vrot.slane %v3142_v23, %v11559_v37  ;;  %v3173_v4 = vcombine.low %v9486_v40, %v9475_v30  ;;  %v9504_v23 = vrot.slane %v3126_v54, %v11559_v37  ;;  %v11597_v54 = vld [vmem:[#allocation126_spill] sm:$0xff] }
 0x2cf   : > { %v3753_v15 = vcombine.low %v3697_v6, %v3713_v5  ;;  %v3044_v11 = vcombine.high %v11597_v54, %v11561_v24  ;;  %v3754_v56 = vcombine.high %v3697_v6, %v3713_v5  ;;  %v9542_v5 = vrot.slane %v9515_v43, %v11563_v28 }
 0x2d0   : > { %v9496_v50 = vrot.slane %v2909_v25, %v11559_v37  ;;  %v3205_v31 = vcombine.low %v9504_v23, %v9489_v63  ;;  %v9565_v6 = vrot.slane %v3658_v22, %v11559_v37 }
 0x2d1   : > { %v3431_v17 = vpop.permute.xlu1 %3430  ;;  %v9470_v45 = vrot.slane %v3753_v15, %v11563_v28 }
 0x2d2   : > { %v3427_v49 = vpop.permute.xlu0 %3426  ;;  %v3488_v15 = vcombine.low %v9449_v13, %v3431_v17  ;;  %v3213_v54 = vrot.slane %v3205_v31, %v11563_v28 }
 0x2d3   : > { %11585 = vst [vmem:[#allocation42_spill] sm:$0xff] %v9470_v45  ;;  %v3472_v48 = vcombine.low %v3419_v27, %v3427_v49  ;;  %v3473_v59 = vcombine.high %v3419_v27, %v3427_v49  ;;  %v3736_v27 = vrot.slane %v3722_v51, %v11563_v28  ;;  %v3786_v31 = vcombine.high %v9482_v52, %v9470_v45 }
 0x2d4   : > { %v3496_v25 = vrot.slane %v3488_v15, %v11559_v37  ;;  %v3489_v15 = vcombine.high %v9449_v13, %v3431_v17  ;;  %v9596_v51 = vrot.slane %v2941_v16, %v11559_v37 }
 0x2d5   : > { %v3439_v53 = vpop.permute.xlu1 %3438  ;;  %v3480_v26 = vrot.slane %v3472_v48, %v11559_v37 }
 0x2d6   : > { %v3435_v19 = vpop.permute.xlu0 %3434 }
 0x2d7   : > { %v3536_v12 = vcombine.low %v3480_v26, %v3496_v25  ;;  %v3537_v29 = vcombine.high %v3480_v26, %v3496_v25  ;;  %v3768_v26 = vrot.slane %v3754_v56, %v11563_v28 }
 0x2d9   : > { %v3447_v61 = vpop.permute.xlu1 %3446  ;;  %v9569_v17 = vrot.slane %v3536_v12, %v11563_v28  ;;  %v9599_v12 = vrot.slane %v3044_v11, %v11559_v37 }
 0x2da   : > { %v3520_v0 = vcombine.low %v3439_v53, %v3447_v61  ;;  %v3521_v21 = vcombine.high %v3439_v53, %v3447_v61  ;;  %v3443_v48 = vpop.permute.xlu0 %3442  ;;  %v3674_v53 = vcombine.high %v11576_v7, %v11575_v32  ;;  %v9545_v32 = vrot.slane %v3706_v55, %v11559_v37 }
 0x2db   : > { %v3504_v35 = vcombine.low %v3435_v19, %v3443_v48  ;;  %v3505_v20 = vcombine.high %v3435_v19, %v3443_v48  ;;  %v9548_v7 = vrot.slane %v3690_v3, %v11559_v37  ;;  %11602 = vst [vmem:[#allocation69_spill] sm:$0xff] %v9569_v17  ;;  %v3551_v19 = vrot.slane %v3537_v29, %v11563_v28 }
 0x2dc   : > { %v3528_v38 = vrot.slane %v3520_v0, %v11559_v37  ;;  %v9534_v13 = vrot.slane %v3521_v21, %v11559_v37  ;;  %v9562_v41 = vrot.slane %v3674_v53, %v11559_v37  ;;  %v9580_v55 = vrot.slane %v2957_v58, %v11559_v37 }
 0x2dd   : > { %v9524_v8 = vpop.permute.xlu1 %4562  ;;  %v3512_v49 = vrot.slane %v3504_v35, %v11559_v37  ;;  %v9538_v0 = vrot.slane %v3505_v20, %v11559_v37  ;;  %v9556_v35 = vrot.slane %v3489_v15, %v11559_v37  ;;  %v9559_v20 = vrot.slane %v3473_v59, %v11559_v37 }
 0x2de   : > { %11598 = vst [vmem:[#allocation55_spill] sm:$0xff] %v9524_v8  ;;  %v9551_v44 = vpop.permute.xlu0 %4558  ;;  %v3769_v3 = vcombine.low %v9548_v7, %v9545_v32  ;;  %v3788_v48 = vcombine.high %v3736_v27, %v3768_v26  ;;  %v3181_v58 = vrot.slane %v3173_v4, %v11563_v28  ;;  %v3737_v29 = vcombine.low %v9565_v6, %v9562_v41 }
 0x2df   : > { %11599 = vst [vmem:[#allocation54_spill] sm:$0xff] %v9551_v44  ;;  %11601 = vst [vmem:[#allocation77_spill] sm:$0xff] %v9559_v20  ;;  %v3568_v1 = vcombine.low %v3512_v49, %v3528_v38  ;;  %v3569_v2 = vcombine.high %v3512_v49, %v3528_v38  ;;  %v3584_v25 = vcombine.low %v9538_v0, %v9534_v13 }
 0x2e0   : > { %v3552_v38 = vcombine.low %v9559_v20, %v9556_v35  ;;  %v3276_v20 = vcombine.high %v9542_v5, %v11561_v24  ;;  %v2988_v4 = vcombine.low %v9496_v50, %v9501_v42  ;;  %v3020_v16 = vcombine.low %v9596_v51, %v9580_v55 }
 0x2e1   : > { %v9553_v21 = vpop.permute.xlu1 %4570  ;;  %v9573_v61 = vrot.slane %v3568_v1, %v11563_v28  ;;  %v3583_v59 = vrot.slane %v3569_v2, %v11563_v28  ;;  %v9604_v49 = vrot.slane %v3584_v25, %v11563_v28  ;;  %v9613_v11 = vrot.slane %v3769_v3, %v11563_v28 }
 0x2e2   : > { %11600 = vst [vmem:[#allocation26_spill] sm:$0xff] %v9553_v21  ;;  %v9584_v56 = vpop.permute.xlu0 %4566  ;;  %v9628_v3 = vrot.slane %v3737_v29, %v11563_v28 }
 0x2e3   : > { %11603 = vst [vmem:[#allocation33_spill] sm:$0xff] %v9573_v61  ;;  %11604 = vst [vmem:[#allocation34_spill] sm:$0xff] %v9584_v56  ;;  %v3603_v53 = vcombine.high %v3551_v19, %v3583_v59  ;;  %v3601_v22 = vcombine.high %v9569_v17, %v9573_v61  ;;  %v3602_v25 = vcombine.low %v3551_v19, %v3583_v59 }
 0x2e4   : > { %v3787_v59 = vcombine.low %v3736_v27, %v3768_v26  ;;  %v3789_v26 = vcombine.low %v9628_v3, %v9613_v11  ;;  %v3225_v27 = vcombine.low %v3181_v58, %v3213_v54 }
 0x2e5   : > { %v9586_v15 = vpop.permute.xlu1 %4578  ;;  %v6716_v1 = vpack.i.bf16 %v3603_v53, %v3788_v48  ;;  %v6691_v2 = vpack.i.bf16 %v3601_v22, %v3786_v31  ;;  %v9620_v48 = vrot.slane %v3552_v38, %v11563_v28  ;;  %v4811_v53 = vcombine.low %v9524_v8, %v9553_v21 }
 0x2e6   : > { %11605 = vst [vmem:[#allocation96_spill] sm:$0xff] %v9586_v15  ;;  %v9615_v45 = vpop.permute.xlu0 %4574  ;;  %v4795_v22 = vcombine.low %v9551_v44, %v9584_v56  ;;  %v3226_v31 = vcombine.high %v3181_v58, %v3213_v54  ;;  %v3081_v8 = vrot.slane %v9599_v12, %v11563_v28  ;;  %v3028_v44 = vrot.slane %v3020_v16, %v11563_v28 }
 0x2e7   : > { %11606 = vst [vmem:[#allocation94_spill] sm:$0xff] %v9615_v45  ;;  %6717 = vrot.lane.b32.xlu1 %v6716_v1, %s7272_s26  ;;  %6692 = vrot.lane.b32.xlu0 %v6691_v2, %s7270_s7  ;;  %v3604_v1 = vcombine.low %v9620_v48, %v9604_v49  ;;  %v6701_v56 = vpack.i.bf16 %v3602_v25, %v3787_v59 }
 0x2e8   : > { %v6726_v21 = vpack.i.bf16 %v3276_v20, %v3226_v31  ;;  %v9647_v38 = vrot.slane %v4811_v53, %v11559_v37  ;;  %v9650_v61 = vrot.slane %v4795_v22, %v11559_v37  ;;  %v2996_v25 = vrot.slane %v2988_v4, %v11563_v28 }
 0x2e9   : > { %v9617_v52 = vpop.permute.xlu1 %4586  ;;  %v6736_v58 = vpack.i.bf16 %v3604_v1, %v3789_v26  ;;  %v3091_v53 = vcombine.high %v3081_v8, %v11561_v24  ;;  %v6711_v31 = vpack.i.bf16 %v9542_v5, %v3225_v27 }
 0x2ea   : > { %11607 = vst [vmem:[#allocation95_spill] sm:$0xff] %v9617_v52  ;;  %v4843_v19 = vcombine.low %v9586_v15, %v9617_v52  ;;  %v9640_v29 = vpop.permute.xlu0 %4582  ;;  %11610 = vst [vmem:[#allocation100_spill] sm:$0xff] %v9647_v38  ;;  %v3040_v59 = vcombine.low %v2996_v25, %v3028_v44  ;;  %v9725_v15 = vrot.slane %v11562_v36, %v11559_v37 }
 0x2eb   : > { %11608 = vst [vmem:[#allocation82_spill] sm:$0xff] %v9640_v29  ;;  %11611 = vst [vmem:[#allocation101_spill] sm:$0xff] %v9650_v61  ;;  %v4827_v16 = vcombine.low %v9615_v45, %v9640_v29  ;;  %6727 = vrot.lane.b32.xlu1 %v6726_v21, %s7274_s1  ;;  %6702 = vrot.lane.b32.xlu0 %v6701_v56, %s7271_s24  ;;  %v4859_v21 = vcombine.low %v9650_v61, %v9647_v38  ;;  %v11636_v61 = vld [vmem:[#allocation40_spill] sm:$0xff] }
 0x2ec   : > { %v9653_v20 = vrot.slane %v4843_v19, %v11559_v37  ;;  %v3041_v56 = vcombine.high %v2996_v25, %v3028_v44  ;;  %v6721_v5 = vpack.i.bf16 %v3081_v8, %v3040_v59  ;;  %v4248_v8 = vcombine.high %v11502_v10, %v11506_v34  ;;  %v11623_v10 = vld [vmem:[#allocation87_spill] sm:$0xff]  ;;  %v11624_v34 = vld [vmem:[#allocation90_spill] sm:$0xff] }
 0x2ed   : > { %v9642_v2 = vpop.permute.xlu1 %4560  ;;  %v9661_v54 = vrot.slane %v4827_v16, %v11559_v37  ;;  %v9683_v17 = vrot.slane %v4859_v21, %v11563_v28  ;;  %v4232_v59 = vcombine.high %v11505_v47, %v11515_v18  ;;  %v4280_v44 = vcombine.high %v11516_v57, %v11554_v62  ;;  %v11625_v57 = vld [vmem:[#allocation89_spill] sm:$0xff]  ;;  %v11626_v62 = vld [vmem:[#allocation48_spill] sm:$0xff] }
 0x2ee   : > { %11609 = vst [vmem:[#allocation68_spill] sm:$0xff] %v9642_v2  ;;  %v9664_v22 = vpop.permute.xlu0 %4556  ;;  %v6746_v26 = vpack.i.bf16 %v3091_v53, %v3041_v56  ;;  %v4328_v45 = vcombine.high %v11624_v34, %v11623_v10  ;;  %v4296_v10 = vcombine.high %v11626_v62, %v11625_v57  ;;  %v4264_v57 = vcombine.high %v11553_v46, %v11530_v60 }
 0x2ef   : > { %11612 = vst [vmem:[#allocation99_spill] sm:$0xff] %v9661_v54  ;;  %11613 = vst [vmem:[#allocation102_spill] sm:$0xff] %v9664_v22  ;;  %v4891_v4 = vcombine.low %v9661_v54, %v9653_v20  ;;  %6737 = vrot.lane.b32.xlu1 %v6736_v58, %s7273_s9  ;;  %6712 = vrot.lane.b32.xlu0 %v6711_v31, %s7273_s9  ;;  %v9721_v29 = vrot.slane %v4232_v59, %v11559_v37  ;;  %v11640_v54 = vld [vmem:[#allocation49_spill] sm:$0xff] }
 0x2f0   : > { %11618 = vst [vmem:[#allocation53_spill] sm:$0xff] %v9683_v17  ;;  %v9765_v52 = vrot.slane %v9725_v15, %v11563_v28 }
 0x2f1   : > { %v9667_v19 = vpop.permute.xlu1 %4568  ;;  %v9676_v1 = vrot.slane %v4891_v4, %v11563_v28 }
 0x2f2   : > { %11614 = vst [vmem:[#allocation75_spill] sm:$0xff] %v9667_v19  ;;  %v9678_v16 = vpop.permute.xlu0 %4564  ;;  %v4626_v47 = vcombine.low %v9642_v2, %v9667_v19  ;;  %11631 = vst [vmem:[#allocation47_spill] sm:$0xff] %v9765_v52 }
 0x2f3   : > { %11615 = vst [vmem:[#allocation38_spill] sm:$0xff] %v9676_v1  ;;  %11616 = vst [vmem:[#allocation39_spill] sm:$0xff] %v9678_v16  ;;  %6747 = vrot.lane.b32.xlu1 %v6746_v26, %s7274_s1  ;;  %6722 = vrot.lane.b32.xlu0 %v6721_v5, %s7273_s9  ;;  %v9710_v5 = vrot.slane %v4248_v8, %v11559_v37  ;;  %v4610_v18 = vcombine.low %v9664_v22, %v9678_v16 }
 0x2f4   : > { %v9742_v22 = vrot.slane %v4280_v44, %v11559_v37  ;;  %v4374_v16 = vrot.slane %v11557_v33, %v11559_v37  ;;  %v9761_v44 = vrot.slane %v4328_v45, %v11563_v28  ;;  %v4063_v45 = vcombine.high %v11531_v9, %v11533_v39 }
 0x2f5   : > { %v9680_v27 = vpop.permute.xlu1 %4576  ;;  %v3174_v9 = vcombine.high %v9486_v40, %v9475_v30  ;;  %v3259_v39 = vcombine.high %v9515_v43, %v11561_v24  ;;  %v4227_v40 = vcombine.high %v9765_v52, %v11561_v24 }
 0x2f6   : > { %11617 = vst [vmem:[#allocation52_spill] sm:$0xff] %v9680_v27  ;;  %v9689_v25 = vpop.permute.xlu0 %4572  ;;  %11630 = vst [vmem:[#allocation46_spill] sm:$0xff] %v9761_v44 }
 0x2f7   : > { %11619 = vst [vmem:[#allocation71_spill] sm:$0xff] %v9689_v25  ;;  %v3273_v52 = vrot.slane %v3259_v39, %v11563_v28  ;;  %v4382_v39 = vcombine.high %v4374_v16, %v11561_v24 }
 0x2f9   : > { %v9691_v58 = vpop.permute.xlu1 %4584 }
 0x2fa   : > { %11620 = vst [vmem:[#allocation72_spill] sm:$0xff] %v9691_v58  ;;  %v9693_v53 = vpop.permute.xlu0 %4580  ;;  %v4658_v21 = vcombine.low %v9680_v27, %v9691_v58  ;;  %v9785_v27 = vrot.slane %v4374_v16, %v11563_v28 }
 0x2fb   : > { %11621 = vst [vmem:[#allocation80_spill] sm:$0xff] %v9693_v53  ;;  %v4642_v4 = vcombine.low %v9689_v25, %v9693_v53  ;;  %v9782_v53 = vrot.slane %v4296_v10, %v11563_v28 }
 0x2fc   : > { %v9734_v34 = vrot.slane %v4658_v21, %v11559_v37  ;;  %v9751_v21 = vrot.slane %v4626_v47, %v11559_v37  ;;  %11635 = vst [vmem:[#allocation78_spill] sm:$0xff] %v9785_v27 }
 0x2fd   : > { %v9695_v31 = vpop.permute.xlu1 %3450  ;;  %v9737_v2 = vrot.slane %v4642_v4, %v11559_v37  ;;  %v9754_v4 = vrot.slane %v4610_v18, %v11559_v37  ;;  %v3206_v18 = vcombine.high %v9504_v23, %v9489_v63  ;;  %11634 = vst [vmem:[#allocation70_spill] sm:$0xff] %v9782_v53  ;;  %v11637_v63 = vld [vmem:[#allocation44_spill] sm:$0xff] }
 0x2fe   : > { %v9729_v8 = vrot.slane %v9695_v31, %v11559_v37  ;;  %v4360_v23 = vcombine.high %v11637_v63, %v11636_v61  ;;  %v11639_v63 = vld [vmem:[#allocation45_spill] sm:$0xff] }
 0x2ff   : > { %v9705_v56 = vpop.permute.xlu0 %3452  ;;  %11627 = vst [vmem:[#allocation98_spill] sm:$0xff] %v9754_v4  ;;  %v4706_v25 = vcombine.low %v9737_v2, %v9734_v34  ;;  %v4674_v10 = vcombine.low %v9754_v4, %v9751_v21  ;;  %v4175_v30 = vcombine.high %v11640_v54, %v11639_v63  ;;  %v9813_v43 = vrot.slane %v3206_v18, %v11563_v28 }
 0x300   : > { %v3800_v19 = vrot.slane %v9705_v56, %v11559_v37  ;;  %v9769_v60 = vrot.slane %v9729_v8, %v11563_v28  ;;  %v4412_v18 = vcombine.high %v9785_v27, %v11561_v24  ;;  %v3188_v4 = vrot.slane %v3174_v9, %v11563_v28  ;;  %v11644_v27 = vld [vmem:[#allocation76_spill] sm:$0xff] }
 0x301   : > { %v9707_v26 = vpop.permute.xlu1 %5126 }
 0x302   : > { %11622 = vst [vmem:[#allocation84_spill] sm:$0xff] %v9707_v26  ;;  %11632 = vst [vmem:[#allocation97_spill] sm:$0xff] %v9769_v60  ;;  %v3808_v46 = vcombine.high %v3800_v19, %v11561_v24  ;;  %v9773_v47 = vrot.slane %v3800_v19, %v11563_v28 }
 0x304   : > { %11633 = vst [vmem:[#allocation83_spill] sm:$0xff] %v9773_v47  ;;  %v9788_v58 = vrot.slane %v3808_v46, %v11563_v28  ;;  %v3838_v19 = vcombine.high %v9773_v47, %v11561_v24  ;;  %v4361_v46 = vcombine.low %v9782_v53, %v9761_v44  ;;  %v3653_v47 = vcombine.high %v9769_v60, %v11561_v24  ;;  %v11642_v60 = vld [vmem:[#allocation86_spill] sm:$0xff] }
 0x305   : > { %v9756_v62 = vpop.permute.xlu0 %5122  ;;  %v9758_v59 = vpop.permute.xlu1 %5134  ;;  %v9818_v53 = vrot.slane %v4706_v25, %v11563_v28  ;;  %v9832_v25 = vrot.slane %v4264_v57, %v11559_v37  ;;  %v6766_v57 = vpack.i.bf16 %v4227_v40, %v4175_v30 }
 0x306   : > { %11628 = vst [vmem:[#allocation66_spill] sm:$0xff] %v9756_v62  ;;  %11629 = vst [vmem:[#allocation67_spill] sm:$0xff] %v9758_v59  ;;  %v6731_v61 = vpack.i.bf16 %v4360_v23, %v3838_v19  ;;  %v6756_v44 = vpack.i.bf16 %v4361_v46, %v9788_v58  ;;  %v5375_v23 = vcombine.low %v9707_v26, %v9758_v59 }
 0x307   : > { %11641 = vst [vmem:[#allocation60_spill] sm:$0xff] %v9818_v53  ;;  %v9835_v46 = vrot.slane %v4674_v10, %v11563_v28  ;;  %v3585_v10 = vcombine.high %v9538_v0, %v9534_v13  ;;  %v3227_v26 = vcombine.low %v3188_v4, %v9813_v43  ;;  %v3770_v13 = vcombine.high %v9548_v7, %v9545_v32  ;;  %v11647_v0 = vld [vmem:[#allocation77_spill] sm:$0xff] }
 0x308   : > { %6732 = vrot.lane.b32.xlu0 %v6731_v61, %s7270_s7  ;;  %6757 = vrot.lane.b32.xlu1 %v6756_v44, %s7271_s24  ;;  %v9844_v61 = vrot.slane %v4063_v45, %v11559_v37  ;;  %v3738_v45 = vcombine.high %v9565_v6, %v9562_v41  ;;  %v9859_v9 = vrot.slane %v5375_v23, %v11559_v37 }
 0x309   : > { %v9800_v38 = vpop.permute.xlu0 %5130  ;;  %v9804_v36 = vpop.permute.xlu1 %5142  ;;  %11643 = vst [vmem:[#allocation30_spill] sm:$0xff] %v9835_v46  ;;  %v4739_v59 = vcombine.high %v9835_v46, %v9818_v53  ;;  %v3553_v30 = vcombine.high %v11647_v0, %v9556_v35  ;;  %v6751_v41 = vpack.i.bf16 %v3273_v52, %v3227_v26  ;;  %v4924_v6 = vcombine.high %v9683_v17, %v9676_v1  ;;  %v11650_v0 = vld [vmem:[#allocation81_spill] sm:$0xff]  ;;  %v11676_v17 = vld [vmem:[#allocation80_spill] sm:$0xff] }
 0x30a   : > { %11638 = vst [vmem:[#allocation29_spill] sm:$0xff] %v9800_v38  ;;  %v5359_v63 = vcombine.low %v9756_v62, %v9800_v38  ;;  %v11645_v62 = vld [vmem:[#allocation73_spill] sm:$0xff]  ;;  %v6741_v38 = vpack.i.bf16 %v3653_v47, %v4412_v18  ;;  %v3605_v7 = vcombine.high %v9620_v48, %v9604_v49  ;;  %v9886_v35 = vrot.slane %v3585_v10, %v11563_v28  ;;  %v11663_v18 = vld [vmem:[#allocation99_spill] sm:$0xff] }
 0x30b   : > { %v6776_v26 = vpack.i.bf16 %v4739_v59, %v4924_v6  ;;  %v3277_v23 = vcombine.high %v3273_v52, %v11561_v24  ;;  %v3790_v49 = vcombine.high %v9628_v3, %v9613_v11  ;;  %v2989_v52 = vcombine.high %v9496_v50, %v9501_v42 }
 0x30c   : > { %v9862_v47 = vrot.slane %v5359_v63, %v11559_v37  ;;  %6742 = vrot.lane.b32.xlu0 %v6741_v38, %s7270_s7  ;;  %6767 = vrot.lane.b32.xlu1 %v6766_v57, %s7270_s7  ;;  %v3623_v63 = vcombine.high %v9729_v8, %v11561_v24  ;;  %v3021_v8 = vcombine.high %v9596_v51, %v9580_v55 }
 0x30d   : > { %v9838_v19 = vpop.permute.xlu0 %5138  ;;  %v9840_v54 = vpop.permute.xlu1 %5150  ;;  %v9904_v48 = vrot.slane %v3770_v13, %v11563_v28  ;;  %v9907_v59 = vrot.slane %v3553_v30, %v11563_v28  ;;  %v3228_v51 = vcombine.high %v3188_v4, %v9813_v43  ;;  %v3074_v11 = vcombine.high %v9599_v12, %v11561_v24  ;;  %v11651_v30 = vld [vmem:[#allocation85_spill] sm:$0xff] }
 0x30e   : > { %v5407_v44 = vcombine.low %v9804_v36, %v9840_v54  ;;  %11646 = vst [vmem:[#allocation134_spill] sm:$0xff] %v9862_v47  ;;  %v5423_v57 = vcombine.low %v9862_v47, %v9859_v9  ;;  %v3637_v3 = vrot.slane %v3623_v63, %v11563_v28  ;;  %v6761_v42 = vpack.i.bf16 %v3605_v7, %v3790_v49 }
 0x30f   : > { %v9921_v13 = vrot.slane %v3738_v45, %v11563_v28  ;;  %v6786_v6 = vpack.i.bf16 %v3277_v23, %v3228_v51  ;;  %v3606_v4 = vcombine.low %v9907_v59, %v9886_v35  ;;  %v3035_v43 = vrot.slane %v3021_v8, %v11563_v28  ;;  %v11656_v23 = vld [vmem:[#allocation93_spill] sm:$0xff]  ;;  %v11657_v8 = vld [vmem:[#allocation88_spill] sm:$0xff] }
 0x310   : > { %v9879_v38 = vrot.slane %v5407_v44, %v11559_v37  ;;  %6752 = vrot.lane.b32.xlu0 %v6751_v41, %s7275_s11  ;;  %6777 = vrot.lane.b32.xlu1 %v6776_v26, %s7270_s7  ;;  %v4079_v41 = vcombine.high %v11651_v30, %v11650_v0  ;;  %v9929_v12 = vrot.slane %v5423_v57, %v11563_v28  ;;  %v11655_v26 = vld [vmem:[#allocation91_spill] sm:$0xff]  ;;  %v11658_v51 = vld [vmem:[#allocation92_spill] sm:$0xff] }
 0x311   : > { %v9870_v40 = vpop.permute.xlu0 %5146  ;;  %v9874_v16 = vpop.permute.xlu1 %5120  ;;  %v4396_v45 = vrot.slane %v4382_v39, %v11563_v28  ;;  %v4111_v49 = vcombine.high %v11656_v23, %v11655_v26  ;;  %v4143_v57 = vcombine.high %v11658_v51, %v11657_v8  ;;  %v3003_v39 = vrot.slane %v2989_v52, %v11563_v28 }
 0x312   : > { %11648 = vst [vmem:[#allocation127_spill] sm:$0xff] %v9874_v16  ;;  %v5391_v32 = vcombine.low %v9838_v19, %v9870_v40  ;;  %11652 = vst [vmem:[#allocation61_spill] sm:$0xff] %v9929_v12  ;;  %v3088_v0 = vrot.slane %v3074_v11, %v11563_v28  ;;  %v4343_v30 = vcombine.low %v9832_v25, %v9742_v22 }
 0x313   : > { %v11661_v8 = vcombine.high %v11645_v62, %v11644_v27  ;;  %v9971_v11 = vrot.slane %v4079_v41, %v11559_v37  ;;  %v4413_v27 = vcombine.high %v4396_v45, %v11561_v24  ;;  %v9983_v62 = vrot.slane %v4143_v57, %v11563_v28 }
 0x314   : > { %v9896_v44 = vrot.slane %v5391_v32, %v11559_v37  ;;  %6762 = vrot.lane.b32.xlu0 %v6761_v42, %s7274_s1  ;;  %v11654_v32 = vcombine.high %v11642_v60, %v11535_v14  ;;  %6787 = vrot.lane.b32.xlu1 %v6786_v6, %s7276_s20  ;;  %v3791_v42 = vcombine.low %v9921_v13, %v9904_v48 }
 0x315   : > { %v9910_v55 = vpop.permute.xlu0 %4590  ;;  %v9913_v10 = vpop.permute.xlu1 %5128  ;;  %v6771_v60 = vpack.i.bf16 %v3637_v3, %v4396_v45  ;;  %v3654_v6 = vcombine.high %v3637_v3, %v11561_v24  ;;  %v9968_v51 = vrot.slane %v11661_v8, %v11559_v37  ;;  %v3042_v14 = vcombine.low %v3003_v39, %v3035_v43 }
 0x316   : > { %11649 = vst [vmem:[#allocation129_spill] sm:$0xff] %v9913_v10  ;;  %v5455_v50 = vcombine.low %v9896_v44, %v9879_v38  ;;  %v9940_v7 = vrot.slane %v11654_v32, %v11559_v37  ;;  %v6796_v26 = vpack.i.bf16 %v3606_v4, %v3791_v42  ;;  %v4367_v3 = vcombine.high %v11557_v33, %v11561_v24  ;;  %v11667_v32 = vld [vmem:[#allocation79_spill] sm:$0xff] }
 0x317   : > { %v4197_v4 = vcombine.high %v9725_v15, %v11561_v24  ;;  %v4707_v41 = vcombine.high %v9737_v2, %v9734_v34  ;;  %v6781_v8 = vpack.i.bf16 %v3088_v0, %v3042_v14  ;;  %v9990_v33 = vrot.slane %v4111_v49, %v11563_v28  ;;  %v11664_v2 = vld [vmem:[#allocation98_spill] sm:$0xff] }
 0x318   : > { %v9932_v63 = vrot.slane %v5455_v50, %v11563_v28  ;;  %6772 = vrot.lane.b32.xlu0 %v6771_v60, %s7271_s24  ;;  %6797 = vrot.lane.b32.xlu1 %v6796_v26, %s7275_s11  ;;  %v3839_v60 = vcombine.high %v9788_v58, %v11561_v24  ;;  %v3608_v15 = vcombine.high %v9695_v31, %v11561_v24  ;;  %v11665_v49 = vld [vmem:[#allocation46_spill] sm:$0xff] }
 0x319   : > { %v9947_v50 = vpop.permute.xlu0 %5124  ;;  %v9960_v23 = vpop.permute.xlu1 %5136  ;;  %v3793_v26 = vcombine.high %v9705_v56, %v11561_v24  ;;  %v6806_v45 = vpack.i.bf16 %v3654_v6, %v4413_v27  ;;  %v3092_v57 = vcombine.high %v3088_v0, %v11561_v24  ;;  %v4892_v52 = vcombine.high %v11663_v18, %v9653_v20  ;;  %v11666_v14 = vld [vmem:[#allocation70_spill] sm:$0xff]  ;;  %v11669_v27 = vld [vmem:[#allocation100_spill] sm:$0xff] }
 0x31a   : > { %11653 = vst [vmem:[#allocation36_spill] sm:$0xff] %v9932_v63  ;;  %11659 = vst [vmem:[#allocation59_spill] sm:$0xff] %v9947_v50  ;;  %v4675_v34 = vcombine.high %v11664_v2, %v9751_v21  ;;  %v4362_v31 = vcombine.high %v11666_v14, %v11665_v49  ;;  %v4182_v56 = vcombine.high %v11667_v32, %v11561_v24  ;;  %v11678_v63 = vld [vmem:[#allocation95_spill] sm:$0xff] }
 0x31b   : > { %11660 = vst [vmem:[#allocation35_spill] sm:$0xff] %v9960_v23  ;;  %v3043_v20 = vcombine.high %v3003_v39, %v3035_v43  ;;  %v4176_v21 = vcombine.low %v9990_v33, %v9983_v62  ;;  %v4211_v18 = vrot.slane %v4197_v4, %v11563_v28  ;;  %v10019_v49 = vrot.slane %v4707_v41, %v11563_v28 }
 0x31c   : > { %6782 = vrot.lane.b32.xlu0 %v6781_v8, %s7275_s11  ;;  %6807 = vrot.lane.b32.xlu1 %v6806_v45, %s7272_s26  ;;  %v11670_v8 = vld [vmem:[#allocation101_spill] sm:$0xff]  ;;  %v5174_v32 = vcombine.low %v9874_v16, %v9913_v10  ;;  %v6791_v45 = vpack.i.bf16 %v4362_v31, %v3839_v60  ;;  %v10024_v14 = vrot.slane %v3608_v15, %v11559_v37  ;;  %v11679_v16 = vld [vmem:[#allocation96_spill] sm:$0xff]  ;;  %v11680_v10 = vld [vmem:[#allocation82_spill] sm:$0xff] }
 0x31d   : > { %v9979_v42 = vpop.permute.xlu0 %5132  ;;  %v10009_v0 = vpop.permute.xlu1 %5144  ;;  %v4860_v2 = vcombine.high %v11670_v8, %v11669_v27  ;;  %v3807_v43 = vrot.slane %v3793_v26, %v11559_v37  ;;  %v6816_v39 = vpack.i.bf16 %v3092_v57, %v3043_v20  ;;  %v3607_v1 = vcombine.high %v9907_v59, %v9886_v35 }
 0x31e   : > { %11662 = vst [vmem:[#allocation58_spill] sm:$0xff] %v9979_v42  ;;  %v5190_v58 = vcombine.low %v9947_v50, %v9979_v42  ;;  %11668 = vst [vmem:[#allocation116_spill] sm:$0xff] %v10009_v0  ;;  %v10030_v4 = vrot.slane %v4892_v52, %v11563_v28  ;;  %v10033_v27 = vrot.slane %v4675_v34, %v11563_v28  ;;  %v11683_v50 = vld [vmem:[#allocation68_spill] sm:$0xff] }
 0x31f   : > { %v5206_v60 = vcombine.low %v9960_v23, %v10009_v0  ;;  %v10042_v15 = vrot.slane %v4367_v3, %v11559_v37  ;;  %v3792_v59 = vcombine.high %v9921_v13, %v9904_v48  ;;  %v6801_v52 = vpack.i.bf16 %v4211_v18, %v4176_v21  ;;  %v11681_v23 = vld [vmem:[#allocation94_spill] sm:$0xff] }
 0x320   : > { %v10036_v41 = vrot.slane %v5190_v58, %v11559_v37  ;;  %6792 = vrot.lane.b32.xlu0 %v6791_v45, %s7272_s26  ;;  %6817 = vrot.lane.b32.xlu1 %v6816_v39, %s7276_s20  ;;  %v4351_v26 = vrot.slane %v4343_v30, %v11563_v28  ;;  %v10051_v57 = vrot.slane %v4860_v2, %v11563_v28 }
 0x321   : > { %v10011_v6 = vpop.permute.xlu0 %5140  ;;  %v10054_v34 = vrot.slane %v5174_v32, %v11559_v37  ;;  %v4740_v58 = vcombine.low %v10033_v27, %v10019_v49  ;;  %v3645_v31 = vrot.slane %v10024_v14, %v11563_v28  ;;  %v3830_v48 = vrot.slane %v3807_v43, %v11563_v28 }
 0x322   : > { %11671 = vst [vmem:[#allocation112_spill] sm:$0xff] %v10036_v41  ;;  %v6826_v13 = vpack.i.bf16 %v3607_v1, %v3792_v59  ;;  %v11673_v30 = vcombine.low %v9721_v29, %v9710_v5  ;;  %v10070_v8 = vrot.slane %v5206_v60, %v11559_v37  ;;  %v4925_v32 = vcombine.low %v10051_v57, %v10030_v4  ;;  %v11674_v59 = vld [vmem:[#allocation72_spill] sm:$0xff] }
 0x323   : > { %11672 = vst [vmem:[#allocation114_spill] sm:$0xff] %v10054_v34  ;;  %v5238_v21 = vcombine.low %v10054_v34, %v10036_v41  ;;  %v4158_v1 = vcombine.low %v9971_v11, %v9968_v51  ;;  %v10081_v45 = vrot.slane %v4182_v56, %v11559_v37  ;;  %v4404_v39 = vrot.slane %v10042_v15, %v11563_v28  ;;  %v11682_v41 = vld [vmem:[#allocation75_spill] sm:$0xff] }
 0x324   : > { %v4319_v20 = vrot.slane %v11673_v30, %v11563_v28  ;;  %6802 = vrot.lane.b32.xlu0 %v6801_v52, %s7271_s24  ;;  %6827 = vrot.lane.b32.xlu1 %v6826_v13, %s7276_s20  ;;  %v11677_v52 = vld [vmem:[#allocation71_spill] sm:$0xff]  ;;  %v6811_v12 = vpack.i.bf16 %v4740_v58, %v4925_v32  ;;  %v4844_v56 = vcombine.high %v11679_v16, %v11678_v63  ;;  %v11686_v16 = vld [vmem:[#allocation26_spill] sm:$0xff] }
 0x325   : > { %v10045_v35 = vpop.permute.xlu0 %5148  ;;  %v4643_v53 = vcombine.high %v11677_v52, %v11676_v17  ;;  %v4828_v13 = vcombine.high %v11681_v23, %v11680_v10  ;;  %v3840_v0 = vcombine.high %v3830_v48, %v11561_v24  ;;  %v6836_v34 = vpack.i.bf16 %v3645_v31, %v4404_v39  ;;  %v11687_v63 = vld [vmem:[#allocation55_spill] sm:$0xff]  ;;  %v11688_v23 = vld [vmem:[#allocation34_spill] sm:$0xff] }
 0x326   : > { %v5222_v3 = vcombine.low %v10011_v6, %v10045_v35  ;;  %v4363_v60 = vcombine.low %v4319_v20, %v4351_v26  ;;  %v4627_v42 = vcombine.high %v11683_v50, %v11682_v41  ;;  %v10102_v17 = vrot.slane %v5238_v21, %v11563_v28  ;;  %v11689_v32 = vld [vmem:[#allocation54_spill] sm:$0xff] }
 0x327   : > { %v4812_v10 = vcombine.high %v11687_v63, %v11686_v16  ;;  %v4796_v52 = vcombine.high %v11689_v32, %v11688_v23  ;;  %v4364_v50 = vcombine.high %v4319_v20, %v4351_v26  ;;  %v4228_v41 = vcombine.high %v4211_v18, %v11561_v24 }
 0x328   : > { %v10073_v2 = vrot.slane %v5222_v3, %v11559_v37  ;;  %v11675_v3 = vld [vmem:[#allocation52_spill] sm:$0xff]  ;;  %6812 = vrot.lane.b32.xlu0 %v6811_v12, %s7271_s24  ;;  %6837 = vrot.lane.b32.xlu1 %v6836_v34, %s7273_s9  ;;  %v10118_v21 = vrot.slane %v4643_v53, %v11559_v37  ;;  %v6821_v12 = vpack.i.bf16 %v4363_v60, %v3830_v48 }
 0x329   : > { %v4659_v30 = vcombine.high %v11675_v3, %v11674_v59  ;;  %v11684_v59 = vld [vmem:[#allocation39_spill] sm:$0xff]  ;;  %v11685_v3 = vld [vmem:[#allocation102_spill] sm:$0xff]  ;;  %v3823_v16 = vcombine.high %v3807_v43, %v11561_v24  ;;  %v6846_v63 = vpack.i.bf16 %v4364_v50, %v3840_v0  ;;  %v4177_v26 = vcombine.high %v9990_v33, %v9983_v62  ;;  %v10193_v50 = vpop.permute.xlu1 %4588 }
 0x32a   : > { %v5270_v46 = vcombine.low %v10070_v8, %v10073_v2  ;;  %v4611_v47 = vcombine.high %v11685_v3, %v11684_v59  ;;  %v3655_v3 = vcombine.high %v3645_v31, %v11561_v24  ;;  %v10127_v18 = vrot.slane %v4844_v56, %v11559_v37 }
 0x32b   : > { %v10115_v59 = vrot.slane %v4659_v30, %v11559_v37  ;;  %v10130_v34 = vrot.slane %v4828_v13, %v11559_v37  ;;  %v10133_v53 = vrot.slane %v4627_v42, %v11559_v37  ;;  %v6831_v0 = vpack.i.bf16 %v4228_v41, %v4177_v26 }
 0x32c   : > { %v10105_v58 = vrot.slane %v5270_v46, %v11563_v28  ;;  %v10136_v20 = vrot.slane %v4611_v47, %v11559_v37  ;;  %6822 = vrot.lane.b32.xlu0 %v6821_v12, %s7273_s9  ;;  %6847 = vrot.lane.b32.xlu1 %v6846_v63, %s7274_s1  ;;  %v4414_v43 = vcombine.high %v4404_v39, %v11561_v24 }
 0x32d   : > { %v11690_v62 = vcombine.high %v9832_v25, %v9742_v22  ;;  %v4166_v31 = vrot.slane %v4158_v1, %v11563_v28  ;;  %v10149_v42 = vrot.slane %v4812_v10, %v11559_v37  ;;  %v10152_v47 = vrot.slane %v4796_v52, %v11559_v37 }
 0x32e   : > { %v5302_v46 = vcombine.low %v10102_v17, %v10105_v58  ;;  %v4722_v48 = vcombine.low %v10118_v21, %v10115_v59  ;;  %v4741_v39 = vcombine.high %v10033_v27, %v10019_v49  ;;  %v3638_v60 = vcombine.high %v10024_v14, %v11561_v24 }
 0x32f   : > { %v10145_v33 = vrot.slane %v11690_v62, %v11563_v28  ;;  %v10161_v22 = vrot.slane %v3823_v16, %v11563_v28  ;;  %v6856_v25 = vpack.i.bf16 %v3655_v3, %v4414_v43  ;;  %v11691_v1 = vcombine.high %v9721_v29, %v9710_v5 }
 0x330   : > { %v4907_v56 = vcombine.low %v10130_v34, %v10127_v18  ;;  %v4690_v13 = vcombine.low %v10136_v20, %v10133_v53  ;;  %6832 = vrot.lane.b32.xlu0 %v6831_v0, %s7272_s26  ;;  %v4926_v49 = vcombine.high %v10051_v57, %v10030_v4  ;;  %v11692_v14 = vcombine.low %v9940_v7, %v9844_v61 }
 0x331   : > { %v10167_v30 = vrot.slane %v11691_v1, %v11563_v28  ;;  %6857 = vrot.lane.b32.xlu1 %v6856_v25, %s7274_s1  ;;  %v4219_v5 = vrot.slane %v10081_v45, %v11563_v28  ;;  %v4397_v10 = vcombine.high %v10042_v15, %v11561_v24  ;;  %v4875_v23 = vcombine.low %v10152_v47, %v10149_v42 }
 0x332   : > { %v4134_v27 = vrot.slane %v11692_v14, %v11563_v28  ;;  %v4730_v4 = vrot.slane %v4722_v48, %v11563_v28  ;;  %v6841_v57 = vpack.i.bf16 %v4741_v39, %v4926_v49  ;;  %v10191_v52 = vrot.slane %v3638_v60, %v11563_v28 }
 0x333   : > { %v4365_v29 = vcombine.low %v10167_v30, %v10145_v33  ;;  %v4915_v12 = vrot.slane %v4907_v56, %v11563_v28  ;;  %v4698_v3 = vrot.slane %v4690_v13, %v11563_v28  ;;  %v4159_v15 = vcombine.high %v9971_v11, %v9968_v51 }
 0x334   : > { %v4178_v32 = vcombine.low %v4134_v27, %v4166_v31  ;;  %6842 = vrot.lane.b32.xlu0 %v6841_v57, %s7272_s26  ;;  %v4411_v16 = vrot.slane %v4397_v10, %v11563_v28  ;;  %v4883_v63 = vrot.slane %v4875_v23, %v11563_v28  ;;  %v4753_v26 = vrot.slane %v10193_v50, %v11559_v37 }
 0x335   : > { %v6866_v41 = vpack.i.bf16 %v4365_v29, %v10161_v22  ;;  %v4742_v43 = vcombine.low %v4698_v3, %v4730_v4  ;;  %v4127_v62 = vcombine.high %v9940_v7, %v9844_v61  ;;  %v4743_v39 = vcombine.high %v4698_v3, %v4730_v4 }
 0x336   : > { %v6851_v0 = vpack.i.bf16 %v4219_v5, %v4178_v32  ;;  %v6876_v48 = vpack.i.bf16 %v10191_v52, %v4411_v16  ;;  %v4212_v51 = vcombine.high %v10081_v45, %v11561_v24  ;;  %v4938_v11 = vrot.slane %v9910_v55, %v11559_v37 }
 0x337   : > { %6867 = vrot.lane.b32.xlu1 %v6866_v41, %s7275_s11  ;;  %v4927_v60 = vcombine.low %v4883_v63, %v4915_v12  ;;  %v4928_v25 = vcombine.high %v4883_v63, %v4915_v12  ;;  %v4173_v1 = vrot.slane %v4159_v15, %v11563_v28  ;;  %v10217_v56 = vrot.slane %v4753_v26, %v11563_v28 }
 0x338   : > { %6852 = vrot.lane.b32.xlu0 %v6851_v0, %s7273_s9  ;;  %v4229_v7 = vcombine.high %v4219_v5, %v11561_v24  ;;  %v4761_v13 = vcombine.high %v4753_v26, %v11561_v24  ;;  %v4141_v49 = vrot.slane %v4127_v62, %v11563_v28  ;;  %v4226_v14 = vrot.slane %v4212_v51, %v11563_v28 }
 0x339   : > { %v6861_v61 = vpack.i.bf16 %v4742_v43, %v4927_v60  ;;  %v6886_v45 = vpack.i.bf16 %v4743_v39, %v4928_v25  ;;  %v10224_v29 = vrot.slane %v4938_v11, %v11563_v28  ;;  %v4179_v10 = vcombine.high %v4134_v27, %v4166_v31  ;;  %v11696_v39 = vld [vmem:[#allocation66_spill] sm:$0xff] }
 0x33a   : > { %v4946_v23 = vcombine.high %v4938_v11, %v11561_v24  ;;  %v4180_v4 = vcombine.low %v4141_v49, %v4173_v1  ;;  %v4908_v5 = vcombine.high %v10130_v34, %v10127_v18  ;;  %v4723_v57 = vcombine.high %v10118_v21, %v10115_v59 }
 0x33b   : > { %6877 = vrot.lane.b32.xlu1 %v6876_v48, %s7275_s11  ;;  %v4791_v32 = vcombine.high %v10217_v56, %v11561_v24  ;;  %v6871_v41 = vpack.i.bf16 %v4229_v7, %v4179_v10  ;;  %v4775_v12 = vrot.slane %v4761_v13, %v11563_v28  ;;  %v4876_v31 = vcombine.high %v10152_v47, %v10149_v42  ;;  %v11694_v47 = vld [vmem:[#allocation84_spill] sm:$0xff]  ;;  %v11695_v48 = vld [vmem:[#allocation29_spill] sm:$0xff]  ;;  %v11698_v10 = vld [vmem:[#allocation58_spill] sm:$0xff] }
 0x33c   : > { %6862 = vrot.lane.b32.xlu0 %v6861_v61, %s7273_s9  ;;  %v6896_v3 = vpack.i.bf16 %v4226_v14, %v4180_v4  ;;  %v4691_v27 = vcombine.high %v10136_v20, %v10133_v53  ;;  %v4976_v15 = vcombine.high %v10224_v29, %v11561_v24  ;;  %v10244_v59 = vrot.slane %v4946_v23, %v11563_v28  ;;  %v11693_v20 = vld [vmem:[#allocation67_spill] sm:$0xff]  ;;  %v11700_v23 = vld [vmem:[#allocation112_spill] sm:$0xff]  ;;  %v11701_v4 = vld [vmem:[#allocation114_spill] sm:$0xff] }
 0x33d   : > { %v4230_v21 = vcombine.high %v4226_v14, %v11561_v24  ;;  %v4922_v18 = vrot.slane %v4908_v5, %v11563_v28  ;;  %v4737_v34 = vrot.slane %v4723_v57, %v11563_v28  ;;  %v3841_v53 = vcombine.high %v10161_v22, %v11561_v24  ;;  %v11702_v57 = vld [vmem:[#allocation116_spill] sm:$0xff] }
 0x33e   : > { %v6881_v42 = vpack.i.bf16 %v4791_v32, %v4976_v15  ;;  %v5376_v63 = vcombine.high %v11694_v47, %v11693_v20  ;;  %v6906_v26 = vpack.i.bf16 %v4775_v12, %v10244_v59  ;;  %v4181_v0 = vcombine.high %v4141_v49, %v4173_v1  ;;  %v11703_v32 = vld [vmem:[#allocation35_spill] sm:$0xff]  ;;  %v11706_v20 = vld [vmem:[#allocation36_spill] sm:$0xff]  ;;  %v11707_v47 = vld [vmem:[#allocation61_spill] sm:$0xff] }
 0x33f   : > { %6887 = vrot.lane.b32.xlu1 %v6886_v45, %s7274_s1  ;;  %v4890_v43 = vrot.slane %v4876_v31, %v11563_v28  ;;  %v4705_v62 = vrot.slane %v4691_v27, %v11563_v28  ;;  %v5360_v51 = vcombine.high %v11696_v39, %v11695_v48  ;;  %v4366_v11 = vcombine.high %v10167_v30, %v10145_v33  ;;  %v10316_v39 = vpop.permute.xlu1 %5152 }
 0x340   : > { %6872 = vrot.lane.b32.xlu0 %v6871_v41, %s7274_s1  ;;  %v6916_v22 = vpack.i.bf16 %v4230_v21, %v4181_v0  ;;  %v4415_v60 = vcombine.high %v4411_v16, %v11561_v24  ;;  %v3656_v1 = vcombine.high %v10191_v52, %v11561_v24  ;;  %v10267_v13 = vrot.slane %v5376_v63, %v11559_v37  ;;  %v11705_v41 = vld [vmem:[#allocation127_spill] sm:$0xff] }
 0x341   : > { %v6891_v25 = vpack.i.bf16 %v4366_v11, %v3841_v53  ;;  %v4745_v61 = vcombine.high %v4705_v62, %v4737_v34  ;;  %v4930_v7 = vcombine.high %v4890_v43, %v4922_v18  ;;  %v5223_v45 = vcombine.high %v10011_v6, %v10045_v35  ;;  %v11697_v6 = vld [vmem:[#allocation134_spill] sm:$0xff] }
 0x342   : > { %v5271_v33 = vcombine.high %v10070_v8, %v10073_v2  ;;  %v4929_v30 = vcombine.low %v4890_v43, %v4922_v18  ;;  %v10274_v49 = vrot.slane %v5360_v51, %v11559_v37  ;;  %v5408_v16 = vcombine.high %v9804_v36, %v9840_v54  ;;  %v11699_v8 = vld [vmem:[#allocation59_spill] sm:$0xff] }
 0x343   : > { %6897 = vrot.lane.b32.xlu1 %v6896_v3, %s7275_s11  ;;  %v5392_v52 = vcombine.high %v9838_v19, %v9870_v40  ;;  %v5456_v14 = vcombine.high %v9896_v44, %v9879_v38  ;;  %v5424_v35 = vcombine.high %v11697_v6, %v9859_v9  ;;  %v5191_v2 = vcombine.high %v11699_v8, %v11698_v10  ;;  %v11704_v44 = vld [vmem:[#allocation129_spill] sm:$0xff]  ;;  %v10331_v8 = vpop.permute.xlu1 %6687 }
 0x344   : > { %6882 = vrot.lane.b32.xlu0 %v6881_v42, %s7270_s7  ;;  %v5239_v5 = vcombine.high %v11701_v4, %v11700_v23  ;;  %v5207_v36 = vcombine.high %v11703_v32, %v11702_v57  ;;  %v4746_v54 = vcombine.high %v10193_v50, %v11561_v24  ;;  %v6901_v19 = vpack.i.bf16 %v3656_v1, %v4415_v60 }
 0x345   : > { %v6926_v40 = vpack.i.bf16 %v4745_v61, %v4930_v7  ;;  %v4744_v38 = vcombine.low %v4705_v62, %v4737_v34  ;;  %v5175_v9 = vcombine.high %v11705_v41, %v11704_v44  ;;  %v5237_v3 = vrot.slane %v5223_v45, %v11559_v37 }
 0x346   : > { %v5285_v31 = vrot.slane %v5271_v33, %v11563_v28  ;;  %v5303_v27 = vcombine.high %v10102_v17, %v10105_v58  ;;  %v5422_v15 = vrot.slane %v5408_v16, %v11559_v37  ;;  %v5406_v21 = vrot.slane %v5392_v52, %v11559_v37 }
 0x347   : > { %6907 = vrot.lane.b32.xlu1 %v6906_v26, %s7271_s24  ;;  %v5470_v18 = vrot.slane %v5456_v14, %v11563_v28  ;;  %v4931_v50 = vcombine.high %v9910_v55, %v11561_v24  ;;  %v5205_v34 = vrot.slane %v5191_v2, %v11559_v37  ;;  %v5253_v42 = vrot.slane %v5239_v5, %v11563_v28 }
 0x348   : > { %6892 = vrot.lane.b32.xlu0 %v6891_v25, %s7276_s20  ;;  %v5221_v53 = vrot.slane %v5207_v36, %v11559_v37  ;;  %v5488_v63 = vcombine.high %v11707_v47, %v11706_v20  ;;  %v5438_v26 = vrot.slane %v5424_v35, %v11563_v28  ;;  %v4760_v0 = vrot.slane %v4746_v54, %v11559_v37 }
 0x349   : > { %v4792_v43 = vcombine.high %v4775_v12, %v11561_v24  ;;  %v6911_v55 = vpack.i.bf16 %v4744_v38, %v4929_v30  ;;  %v5189_v62 = vrot.slane %v5175_v9, %v11559_v37  ;;  %v5304_v11 = vcombine.low %v5253_v42, %v5285_v31  ;;  %v5155_v9 = vpop.permute.xlu0 %5154 }
 0x34a   : > { %v5286_v48 = vcombine.low %v5221_v53, %v5237_v3  ;;  %v6936_v51 = vpack.i.bf16 %v5303_v27, %v5488_v63  ;;  %v4977_v60 = vcombine.high %v10244_v59, %v11561_v24  ;;  %v5471_v25 = vcombine.low %v5406_v21, %v5422_v15  ;;  %v10348_v27 = vpop.permute.xlu1 %6697 }
 0x34b   : > { %6917 = vrot.lane.b32.xlu1 %v6916_v22, %s7276_s20  ;;  %v4945_v22 = vrot.slane %v4931_v50, %v11559_v37  ;;  %v5254_v1 = vcombine.low %v5189_v62, %v5205_v34  ;;  %v5489_v12 = vcombine.low %v5438_v26, %v5470_v18  ;;  %v5439_v61 = vcombine.low %v10274_v49, %v10267_v13 }
 0x34c   : > { %6902 = vrot.lane.b32.xlu0 %v6901_v19, %s7276_s20  ;;  %v4783_v7 = vrot.slane %v4760_v0, %v11563_v28  ;;  %v6921_v45 = vpack.i.bf16 %v4792_v43, %v4977_v60  ;;  %v5287_v33 = vcombine.high %v5221_v53, %v5237_v3  ;;  %v5294_v30 = vrot.slane %v5286_v48, %v11563_v28 }
 0x34d   : > { %v6946_v16 = vpack.i.bf16 %v5304_v11, %v5489_v12  ;;  %v5305_v52 = vcombine.high %v5253_v42, %v5285_v31  ;;  %v5472_v14 = vcombine.high %v5406_v21, %v5422_v15  ;;  %v4968_v59 = vrot.slane %v4945_v22, %v11563_v28 }
 0x34e   : > { %v5479_v6 = vrot.slane %v5471_v25, %v11563_v28  ;;  %v5255_v35 = vcombine.high %v5189_v62, %v5205_v34  ;;  %v5262_v10 = vrot.slane %v5254_v1, %v11563_v28  ;;  %v5490_v2 = vcombine.high %v5438_v26, %v5470_v18 }
 0x34f   : > { %6927 = vrot.lane.b32.xlu1 %v6926_v40, %s7276_s20  ;;  %v5440_v23 = vcombine.high %v10274_v49, %v10267_v13  ;;  %v4776_v4 = vcombine.high %v4760_v0, %v11561_v24  ;;  %v4793_v5 = vcombine.high %v4783_v7, %v11561_v24  ;;  %v6931_v57 = vpack.i.bf16 %v4783_v7, %v4968_v59  ;;  %v10355_v0 = vpop.permute.xlu0 %6682 }
 0x350   : > { %6912 = vrot.lane.b32.xlu0 %v6911_v55, %s7275_s11  ;;  %v5447_v32 = vrot.slane %v5439_v61, %v11563_v28  ;;  %v5301_v36 = vrot.slane %v5287_v33, %v11563_v28  ;;  %v6956_v54 = vpack.i.bf16 %v5305_v52, %v5490_v2  ;;  %v5306_v19 = vcombine.low %v5262_v10, %v5294_v30  ;;  %v10359_v55 = vpop.permute.xlu1 %6707 }
 0x351   : > { %v4961_v40 = vcombine.high %v4945_v22, %v11561_v24  ;;  %v4978_v38 = vcombine.high %v4968_v59, %v11561_v24  ;;  %v5486_v44 = vrot.slane %v5472_v14, %v11563_v28  ;;  %v5269_v13 = vrot.slane %v5255_v35, %v11563_v28  ;;  %v11708_v35 = vld [vmem:[#allocation104_spill] sm:$0xff] }
 0x352   : > { %v5491_v49 = vcombine.low %v5447_v32, %v5479_v6  ;;  %v4790_v41 = vrot.slane %v4776_v4, %v11563_v28  ;;  %v5454_v31 = vrot.slane %v5440_v23, %v11563_v28  ;;  %v5502_v53 = vrot.slane %v5155_v9, %v11559_v37 }
 0x353   : > { %6937 = vrot.lane.b32.xlu1 %v6936_v51, %s7270_s7  ;;  %v6941_v3 = vpack.i.bf16 %v4793_v5, %v4978_v38  ;;  %v5308_v21 = vcombine.low %v5269_v13, %v5301_v36  ;;  %v4975_v18 = vrot.slane %v4961_v40, %v11563_v28  ;;  %v5309_v26 = vcombine.high %v5269_v13, %v5301_v36  ;;  %v11710_v36 = vld [vmem:[#allocation109_spill] sm:$0xff]  ;;  %v11711_v40 = vld [vmem:[#allocation43_spill] sm:$0xff] }
 0x354   : > { %6922 = vrot.lane.b32.xlu0 %v6921_v45, %s7272_s26  ;;  %v6966_v15 = vpack.i.bf16 %v5306_v19, %v5491_v49  ;;  %v5493_v50 = vcombine.low %v5454_v31, %v5486_v44  ;;  %v4794_v42 = vcombine.high %v4790_v41, %v11561_v24  ;;  %v5494_v62 = vcombine.high %v5454_v31, %v5486_v44  ;;  %v11712_v44 = vld [vmem:[#allocation111_spill] sm:$0xff] }
 0x355   : > { %v6951_v34 = vpack.i.bf16 %v4790_v41, %v4975_v18  ;;  %v4979_v43 = vcombine.high %v4975_v18, %v11561_v24  ;;  %v5307_v51 = vcombine.high %v5262_v10, %v5294_v30  ;;  %v5510_v11 = vcombine.high %v5502_v53, %v11561_v24 }
 0x356   : > { %v6976_v63 = vpack.i.bf16 %v5308_v21, %v5493_v50  ;;  %v6981_v22 = vpack.i.bf16 %v5309_v26, %v5494_v62  ;;  %v5492_v25 = vcombine.high %v5447_v32, %v5479_v6  ;;  %v5317_v12 = vrot.slane %v10316_v39, %v11559_v37  ;;  %v11714_v21 = vld [vmem:[#allocation105_spill] sm:$0xff]  ;;  %v11717_v26 = vld [vmem:[#allocation50_spill] sm:$0xff] }
 0x357   : > { %6947 = vrot.lane.b32.xlu1 %v6946_v16, %s7271_s24  ;;  %v6961_v48 = vpack.i.bf16 %v4794_v42, %v4979_v43  ;;  %v10372_v61 = vrot.slane %v5502_v53, %v11563_v28  ;;  %v5495_v45 = vcombine.high %v5155_v9, %v11561_v24  ;;  %v5524_v33 = vrot.slane %v5510_v11, %v11563_v28  ;;  %v11713_v9 = vld [vmem:[#allocation106_spill] sm:$0xff]  ;;  %v11716_v53 = vld [vmem:[#allocation56_spill] sm:$0xff] }
 0x358   : > { %6932 = vrot.lane.b32.xlu0 %v6931_v57, %s7273_s9  ;;  %v6971_v7 = vpack.i.bf16 %v5307_v51, %v5492_v25  ;;  %v10379_v30 = vrot.slane %v5317_v12, %v11563_v28  ;;  %v6465_v10 = vunpack.i.h.bf16 %v11708_v35  ;;  %v5325_v2 = vcombine.high %v5317_v12, %v11561_v24  ;;  %v11709_v57 = vld [vmem:[#allocation103_spill] sm:$0xff]  ;;  %v11718_v12 = vld [vmem:[#allocation108_spill] sm:$0xff] }
 0x359   : > { %v10363_v60 = vpop.permute.xlu0 %6692  ;;  %v10366_v1 = vpop.permute.xlu1 %6717  ;;  %v5540_v16 = vcombine.high %v10372_v61, %v11561_v24  ;;  %v5509_v14 = vrot.slane %v5495_v45, %v11559_v37  ;;  %v5541_v6 = vcombine.high %v5524_v33, %v11561_v24  ;;  %v6470_v32 = vunpack.i.h.bf16 %v11709_v57  ;;  %v11719_v45 = vld [vmem:[#allocation57_spill] sm:$0xff] }
 0x35a   : > { %v5355_v23 = vcombine.high %v10379_v30, %v11561_v24  ;;  %v2827_v38 = vsel %vm447_vm2, %v11711_v40, %v6465_v10  ;;  %v6505_v13 = vunpack.i.h.bf16 %v11712_v44  ;;  %v5310_v49 = vcombine.high %v10316_v39, %v11561_v24 }
 0x35b   : > { %6957 = vrot.lane.b32.xlu1 %v6956_v54, %s7272_s26  ;;  %v5532_v4 = vrot.slane %v5509_v14, %v11563_v28  ;;  %v6500_v54 = vunpack.i.h.bf16 %v11710_v36  ;;  %v5339_v41 = vrot.slane %v5325_v2, %v11563_v28  ;;  %v5525_v31 = vcombine.high %v5509_v14, %v11561_v24 }
 0x35c   : > { %6942 = vrot.lane.b32.xlu0 %v6941_v3, %s7274_s1  ;;  %v6475_v3 = vunpack.i.h.bf16 %v11713_v9  ;;  %v6480_v18 = vunpack.i.h.bf16 %v11714_v21  ;;  %v2829_v50 = vsel %vm1093_vm6, %v2827_v38, %v6470_v32  ;;  %v6515_v43 = vunpack.i.h.bf16 %v11717_v26  ;;  %v11722_v38 = vld [vmem:[#allocation110_spill] sm:$0xff] }
 0x35d   : > { %v10383_v52 = vpop.permute.xlu0 %6702  ;;  %v10386_v59 = vpop.permute.xlu1 %6727  ;;  %v5324_v62 = vrot.slane %v5310_v49, %v11559_v37  ;;  %v5356_v51 = vcombine.high %v5339_v41, %v11561_v24  ;;  %v5539_v25 = vrot.slane %v5525_v31, %v11563_v28  ;;  %v11720_v37 = vld [vmem:[#allocation107_spill] sm:$0xff]  ;;  %v6495_v44 = vunpack.i.h.bf16 %v11722_v38  ;;  %v11724_v31 = vld [vmem:[#allocation44_spill] sm:$0xff] }
 0x35e   : > { %v2831_v11 = vsel %vm1096_vm7, %v2829_v50, %v6475_v3  ;;  %v6490_v14 = vunpack.i.h.bf16 %v11720_v37  ;;  %v11727_v50 = vld [vmem:[#allocation83_spill] sm:$0xff]  ;;  %v6700_v38 = vunpack.i.h.bf16 %v10348_v27 }
 0x35f   : > { %6967 = vrot.lane.b32.xlu1 %v6966_v15, %s7273_s9  ;;  %v5542_v15 = vcombine.high %v5532_v4, %v11561_v24  ;;  %v5347_v10 = vrot.slane %v5324_v62, %v11563_v28 }
 0x360   : > { %6952 = vrot.lane.b32.xlu0 %v6951_v34, %s7275_s11  ;;  %v11715_v34 = vld [vmem:[#allocation51_spill] sm:$0xff] }
 0x361   : > { %v10396_v5 = vpop.permute.xlu0 %6712  ;;  %v10401_v19 = vpop.permute.xlu1 %6737  ;;  %v2841_v42 = vsel %vm447_vm2, %v11715_v34, %v6500_v54  ;;  %v5543_v54 = vcombine.high %v5539_v25, %v11561_v24 }
 0x362   : > { %v2843_v39 = vsel %vm1093_vm6, %v2841_v42, %v6505_v13  ;;  %v5340_v42 = vcombine.high %v5324_v62, %v11561_v24 }
 0x363   : > { %6977 = vrot.lane.b32.xlu1 %v6976_v63, %s7275_s11  ;;  %v6510_v63 = vunpack.i.h.bf16 %v11716_v53 }
 0x364   : > { %6962 = vrot.lane.b32.xlu0 %v6961_v48, %s7276_s20 }
 0x365   : > { %v10423_v48 = vpop.permute.xlu0 %6722 }
 0x367   : > { %6982 = vrot.lane.b32.xlu1 %v6981_v22, %s7276_s20  ;;  %v10427_v22 = vpop.permute.xlu1 %6747 }
 0x368   : > { %6972 = vrot.lane.b32.xlu0 %v6971_v7, %s7274_s1  ;;  %v6485_v7 = vunpack.i.h.bf16 %v11718_v12 }
 0x36b   : > { %5612 = vrot.lane.b32.xlu1 %v5524_v33, %s7271_s24  ;;  %v6520_v33 = vunpack.i.h.bf16 %v11719_v45 }
 0x36c   : > { %5604 = vrot.lane.b32.xlu0 %v5540_v16, %s7270_s7  ;;  %v2845_v16 = vsel %vm1096_vm7, %v2843_v39, %v6510_v63  ;;  %v5357_v63 = vcombine.high %v5347_v10, %v11561_v24 }
 0x36d   : > { %v2847_v35 = vsel %vm1099_vm8, %v2845_v16, %v6515_v43  ;;  %v6684_v16 = vunpack.i.l.bf16 %v10355_v0 }
 0x36e   : > { %v2849_v3 = vsel %vm1102_vm9, %v2847_v35, %v6520_v33  ;;  %v6685_v33 = vunpack.i.h.bf16 %v10355_v0  ;;  %v6690_v0 = vunpack.i.h.bf16 %v10331_v8 }
 0x36f   : > { %5620 = vrot.lane.b32.xlu1 %v5541_v6, %s7272_s26  ;;  %v2833_v6 = vsel %vm1099_vm8, %v2831_v11, %v6480_v18 }
 0x370   : > { %5548 = vrot.lane.b32.xlu0 %v5355_v23, %s7270_s7  ;;  %v11721_v23 = vld [vmem:[#allocation62_spill] sm:$0xff]  ;;  %v2835_v40 = vsel %vm1102_vm9, %v2833_v6, %v6485_v7  ;;  %v5903_v7 = vld [vmem:[%s10988_s4] sm:$0xff]  ;;  %v7277_v6 = vmov 0   ;;  %s11763_s7 = sld [smem:[#allocation138_spill]] }
 0x371   : > { %v2837_v11 = vsel %vm1105_vm10, %v2835_v40, %v6490_v14  ;;  %v5354_v14 = vrot.slane %v5340_v42, %v11563_v28  ;;  %6986 = vset.pattern.permute.xlu1 %v7277_v6  ;;  %6987 = vset.pattern.permute.xlu0 %v7277_v6  ;;  %v6689_v40 = vunpack.i.l.bf16 %v10331_v8  ;;  %v6709_v42 = vunpack.i.l.bf16 %v10359_v55 }
 0x372   : > { %v10469_v62 = vsel %vm1108_vm11, %v2837_v11, %v6495_v44  ;;  %v11733_v44 = vld [vmem:[#allocation28_spill] sm:$0xff] }
 0x373   : > { %5628 = vrot.lane.b32.xlu1 %v5532_v4, %s7273_s9  ;;  %v6525_v4 = vunpack.i.h.bf16 %v11721_v23  ;;  %v11729_v23 = vld [vmem:[#allocation41_spill] sm:$0xff] }
 0x374   : > { %5556 = vrot.lane.b32.xlu0 %v5339_v41, %s7271_s24  ;;  %v11723_v41 = vld [vmem:[#allocation64_spill] sm:$0xff] }
 0x375   : > { %v6530_v9 = vunpack.i.h.bf16 %v11723_v41  ;;  %v2851_v43 = vsel %vm1105_vm10, %v2849_v3, %v6525_v4  ;;  %v6679_v4 = vunpack.i.l.bf16 %v11729_v23  ;;  %v11735_v41 = vld [vmem:[#allocation130_spill] sm:$0xff] }
 0x376   : > { %s10867_s24 = scalar_lea.hbm %s11763_s7, %s6261_s8 }
 0x377   : > { %5636 = vrot.lane.b32.xlu1 %v5542_v15, %s7274_s1  ;;  %v11725_v15 = vld [vmem:[#allocation40_spill] sm:$0xff]  ;;  %v10476_v45 = vsel %vm1108_vm11, %v2851_v43, %v6530_v9 }
 0x378   : > { %5564 = vrot.lane.b32.xlu0 %v5356_v51, %s7272_s26  ;;  %v11726_v21 = vcombine.low %v11724_v31, %v11725_v15  ;;  %v5723_v28 = vrot.slane %v10476_v45, 5  ;;  %v6699_v31 = vunpack.i.l.bf16 %v10348_v27  ;;  %v6695_v27 = vunpack.i.h.bf16 %v10363_v60  ;;  %s10877_s26 = scalar_lea.sflag [#allocation13], %s339_s0 }
 0x37a   : > { %v6733_v2 = vpop.permute.xlu0 %6732  ;;  %v6758_v57 = vpop.permute.xlu1 %6757 }
 0x37b   : > { %5644 = vrot.lane.b32.xlu1 %v5539_v25, %s7275_s11  ;;  %v6735_v32 = vunpack.i.h.bf16 %v6733_v2  ;;  %v6734_v36 = vunpack.i.l.bf16 %v6733_v2  ;;  %v6760_v13 = vunpack.i.h.bf16 %v6758_v57  ;;  %v6759_v49 = vunpack.i.l.bf16 %v6758_v57  ;;  %v11728_v25 = vld [vmem:[#allocation31_spill] sm:$0xff]  ;;  %v11730_v57 = vld [vmem:[#allocation128_spill] sm:$0xff] }
 0x37c   : > { %5572 = vrot.lane.b32.xlu0 %v5347_v10, %s7273_s9  ;;  %v6674_v12 = vunpack.i.l.bf16 %v11728_v25  ;;  %v6675_v35 = vunpack.i.h.bf16 %v11728_v25  ;;  %v5721_v2 = vrot.slane %v10469_v62, 5  ;;  %v6694_v25 = vunpack.i.l.bf16 %v10363_v60  ;;  %s7122_s9 = scalar_lea.vmem %s10859_s18, 32 }
 0x37d   : > { %v4542_v18 = vsel %vm447_vm2, %v11726_v21, %v6735_v32  ;;  %v3969_v34 = vsel %vm447_vm2, %v11727_v50, %v6734_v36  ;;  %v11731_v32 = vld [vmem:[#allocation131_spill] sm:$0xff]  ;;  %v5358_v21 = vcombine.high %v5354_v14, %v11561_v24  ;;  %v11737_v50 = vld [vmem:[#allocation133_spill] sm:$0xff]  ;;  %p7123_p2 = scmp.ne.s32.totalorder %s10859_s18, %s7122_s9 }
 0x37e   : > { %v10454_v53 = vpop.permute.xlu0 %6742  ;;  %v10458_v39 = vsel %vm1093_vm6, %v3969_v34, %v6759_v49  ;;  %v10461_v26 = vsel %vm1093_vm6, %v4542_v18, %v6760_v13  ;;  %v10464_v51 = vpop.permute.xlu1 %6767  ;;  %v11732_v36 = vcombine.low %v11730_v57, %v11731_v32  ;;  %v3405_v13 = vsel %vm447_vm2, %v11733_v44, %v6685_v33  ;;  %v11734_v49 = vld [vmem:[#allocation132_spill] sm:$0xff] }
 0x37f   : > { %5652 = vrot.lane.b32.xlu1 %v5543_v54, %s7276_s20  ;;  %v11736_v9 = vcombine.low %v11734_v49, %v11735_v41  ;;  %v6680_v18 = vunpack.i.h.bf16 %v11729_v23  ;;  %v3391_v8 = vsel %vm447_vm2, %v11737_v50, %v6675_v35  ;;  %v6710_v34 = vunpack.i.h.bf16 %v10359_v55  ;;  %v11742_v49 = vld [vmem:[#allocation42_spill] sm:$0xff]  ;;  %p7124_p10 = pnand %p7123_p2, %p11764_p12 }
 0x380   : > { %5580 = vrot.lane.b32.xlu0 %v5357_v63, %s7274_s1  ;;  %v3390_v54 = vsel %vm447_vm2, %v11732_v36, %v6674_v12  ;;  %v3393_v43 = vsel %vm1093_vm6, %v3391_v8, %v6690_v0  ;;  %v6705_v33 = vunpack.i.h.bf16 %v10383_v52  ;;  %v6715_v35 = vunpack.i.h.bf16 %v10396_v5  ;;  %s7280_s1 = smov [#allocation12]  }
 0x381   : > { %v3404_v3 = vsel %vm447_vm2, %v11736_v9, %v6684_v16  ;;  %v3392_v11 = vsel %vm1093_vm6, %v3390_v54, %v6679_v4  ;;  %v6704_v16 = vunpack.i.l.bf16 %v10383_v52  ;;  %v6714_v23 = vunpack.i.l.bf16 %v10396_v5  ;;  %p7125_p13 = pneg %p7124_p10 }
 0x382   : > { %v10480_v37 = vpop.permute.xlu0 %6752  ;;  %v10486_v10 = vpop.permute.xlu1 %6777  ;;  %v3406_v12 = vsel %vm1093_vm6, %v3404_v3, %v6680_v18  ;;  %v3394_v60 = vsel %vm1096_vm7, %v3392_v11, %v6709_v42  ;;  %v3395_v0 = vsel %vm1096_vm7, %v3393_v43, %v6710_v34  ;;  %v6725_v57 = vunpack.i.h.bf16 %v10423_v48 }
 0x383   : > { %5922 = vperm.xlu1 %6986, %v5903_v7   ;;  %v3407_v7 = vsel %vm1093_vm6, %v3405_v13, %v6689_v40  ;;  %v3408_v55 = vsel %vm1096_vm7, %v3406_v12, %v6699_v31  ;;  %v6724_v32 = vunpack.i.l.bf16 %v10423_v48  ;;  %v6720_v52 = vunpack.i.h.bf16 %v10366_v1  ;;  %v11738_v40 = vld [vmem:[#allocation69_spill] sm:$0xff]  ;;  %v11741_v13 = vld [vmem:[#allocation74_spill] sm:$0xff] }
 0x384   : > { %5588 = vrot.lane.b32.xlu0 %v5354_v14, %s7275_s11  ;;  %v3409_v14 = vsel %vm1096_vm7, %v3407_v7, %v6700_v38  ;;  %v6719_v54 = vunpack.i.l.bf16 %v10366_v1  ;;  %v11739_v38 = vld [vmem:[#allocation33_spill] sm:$0xff]  ;;  %v11743_v41 = vcombine.low %v11741_v13, %v11742_v49  ;;  %v6730_v3 = vunpack.i.h.bf16 %v10386_v59  ;;  %s7126_s11 = sshll.u32 %s7280_s1, 4  ;;  %s7127_s11 = int_to_ptr.vmem [resolvable:$false] %s7126_s11 }
 0x385   : > { %v11740_v44 = vcombine.low %v11738_v40, %v11739_v38  ;;  %v6729_v31 = vunpack.i.l.bf16 %v10386_v59  ;;  %v3410_v1 = vsel %vm1099_vm8, %v3408_v55, %v6714_v23  ;;  %v3411_v18 = vsel %vm1099_vm8, %v3409_v14, %v6715_v35  ;;  %p7129_p3 = scmp.lt.s32.totalorder %s10859_s18, %s7127_s11 }
 0x386   : > { %v10506_v15 = vpop.permute.xlu0 %6762  ;;  %v6788_v63 = vpop.permute.xlu1 %6787  ;;  %v3968_v9 = vsel %vm447_vm2, %v11743_v41, %v6694_v25  ;;  %v6750_v50 = vunpack.i.h.bf16 %v10427_v22  ;;  %v6749_v8 = vunpack.i.l.bf16 %v10427_v22  ;;  %v3396_v42 = vsel %vm1099_vm8, %v3394_v60, %v6724_v32 }
 0x387   : > { %v3954_v5 = vsel %vm447_vm2, %v11740_v44, %v6695_v27  ;;  %v3397_v43 = vsel %vm1099_vm8, %v3395_v0, %v6725_v57  ;;  %v6755_v11 = vunpack.i.h.bf16 %v10480_v37  ;;  %v6754_v59 = vunpack.i.l.bf16 %v10480_v37 }
 0x388   : > { %5596 = vrot.lane.b32.xlu0 %v5358_v21, %s7276_s20  ;;  %v3956_v48 = vsel %vm1093_vm6, %v3954_v5, %v6705_v33  ;;  %v3970_v21 = vsel %vm1093_vm6, %v3968_v9, %v6704_v16  ;;  %v6740_v25 = vunpack.i.h.bf16 %v10401_v19  ;;  %v6739_v12 = vunpack.i.l.bf16 %v10401_v19  ;;  %s7128_s20 = scalar_lea.vmem %s7127_s11, 64 }
 0x389   : > { %v6790_v7 = vunpack.i.h.bf16 %v6788_v63  ;;  %v6789_v33 = vunpack.i.l.bf16 %v6788_v63  ;;  %v3958_v16 = vsel %vm1096_vm7, %v3956_v48, %v6720_v52  ;;  %v3972_v22 = vsel %vm1096_vm7, %v3970_v21, %v6719_v54  ;;  %p7130_p9 = scmp.lt.s32.totalorder %s7128_s20, %s7122_s9 }
 0x38a   : > { %v10527_v4 = vpop.permute.xlu0 %6772  ;;  %v6798_v36 = vpop.permute.xlu1 %6797  ;;  %v3412_v35 = vsel %vm1102_vm9, %v3410_v1, %v6729_v31  ;;  %v3413_v23 = vsel %vm1102_vm9, %v3411_v18, %v6730_v3  ;;  %v3398_v37 = vsel %vm1102_vm9, %v3396_v42, %v6749_v8  ;;  %v3399_v60 = vsel %vm1102_vm9, %v3397_v43, %v6750_v50 }
 0x38b   : > { %v3414_v19 = vsel %vm1105_vm10, %v3412_v35, %v6754_v59  ;;  %v3415_v63 = vsel %vm1105_vm10, %v3413_v23, %v6755_v11  ;;  %v6765_v57 = vunpack.i.h.bf16 %v10506_v15  ;;  %v6764_v32 = vunpack.i.l.bf16 %v10506_v15  ;;  %p7131_p6 = por %p7130_p9, %p7129_p3 }
 0x38c   : > { %v3416_v54 = vsel %vm1108_vm11, %v3414_v19, %v6789_v33  ;;  %v3417_v40 = vsel %vm1108_vm11, %v3415_v63, %v6790_v7  ;;  %v6800_v5 = vunpack.i.h.bf16 %v6798_v36  ;;  %v6799_v13 = vunpack.i.l.bf16 %v6798_v36 }
 0x38d   : > { %v3960_v9 = vsel %vm1099_vm8, %v3958_v16, %v6740_v25  ;;  %v3974_v3 = vsel %vm1099_vm8, %v3972_v22, %v6739_v12  ;;  %v5735_v21 = vrot.slane %v3416_v54, 4  ;;  %v5738_v1 = vrot.slane %v3417_v40, 4  ;;  %p7132_p4 = pnand %p7131_p6, %p7125_p13 }
 0x38e   : > { %v6783_v34 = vpop.permute.xlu0 %6782  ;;  %v10555_v27 = vpop.permute.xlu1 %6807  ;;  %v3962_v18 = vsel %vm1102_vm9, %v3960_v9, %v6765_v57  ;;  %v3976_v36 = vsel %vm1102_vm9, %v3974_v3, %v6764_v32  ;;  %v6769_v9 = vunpack.i.l.bf16 %v10464_v51  ;;  %v11748_v3 = vld [vmem:[#allocation97_spill] sm:$0xff] }
 0x38f   : > { %v6785_v55 = vunpack.i.h.bf16 %v6783_v34  ;;  %v6784_v14 = vunpack.i.l.bf16 %v6783_v34  ;;  %v3964_v11 = vsel %vm1105_vm10, %v3962_v18, %v6800_v5  ;;  %v3978_v59 = vsel %vm1105_vm10, %v3976_v36, %v6799_v13 }
 0x390   : > { %v5739_v23 = vsel %vm5733_vm15, %v5735_v21, %v5738_v1  ;;  %v6780_v18 = vunpack.i.h.bf16 %v10486_v10  ;;  %v6779_v36 = vunpack.i.l.bf16 %v10486_v10 }
 0x391   : > { %v3400_v49 = vsel %vm1105_vm10, %v3398_v37, %v6784_v14  ;;  %v3401_v41 = vsel %vm1105_vm10, %v3399_v60, %v6785_v55  ;;  %v11744_v55 = vld [vmem:[#allocation32_spill] sm:$0xff]  ;;  %v11746_v37 = vld [vmem:[#allocation37_spill] sm:$0xff] }
 0x392   : > { %v10565_v0 = vpop.permute.xlu0 %6792  ;;  %v6818_v52 = vpop.permute.xlu1 %6817  ;;  %v11745_v14 = vrot.slane %v11744_v55, 5  ;;  %v11747_v60 = vrot.slane %v11746_v37, 5  ;;  %v11752_v55 = vld [vmem:[#allocation45_spill] sm:$0xff] }
 0x393   : > { %v6820_v38 = vunpack.i.h.bf16 %v6818_v52  ;;  %v6819_v44 = vunpack.i.l.bf16 %v6818_v52 }
 0x394   : > { %v5724_v35 = vsel %vm5718_vm13, %v11745_v14, %v5723_v28  ;;  %v5722_v19 = vsel %vm5718_vm13, %v11747_v60, %v5721_v2 }
 0x395   : > { %v3402_v31 = vsel %vm1108_vm11, %v3400_v49, %v6819_v44  ;;  %v3403_v15 = vsel %vm1108_vm11, %v3401_v41, %v6820_v38  ;;  %v5794_v57 = vsel %vm5733_vm15, %v5724_v35, %v5735_v21  ;;  %v6745_v44 = vunpack.i.h.bf16 %v10454_v53 }
 0x396   : > { %v10579_v48 = vpop.permute.xlu0 %6802  ;;  %v6828_v50 = vpop.permute.xlu1 %6827  ;;  %v5734_v8 = vrot.slane %v3402_v31, 4  ;;  %v5736_v34 = vrot.slane %v3403_v15, 4  ;;  %v6770_v49 = vunpack.i.h.bf16 %v10464_v51  ;;  %v6744_v41 = vunpack.i.l.bf16 %v10454_v53  ;;  %v11749_v51 = vld [vmem:[#allocation47_spill] sm:$0xff] }
 0x397   : > { %v6830_v42 = vunpack.i.h.bf16 %v6828_v50  ;;  %v6829_v43 = vunpack.i.l.bf16 %v6828_v50  ;;  %v3955_v31 = vsel %vm447_vm2, %v11748_v3, %v6745_v44  ;;  %v6775_v15 = vunpack.i.h.bf16 %v10527_v4 }
 0x398   : > { %v5737_v63 = vsel %vm5733_vm15, %v5734_v8, %v5736_v34  ;;  %v5793_v52 = vsel %vm5733_vm15, %v5722_v19, %v5734_v8  ;;  %v6774_v21 = vunpack.i.l.bf16 %v10527_v4  ;;  %v6810_v50 = vunpack.i.h.bf16 %v10555_v27 }
 0x399   : > { %v10586_v25 = vsel %vm1108_vm11, %v3964_v11, %v6830_v42  ;;  %v10589_v12 = vsel %vm1108_vm11, %v3978_v59, %v6829_v43  ;;  %v6809_v8 = vunpack.i.l.bf16 %v10555_v27  ;;  %v4529_v34 = vsel %vm447_vm2, %v11749_v51, %v6770_v49  ;;  %v11750_v42 = vld [vmem:[#allocation78_spill] sm:$0xff]  ;;  %v11751_v59 = vld [vmem:[#allocation49_spill] sm:$0xff] }
 0x39a   : > { %v10591_v7 = vpop.permute.xlu0 %6812  ;;  %v5749_v33 = vrot.slane %v10586_v25, 3  ;;  %v5750_v16 = vrot.slane %v10589_v12, 3  ;;  %v10595_v22 = vpop.permute.xlu1 %6837  ;;  %v4543_v43 = vsel %vm447_vm2, %v11750_v42, %v6744_v41  ;;  %v6795_v4 = vunpack.i.h.bf16 %v10565_v0 }
 0x39b   : > { %v6794_v11 = vunpack.i.l.bf16 %v10565_v0  ;;  %v11753_v14 = vcombine.low %v11751_v59, %v11752_v55  ;;  %v6805_v35 = vunpack.i.h.bf16 %v10579_v48  ;;  %v6804_v27 = vunpack.i.l.bf16 %v10579_v48  ;;  %v11754_v0 = vld [vmem:[#allocation30_spill] sm:$0xff] }
 0x39c   : > { %v5796_v32 = vsel %vm5748_vm0, %v5739_v23, %v5750_v16  ;;  %v5795_v45 = vsel %vm5748_vm0, %v5737_v63, %v5749_v33  ;;  %v6815_v23 = vunpack.i.h.bf16 %v10591_v7  ;;  %v3957_v37 = vsel %vm1093_vm6, %v3955_v31, %v6775_v15 }
 0x39d   : > { %v6272_v28 = vpack.c.bf16 %v5796_v32, %v5794_v57  ;;  %v6274_v40 = vpack.c.bf16 %v5795_v45, %v5793_v52  ;;  %v4528_v10 = vsel %vm447_vm2, %v11753_v14, %v6769_v9  ;;  %v4545_v60 = vsel %vm1093_vm6, %v4543_v43, %v6774_v21  ;;  %v11755_v32 = vld [vmem:[#allocation60_spill] sm:$0xff] }
 0x39e   : > { %v6823_v54 = vpop.permute.xlu0 %6822  ;;  %v10613_v38 = vpop.permute.xlu1 %6847  ;;  %v11756_v52 = vcombine.low %v11754_v0, %v11755_v32  ;;  %v3959_v49 = vsel %vm1096_vm7, %v3957_v37, %v6810_v50  ;;  %v4547_v41 = vsel %vm1096_vm7, %v4545_v60, %v6809_v8  ;;  %v4546_v3 = vsel %vm1096_vm7, %v10461_v26, %v6795_v4 }
 0x39f   : > { %6273 = vmatprep.subr.bf16.mxu0 %v6272_v28  ;;  %6286 = vmatprep.subr.bf16.mxu1 %v6272_v28  ;;  %v6825_v19 = vunpack.i.h.bf16 %v6823_v54  ;;  %v6824_v63 = vunpack.i.l.bf16 %v6823_v54  ;;  %v11757_v28 = vld [vmem:[#allocation53_spill] sm:$0xff]  ;;  %v3973_v54 = vsel %vm1096_vm7, %v10458_v39, %v6794_v11  ;;  %v6840_v31 = vunpack.i.h.bf16 %v10595_v22 }
 0x3a0   : > { %6275 = vmatpush1.bf16.msra.mxu0 %v6274_v40  ;;  %6292 = vmatpush1.bf16.msra.mxu1 %v6274_v40  ;;  %v5092_v45 = vsel %vm447_vm2, %v11756_v52, %v6780_v18  ;;  %v11758_v40 = vld [vmem:[#allocation38_spill] sm:$0xff]  ;;  %v6814_v15 = vunpack.i.l.bf16 %v10591_v7  ;;  %v4531_v21 = vsel %vm1093_vm6, %v4529_v34, %v6805_v35  ;;  %v4530_v18 = vsel %vm1093_vm6, %v4528_v10, %v6804_v27 }
 0x3a1   : > { %v11759_v44 = vcombine.low %v11757_v28, %v11758_v40  ;;  %v5094_v50 = vsel %vm1093_vm6, %v5092_v45, %v6815_v23  ;;  %v6850_v8 = vunpack.i.h.bf16 %v10613_v38  ;;  %v6849_v51 = vunpack.i.l.bf16 %v10613_v38 }
 0x3a2   : > { %v10615_v62 = vpop.permute.xlu0 %6832  ;;  %v3975_v39 = vsel %vm1099_vm8, %v3973_v54, %v6824_v63  ;;  %v4548_v26 = vsel %vm1099_vm8, %v4546_v3, %v6825_v19  ;;  %v3961_v11 = vsel %vm1099_vm8, %v3959_v49, %v6840_v31 }
 0x3a3   : > { %v10617_v2 = vpop.permute.xlu1 %6857  ;;  %v5106_v48 = vsel %vm447_vm2, %v11759_v44, %v6779_v36  ;;  %v6839_v36 = vunpack.i.l.bf16 %v10595_v22  ;;  %v6835_v34 = vunpack.i.h.bf16 %v10615_v62  ;;  %v6834_v4 = vunpack.i.l.bf16 %v10615_v62 }
 0x3a4   : > { %v6860_v43 = vunpack.i.h.bf16 %v10617_v2  ;;  %v6859_v7 = vunpack.i.l.bf16 %v10617_v2  ;;  %v5108_v59 = vsel %vm1093_vm6, %v5106_v48, %v6814_v15  ;;  %v3977_v27 = vsel %vm1102_vm9, %v3975_v39, %v6849_v51 }
 0x3a5   : > { %v4549_v14 = vsel %vm1099_vm8, %v4547_v41, %v6839_v36  ;;  %v4550_v62 = vsel %vm1102_vm9, %v4548_v26, %v6850_v8  ;;  %v4532_v63 = vsel %vm1096_vm7, %v4530_v18, %v6834_v4 }
 0x3a6   : > { %v10620_v5 = vpop.permute.xlu0 %6842  ;;  %v4551_v19 = vsel %vm1102_vm9, %v4549_v14, %v6859_v7 }
 0x3a7   : > { %v6845_v38 = vunpack.i.h.bf16 %v10620_v5  ;;  %v6844_v55 = vunpack.i.l.bf16 %v10620_v5  ;;  %v3963_v5 = vsel %vm1102_vm9, %v3961_v11, %v6860_v43 }
 0x3a9   : > { %v10622_v13 = vpop.permute.xlu1 %6867  ;;  %v5096_v32 = vsel %vm1096_vm7, %v5094_v50, %v6845_v38  ;;  %v5110_v52 = vsel %vm1096_vm7, %v5108_v59, %v6844_v55 }
 0x3aa   : > { %v10631_v1 = vpop.permute.xlu0 %6852  ;;  %v6870_v10 = vunpack.i.h.bf16 %v10622_v13  ;;  %v6869_v35 = vunpack.i.l.bf16 %v10622_v13  ;;  %v4533_v13 = vsel %vm1096_vm7, %v4531_v21, %v6835_v34 }
 0x3ab   : > { %v6854_v2 = vunpack.i.l.bf16 %v10631_v1  ;;  %v6855_v37 = vunpack.i.h.bf16 %v10631_v1 }
 0x3ac   : > { %v3979_v1 = vsel %vm1105_vm10, %v3977_v27, %v6869_v35  ;;  %v4552_v40 = vsel %vm1105_vm10, %v4550_v62, %v6870_v10 }
 0x3ad   : > { %v10637_v53 = vpop.permute.xlu1 %6877  ;;  %v4534_v48 = vsel %vm1099_vm8, %v4532_v63, %v6854_v2  ;;  %v4535_v41 = vsel %vm1099_vm8, %v4533_v13, %v6855_v37 }
 0x3ae   : > { %v10654_v57 = vpop.permute.xlu0 %6862  ;;  %v6880_v23 = vunpack.i.h.bf16 %v10637_v53  ;;  %v6879_v44 = vunpack.i.l.bf16 %v10637_v53 }
 0x3af   : > { %v6865_v54 = vunpack.i.h.bf16 %v10654_v57  ;;  %v6864_v3 = vunpack.i.l.bf16 %v10654_v57 }
 0x3b0   : > { %v3965_v49 = vsel %vm1105_vm10, %v3963_v5, %v6880_v23 }
 0x3b1   : > { %v10666_v9 = vpop.permute.xlu1 %6887  ;;  %v5098_v7 = vsel %vm1099_vm8, %v5096_v32, %v6865_v54  ;;  %v5112_v34 = vsel %vm1099_vm8, %v5110_v52, %v6864_v3 }
 0x3b2   : > { %v6873_v42 = vpop.permute.xlu0 %6872  ;;  %v6890_v26 = vunpack.i.h.bf16 %v10666_v9 }
 0x3b3   : > { %v6875_v45 = vunpack.i.h.bf16 %v6873_v42  ;;  %v6874_v28 = vunpack.i.l.bf16 %v6873_v42  ;;  %v6889_v42 = vunpack.i.l.bf16 %v10666_v9  ;;  %v4553_v9 = vsel %vm1105_vm10, %v4551_v19, %v6879_v44 }
 0x3b4   : > { %v5100_v13 = vsel %vm1102_vm9, %v5098_v7, %v6890_v26 }
 0x3b5   : > { %v6898_v22 = vpop.permute.xlu1 %6897  ;;  %v4536_v8 = vsel %vm1102_vm9, %v4534_v48, %v6874_v28  ;;  %v4537_v53 = vsel %vm1102_vm9, %v4535_v41, %v6875_v45  ;;  %v5114_v19 = vsel %vm1102_vm9, %v5112_v34, %v6889_v42 }
 0x3b6   : > { %v10698_v60 = vpop.permute.xlu0 %6882  ;;  %v6900_v15 = vunpack.i.h.bf16 %v6898_v22  ;;  %v6899_v21 = vunpack.i.l.bf16 %v6898_v22 }
 0x3b7   : > { %v6885_v26 = vunpack.i.h.bf16 %v10698_v60  ;;  %v6884_v42 = vunpack.i.l.bf16 %v10698_v60 }
 0x3b8   : > { %v4538_v59 = vsel %vm1105_vm10, %v4536_v8, %v6899_v21  ;;  %v4539_v38 = vsel %vm1105_vm10, %v4537_v53, %v6900_v15 }
 0x3b9   : > { %v10704_v0 = vpop.permute.xlu1 %6907 }
 0x3ba   : > { %v6893_v31 = vpop.permute.xlu0 %6892  ;;  %v6909_v7 = vunpack.i.l.bf16 %v10704_v0 }
 0x3bb   : > { %v6895_v36 = vunpack.i.h.bf16 %v6893_v31  ;;  %v6894_v50 = vunpack.i.l.bf16 %v6893_v31 }
 0x3bd   : > { %v6918_v18 = vpop.permute.xlu1 %6917  ;;  %v3981_v43 = vsel %vm1108_vm11, %v3979_v1, %v6894_v50  ;;  %v4554_v57 = vsel %vm1108_vm11, %v4552_v40, %v6895_v36 }
 0x3be   : > { %v6920_v51 = vunpack.i.h.bf16 %v6918_v18  ;;  %v6919_v39 = vunpack.i.l.bf16 %v6918_v18  ;;  %v5753_v4 = vrot.slane %v3981_v43, 3  ;;  %v5764_v22 = vrot.slane %v4554_v57, 2  ;;  %v6903_v11 = vpop.permute.xlu0 %6902 }
 0x3bf   : > { %v6905_v14 = vunpack.i.h.bf16 %v6903_v11  ;;  %v6904_v10 = vunpack.i.l.bf16 %v6903_v11  ;;  %v6910_v57 = vunpack.i.h.bf16 %v10704_v0 }
 0x3c0   : > { %v4540_v35 = vsel %vm1108_vm11, %v4538_v59, %v6919_v39  ;;  %v4541_v2 = vsel %vm1108_vm11, %v4539_v38, %v6920_v51  ;;  %v5754_v27 = vsel %vm5748_vm0, %v5750_v16, %v5753_v4  ;;  %v5093_v4 = vsel %vm447_vm2, %v10217_v56, %v6885_v26 }
 0x3c1   : > { %v6928_v55 = vpop.permute.xlu1 %6927  ;;  %v3967_v62 = vsel %vm1108_vm11, %v3965_v49, %v6905_v14  ;;  %v4555_v23 = vsel %vm1108_vm11, %v4553_v9, %v6904_v10  ;;  %v5798_v37 = vsel %vm3982_vm4, %v5754_v27, %v5764_v22  ;;  %v5763_v32 = vrot.slane %v4540_v35, 2 }
 0x3c2   : > { %v5751_v5 = vrot.slane %v3967_v62, 3  ;;  %v6913_v63 = vpop.permute.xlu0 %6912  ;;  %v5765_v52 = vrot.slane %v4541_v2, 2  ;;  %v6930_v12 = vunpack.i.h.bf16 %v6928_v55  ;;  %v6929_v40 = vunpack.i.l.bf16 %v6928_v55 }
 0x3c3   : > { %v6915_v28 = vunpack.i.h.bf16 %v6913_v63  ;;  %v6914_v1 = vunpack.i.l.bf16 %v6913_v63  ;;  %v5767_v16 = vrot.slane %v4555_v23, 2  ;;  %v5095_v9 = vsel %vm1093_vm6, %v5093_v4, %v6910_v57 }
 0x3c4   : > { %v5752_v44 = vsel %vm5748_vm0, %v5749_v33, %v5751_v5  ;;  %v5766_v18 = vsel %vm3982_vm4, %v5763_v32, %v5765_v52 }
 0x3c5   : > { %v6938_v45 = vpop.permute.xlu1 %6937  ;;  %v5102_v48 = vsel %vm1105_vm10, %v5100_v13, %v6915_v28  ;;  %v5116_v49 = vsel %vm1105_vm10, %v5114_v19, %v6914_v1  ;;  %v5797_v41 = vsel %vm3982_vm4, %v5752_v44, %v5763_v32  ;;  %v5768_v33 = vsel %vm3982_vm4, %v5764_v22, %v5767_v16 }
 0x3c6   : > { %v10744_v54 = vsel %vm1108_vm11, %v5102_v48, %v6930_v12  ;;  %v10747_v3 = vsel %vm1108_vm11, %v5116_v49, %v6929_v40  ;;  %v6923_v31 = vpop.permute.xlu0 %6922  ;;  %v5107_v22 = vsel %vm447_vm2, %v10224_v29, %v6884_v42  ;;  %v6940_v11 = vunpack.i.h.bf16 %v6938_v45 }
 0x3c7   : > { %v5777_v15 = vrot.slane %v10744_v54, 1  ;;  %v5778_v21 = vrot.slane %v10747_v3, 1  ;;  %v6939_v59 = vunpack.i.l.bf16 %v6938_v45  ;;  %v6925_v38 = vunpack.i.h.bf16 %v6923_v31 }
 0x3c8   : > { %v6924_v60 = vunpack.i.l.bf16 %v6923_v31  ;;  %v5109_v35 = vsel %vm1093_vm6, %v5107_v22, %v6909_v7  ;;  %v5656_v56 = vsel %vm447_vm2, %v5302_v46, %v6940_v11  ;;  %v11760_v29 = vcombine.low %v11707_v47, %v11706_v20 }
 0x3c9   : > { %v6948_v25 = vpop.permute.xlu1 %6947  ;;  %v5800_v36 = vsel %vm2280_vm5, %v5768_v33, %v5778_v21  ;;  %v5799_v50 = vsel %vm2280_vm5, %v5766_v18, %v5777_v15  ;;  %v5097_v13 = vsel %vm1096_vm7, %v5095_v9, %v6925_v38 }
 0x3ca   : > { %v6933_v8 = vpop.permute.xlu0 %6932  ;;  %v6276_v53 = vpack.c.bf16 %v5800_v36, %v5798_v37  ;;  %v6278_v51 = vpack.c.bf16 %v5799_v50, %v5797_v41  ;;  %v5670_v62 = vsel %vm447_vm2, %v11760_v29, %v6939_v59  ;;  %v6950_v5 = vunpack.i.h.bf16 %v6948_v25 }
 0x3cb   : > { %v6935_v55 = vunpack.i.h.bf16 %v6933_v8  ;;  %v6934_v14 = vunpack.i.l.bf16 %v6933_v8  ;;  %v6949_v63 = vunpack.i.l.bf16 %v6948_v25  ;;  %v5111_v19 = vsel %vm1096_vm7, %v5109_v35, %v6924_v60 }
 0x3cc   : > { %6277 = vmatprep.subr.bf16.mxu0 %v6276_v53  ;;  %6287 = vmatprep.subr.bf16.mxu1 %v6276_v53  ;;  %v5658_v48 = vsel %vm1093_vm6, %v5656_v56, %v6950_v5 }
 0x3cd   : > { %v6958_v39 = vpop.permute.xlu1 %6957  ;;  %6279 = vmatpush1.bf16.msra.mxu0 %v6278_v51  ;;  %6293 = vmatpush1.bf16.msra.mxu1 %v6278_v51  ;;  %v5099_v45 = vsel %vm1099_vm8, %v5097_v13, %v6935_v55  ;;  %v5113_v17 = vsel %vm1099_vm8, %v5111_v19, %v6934_v14  ;;  %v5672_v49 = vsel %vm1093_vm6, %v5670_v62, %v6949_v63 }
 0x3ce   : > { %v6943_v43 = vpop.permute.xlu0 %6942  ;;  %v6960_v32 = vunpack.i.h.bf16 %v6958_v39  ;;  %v6959_v52 = vunpack.i.l.bf16 %v6958_v39 }
 0x3cf   : > { %v6945_v2 = vunpack.i.h.bf16 %v6943_v43  ;;  %v6944_v0 = vunpack.i.l.bf16 %v6943_v43 }
 0x3d0   : > { %v5660_v25 = vsel %vm1096_vm7, %v5658_v48, %v6960_v32  ;;  %v5674_v33 = vsel %vm1096_vm7, %v5672_v49, %v6959_v52 }
 0x3d1   : > { %v6968_v34 = vpop.permute.xlu1 %6967  ;;  %v5101_v46 = vsel %vm1102_vm9, %v5099_v45, %v6945_v2  ;;  %v5115_v20 = vsel %vm1102_vm9, %v5113_v17, %v6944_v0 }
 0x3d2   : > { %v6953_v10 = vpop.permute.xlu0 %6952  ;;  %v6970_v12 = vunpack.i.h.bf16 %v6968_v34  ;;  %v6969_v40 = vunpack.i.l.bf16 %v6968_v34 }
 0x3d3   : > { %v6955_v23 = vunpack.i.h.bf16 %v6953_v10  ;;  %v6954_v37 = vunpack.i.l.bf16 %v6953_v10 }
 0x3d4   : > { %v5662_v39 = vsel %vm1099_vm8, %v5660_v25, %v6970_v12  ;;  %v5676_v26 = vsel %vm1099_vm8, %v5674_v33, %v6969_v40  ;;  %v7278_v12 = vmov 1966171168   ;;  %v7279_v33 = vmov 1.0  }
 0x3d5   : > { %v6978_v27 = vpop.permute.xlu1 %6977  ;;  %v5103_v16 = vsel %vm1105_vm10, %v5101_v46, %v6955_v23  ;;  %v5117_v44 = vsel %vm1105_vm10, %v5115_v20, %v6954_v37  ;;  %v5949_v40 = vunpack.c.l.s4 %v7278_v12 }
 0x3d6   : > { %v6963_v58 = vpop.permute.xlu0 %6962  ;;  %v6980_v42 = vunpack.i.h.bf16 %v6978_v27  ;;  %v6979_v43 = vunpack.i.l.bf16 %v6978_v27 }
 0x3d7   : > { %v6965_v28 = vunpack.i.h.bf16 %v6963_v58  ;;  %v6964_v1 = vunpack.i.l.bf16 %v6963_v58  ;;  %v5950_v48 = vunpack.c.0.s8 %v5949_v40 }
 0x3d9   : > { %v6983_v47 = vpop.permute.xlu1 %6982  ;;  %v5105_v41 = vsel %vm1108_vm11, %v5103_v16, %v6965_v28  ;;  %v5119_v31 = vsel %vm1108_vm11, %v5117_v44, %v6964_v1  ;;  %v5801_v28 = vld [vmem:[#allocation9] sm:$0xff] }
 0x3da   : > { %v6973_v18 = vpop.permute.xlu0 %6972  ;;  %v5779_v36 = vrot.slane %v5105_v41, 1  ;;  %v5781_v50 = vrot.slane %v5119_v31, 1  ;;  %v6985_v57 = vunpack.i.h.bf16 %v6983_v47  ;;  %v6984_v7 = vunpack.i.l.bf16 %v6983_v47  ;;  %v5802_v47 = vld [vmem:[#allocation9 + $0x8] sm:$0xff] }
 0x3db   : > { %v6975_v53 = vunpack.i.h.bf16 %v6973_v18  ;;  %v6974_v51 = vunpack.i.l.bf16 %v6973_v18  ;;  %v11761_v16 = vld [vmem:[#allocation27_spill] sm:$0xff] }
 0x3dc   : > { %v5782_v55 = vsel %vm2280_vm5, %v5778_v21, %v5781_v50  ;;  %v5780_v10 = vsel %vm2280_vm5, %v5777_v15, %v5779_v36  ;;  %v10827_v44 = vsub.s32 0, %v11761_v16 }
 0x3dd   : > { %v5613_v8 = vpop.permute.xlu1 %5612  ;;  %v5664_v34 = vsel %vm1102_vm9, %v5662_v39, %v6975_v53  ;;  %v5678_v4 = vsel %vm1102_vm9, %v5676_v26, %v6974_v51 }
 0x3de   : > { %v5605_v22 = vpop.permute.xlu0 %5604  ;;  %v5680_v11 = vsel %vm1105_vm10, %v5678_v4, %v6979_v43  ;;  %v5666_v59 = vsel %vm1105_vm10, %v5664_v34, %v6980_v42 }
 0x3df   : > { %v5682_v60 = vsel %vm1108_vm11, %v5680_v11, %v6984_v7  ;;  %v5668_v14 = vsel %vm1108_vm11, %v5666_v59, %v6985_v57  ;;  %v5671_v27 = vsel %vm447_vm2, %v10372_v61, %v5605_v22  ;;  %v11762_v59 = vlaneseq }
 0x3e0   : > { %v6280_v9 = vpack.c.bf16 %v5682_v60, %v5782_v55  ;;  %v6282_v35 = vpack.c.bf16 %v5668_v14, %v5780_v10  ;;  %v5673_v21 = vsel %vm1093_vm6, %v5671_v27, %v5613_v8  ;;  %v5953_v8 = vsub.s32 %v5950_v48, %v11761_v16 }
 0x3e1   : > { %v5621_v38 = vpop.permute.xlu1 %5620 }
 0x3e2   : > { %v5549_v2 = vpop.permute.xlu0 %5548  ;;  %6281 = vmatprep.subr.bf16.mxu0 %v6280_v9  ;;  %6288 = vmatprep.subr.bf16.mxu1 %v6280_v9  ;;  %v5675_v29 = vsel %vm1096_vm7, %v5673_v21, %v5621_v38 }
 0x3e3   : > { %6283 = vmatpush1.bf16.msra.mxu0 %v6282_v35  ;;  %6294 = vmatpush1.bf16.msra.mxu1 %v6282_v35  ;;  %v5657_v19 = vsel %vm447_vm2, %v10379_v30, %v5549_v2  ;;  %v5803_v30 = vld [vmem:[#allocation9 + $0x10] sm:$0x1] }
 0x3e5   : > { %v5629_v0 = vpop.permute.xlu1 %5628 }
 0x3e6   : > { %v5557_v3 = vpop.permute.xlu0 %5556  ;;  %v5677_v15 = vsel %vm1099_vm8, %v5675_v29, %v5629_v0 }
 0x3e7   : > { %v5659_v32 = vsel %vm1093_vm6, %v5657_v19, %v5557_v3 }
 0x3e9   : > { %v5637_v56 = vpop.permute.xlu1 %5636 }
 0x3ea   : > { %v5565_v54 = vpop.permute.xlu0 %5564  ;;  %v5679_v23 = vsel %vm1102_vm9, %v5677_v15, %v5637_v56 }
 0x3eb   : > { %v5661_v45 = vsel %vm1096_vm7, %v5659_v32, %v5565_v54  ;;  %vm5965_vm7 = vcmp.lt.s32.totalorder %v11762_v59, 256 }
 0x3ed   : > { %v5645_v62 = vpop.permute.xlu1 %5644 }
 0x3ee   : > { %v5573_v37 = vpop.permute.xlu0 %5572  ;;  %v5681_v5 = vsel %vm1105_vm10, %v5679_v23, %v5645_v62 }
 0x3ef   : > { %v5663_v17 = vsel %vm1099_vm8, %v5661_v45, %v5573_v37 }
 0x3f1   : > { %v5653_v63 = vpop.permute.xlu1 %5652 }
 0x3f2   : > { %v5683_v13 = vsel %vm1108_vm11, %v5681_v5, %v5653_v63  ;;  %v5581_v61 = vpop.permute.xlu0 %5580 }
 0x3f3   : > { %6242 = vmatprep.subr.msk.mxu0 %vm5688_vm12, %v5683_v13  ;;  %6289 = vmatprep.subr.msk.mxu1 %vm5688_vm12, %v5683_v13  ;;  %v5665_v58 = vsel %vm1102_vm9, %v5663_v17, %v5581_v61 }
 0x3f6   : > { %v5589_v52 = vpop.permute.xlu0 %5588 }
 0x3f7   : > { %v5667_v46 = vsel %vm1105_vm10, %v5665_v58, %v5589_v52 }
 0x3fa   : > { %v5597_v20 = vpop.permute.xlu0 %5596 }
 0x3fb   : > { %v5669_v1 = vsel %vm1108_vm11, %v5667_v46, %v5597_v20 }
 0x3fc   : > { %6243 = vmatpush1.msk.msra.mxu0 %vm5688_vm12, %v5669_v1  ;;  %6295 = vmatpush1.msk.msra.mxu1 %vm5688_vm12, %v5669_v1 }
 0x3fd   : > { %6245 = vmatmul.mubr.msk.f32.vlgmr.msra.gmra.mrb[0].mxu1 %vm5804_vm1, %v5802_v47  ;;  %6244 = vmatmul.mubr.msk.f32.vlgmr.msra.gmra.mrb[0].mxu0 %vm5804_vm1, %v5801_v28 }
 0x3fe   : > { %5896 = vmatprep.mubr.f32.mxu1 %v11561_v24 }
 0x401   : > { %6246 = vmatmul.mubr.msk.f32.gmra.mrb[2].mxu1 %vm5804_vm1, %v5803_v30 }
 0x4d0   : > { %v5892_v49 = vpop.f32.mrb[0].mxu1  ;;  %v10829_v41 = vpop.f32.mrb[0].mxu0 }
 0x4d1   : > { %vm5904_vm2 = vcmp.eq.f32.partialorder %v5892_v49, 0.0  ;;  %v10831_v31 = vpop.f32.mrb[1].mxu1  ;;  %v10833_v25 = vpop.f32.mrb[1].mxu0 }
 0x4d2   : > { %v5906_v24 = vsel %vm5904_vm2, 1.0, %v5892_v49  ;;  %v5943_v18 = vsel %vm5904_vm2, 0.0, %v7279_v33  ;;  %vm5905_vm3 = vcmp.eq.f32.partialorder %v10831_v31, 0.0  ;;  %v10873_v14 = vsel %vm5904_vm2, 1, %v7277_v6 }
 0x4d3   : > { %v5911_v36 = vrot.slane %v5906_v24, %v10827_v44  ;;  %v5907_v50 = vsel %vm5905_vm3, 1.0, %v10831_v31  ;;  %v5944_v51 = vsel %vm5905_vm3, 0.0, %v7279_v33  ;;  %v5974_v57 = vrot.slane %v5943_v18, 1 }
 0x4d4   : > { %v5915_v53 = vrot.slane %v5907_v50, %v10827_v44  ;;  %v5898_v39 = vpop.f32.mrb[2].mxu1  ;;  %v5947_v26 = vcombine.low %v5943_v18, %v5944_v51  ;;  %v5977_v22 = vrot.slane %v5944_v51, 1 }
 0x4d5   : > { %7000 = vrcp.f32 %v5911_v36  ;;  %vm5968_vm4 = vcmp.eq.f32.partialorder %v5898_v39, 0.0  ;;  %v5900_v42 = vpop.f32.mrb[3].mxu1 }
 0x4d6   : > { %7002 = vrcp.f32 %v5915_v53  ;;  %v5970_v43 = vsel %vm5968_vm4, 0.0, %v7279_v33  ;;  %vm5969_vm6 = vcmp.eq.f32.partialorder %v5900_v42, 0.0  ;;  %v5954_v7 = vrot.slane %v5947_v26, %v5953_v8 }
 0x4d7   : > { %v5975_v34 = vrot.slane %v5970_v43, 1  ;;  %v5971_v4 = vsel %vm5969_vm6, 0.0, %v7279_v33 }
 0x4d8   : > { %v5978_v11 = vrot.slane %v5971_v4, 1  ;;  %v5961_v38 = vrot.slane %v5954_v7, %v5953_v8 }
 0x4d9   : > { %v5976_v60 = vsel %vm2280_vm5, %v5974_v57, %v5975_v34 }
 0x4da   : > { %v5979_v55 = vsel %vm2280_vm5, %v5977_v22, %v5978_v11  ;;  %5982 = vst [vmem:[%s406_s5] sm:$0xff] %v5976_v60  ;;  %5967 = vst.msk [vmem:[%s399_s22] sm:$0x3] %vm5965_vm7, %v5961_v38 }
 0x4db   : > { %5983 = vst [vmem:[%s406_s5 + $0x8] sm:$0xff] %v5979_v55 }
 0x4dc   : > { %7135 = shalt.err (!%p7132_p4)
}
 0x4dd   : > { %s7136_s0 = scalar_lea.hbm %s10857_s14, 32  ;;  %s7140_s17 = scalar_lea.hbm %s10990_s6, 64 }
 0x4de   : > { %p7137_p7 = scmp.ne.s32.totalorder %s10857_s14, %s7136_s0  ;;  %p7141_p11 = scmp.lt.u32.totalorder %s10857_s14, %s10990_s6 }
 0x4df   : > { %p7142_p0 = scmp.lt.u32.totalorder %s7140_s17, %s7136_s0  ;;  %p7144_p2 = scmp.lt.u32.totalorder %s7136_s0, %s10857_s14 }
 0x4e0   : > { %p7138_p5 = pnand %p7137_p7, %p11764_p12 }
 0x4e1   : > { %p7143_p1 = por %p7142_p0, %p7141_p11 }
 0x4e2   : > { %p7139_p8 = pneg %p7138_p5 }
 0x4e3   : > { %p7145_p10 = por %p7144_p2, %p7143_p1 }
 0x4e5   : > { %p7146_p13 = pnand %p7145_p10, %p7139_p8 }
 0x4e7   : > { %7149 = shalt.err (!%p7146_p13)
}
 0x4e8   : > { %6307 = dma.vmem_to_hbm [thread:$0]  (%p11764_p12), %s10859_s18, 32, %s10857_s14, %s10877_s26   ;;  %v5928_v10 = vsel %vm5905_vm3, 1, %v7277_v6 }
 0x4e9   : > { %s7150_s5 = scalar_lea.vmem %s10869_s12, 256  ;;  %s7281_s19 = smov [#allocation14]  }
 0x4ea   : > { %p7151_p3 = scmp.ne.s32.totalorder %s10869_s12, %s7150_s5  ;;  %s7154_s13 = sshll.u32 %s7281_s19, 4  ;;  %s7155_s13 = int_to_ptr.vmem [resolvable:$false] %s7154_s13 }
 0x4eb   : > { %s7156_s27 = scalar_lea.vmem %s7155_s13, 512  ;;  %p7157_p4 = scmp.lt.s32.totalorder %s10869_s12, %s7155_s13 }
 0x4ec   : > { %p7152_p9 = pnand %p7151_p3, %p11764_p12  ;;  %p7158_p7 = scmp.lt.s32.totalorder %s7156_s27, %s7150_s5 }
 0x4ee   : > { %p7153_p6 = pneg %p7152_p9  ;;  %p7159_p5 = por %p7158_p7, %p7157_p4 }
 0x4f0   : > { %p7160_p8 = pnand %p7159_p5, %p7153_p6 }
 0x4f2   : > { %7163 = shalt.err (!%p7160_p8)
}
 0x4f3   : > { %s7164_s18 = scalar_lea.hbm %s10867_s24, 256  ;;  %s7168_s9 = scalar_lea.hbm %s11763_s7, 512 }
 0x4f4   : > { %p7165_p11 = scmp.ne.s32.totalorder %s10867_s24, %s7164_s18  ;;  %p7169_p2 = scmp.lt.u32.totalorder %s10867_s24, %s11763_s7 }
 0x4f5   : > { %p7170_p10 = scmp.lt.u32.totalorder %s7168_s9, %s7164_s18  ;;  %p7172_p3 = scmp.lt.u32.totalorder %s7164_s18, %s10867_s24 }
 0x4f6   : > { %p7166_p0 = pnand %p7165_p11, %p11764_p12 }
 0x4f7   : > { %p7171_p13 = por %p7170_p10, %p7169_p2 }
 0x4f8   : > { %p7167_p1 = pneg %p7166_p0 }
 0x4f9   : > { %p7173_p9 = por %p7172_p3, %p7171_p13 }
 0x4fb   : > { %p7174_p6 = pnand %p7173_p9, %p7167_p1 }
 0x4fd   : > { %7177 = shalt.err (!%p7174_p6)
}
 0x4fe   : > { %6308 = dma.vmem_to_hbm [thread:$0]  (%p11764_p12), %s10869_s12, 256, %s10867_s24, %s10877_s26   ;;  %v7001_v6 = vpop.eup %7000  ;;  %v5923_v9 = vpop.permute.xlu1 %5922  ;;  %v5932_v35 = vrot.slane %v10873_v14, %v10827_v44  ;;  %v5936_v27 = vrot.slane %v5928_v10, %v10827_v44 }
 0x4ff   : > { %v7003_v2 = vpop.eup %7002  ;;  %v5917_v0 = vmul.f32 %v7001_v6, %v10829_v41  ;;  %s392_s20 = scalar_lea.vmem [#allocation11], %s6239_s10  ;;  %s11765_s26 = sld [smem:[#allocation137_spill]] }
 0x500   : > { %v5919_v3 = vmul.f32 %v7003_v2, %v10833_v25  ;;  %s6009_s0 = sshll.u32 %s392_s20, 4  ;;  %vm5937_vm5 = vcmp.eq.s32.totalorder %v5932_v35, 1  ;;  %vm5938_vm8 = vcmp.eq.s32.totalorder %v5936_v27, 1  ;;  %s5985_s10 = scalar_lea.sflag [#allocation5], %s7557_s21  ;;  %s10940_s0 = int_to_ptr.vmem [resolvable:$true] %s6009_s0 }
 0x501   : > { %v5925_v21 = vadd.f32 %v5923_v9, %v5917_v0  ;;  %s7178_s17 = scalar_lea.vmem %s10940_s0, 256  ;;  %s7282_s29 = smov [#allocation11]  }
 0x502   : > { %v5926_v56 = vadd.f32 %v5923_v9, %v5919_v3  ;;  %p7179_p4 = scmp.ne.s32.totalorder %s10940_s0, %s7178_s17  ;;  %s7182_s15 = sshll.u32 %s7282_s29, 4  ;;  %s7183_s15 = int_to_ptr.vmem [resolvable:$false] %s7182_s15 }
 0x503   : > { %v5939_v29 = vsel %vm5937_vm5, 0.0, %v5925_v21  ;;  %s7184_s22 = scalar_lea.vmem %s7183_s15, 512  ;;  %p7185_p8 = scmp.lt.s32.totalorder %s10940_s0, %s7183_s15 }
 0x504   : > { %v5940_v54 = vsel %vm5938_vm8, 0.0, %v5926_v56  ;;  %5941 = vst [vmem:[%s392_s20] sm:$0xff] %v5939_v29  ;;  %p7180_p7 = pnand %p7179_p4, %p11764_p12  ;;  %p7186_p11 = scmp.lt.s32.totalorder %s7184_s22, %s7178_s17 }
 0x505   : > { %s11766_s23 = smov %s11765_s26  ;;  %s10938_s30 = scalar_lea.hbm %s11765_s26, %s6261_s8  ;;  %5942 = vst [vmem:[%s392_s20 + $0x8] sm:$0xff] %v5940_v54 }
 0x506   : > { %p7181_p5 = pneg %p7180_p7  ;;  %p7187_p0 = por %p7186_p11, %p7185_p8 }
 0x508   : > { %p7188_p1 = pnand %p7187_p0, %p7181_p5 }
 0x50a   : > { %7191 = shalt.err (!%p7188_p1)
}
 0x50b   : > { %s7192_s21 = scalar_lea.hbm %s10938_s30, 256  ;;  %s7196_s19 = scalar_lea.hbm %s11766_s23, 512 }
 0x50c   : > { %p7193_p2 = scmp.ne.s32.totalorder %s10938_s30, %s7192_s21  ;;  %p7197_p3 = scmp.lt.u32.totalorder %s10938_s30, %s11766_s23 }
 0x50d   : > { %p7198_p9 = scmp.lt.u32.totalorder %s7196_s19, %s7192_s21  ;;  %p7200_p4 = scmp.lt.u32.totalorder %s7192_s21, %s10938_s30 }
 0x50e   : > { %p7194_p10 = pnand %p7193_p2, %p11764_p12 }
 0x50f   : > { %p7199_p6 = por %p7198_p9, %p7197_p3 }
 0x510   : > { %p7195_p13 = pneg %p7194_p10 }
 0x511   : > { %p7201_p7 = por %p7200_p4, %p7199_p6 }
 0x513   : > { %p7202_p5 = pnand %p7201_p7, %p7195_p13 }
 0x515   : > { %7205 = shalt.err (!%p7202_p5)
}
 0x516   : > { %6306 = dma.vmem_to_hbm [thread:$0]  (%p11764_p12), %s10940_s0, 256, %s10938_s30, %s5985_s10  }
 0x517 PF: > { %s11767_s18 = sld [smem:[#allocation20_spill]]  ;;  %s11768_s14 = sld [smem:[#allocation25_spill]] }
 0x518   : > { %s11769_s28 = sld [smem:[#allocation22_spill]] }
 0x51d   : > { %s6049_s9 = sand.u32 1, %s11767_s18   ;;  %p11770_p8 = scmp.ne.s32.totalorder %s11768_s14, 0 }
 0x51e   : > { %p11771_p11 = scmp.ge.s32.totalorder %s11769_s28, 2  ;;  %s6050_s1 = scalar_lea.sflag [#allocation5], %s6049_s9 }
 0x520   : > { %p6327_p0 = pnand %p11771_p11, %p11770_p8 }
 0x522   : > { %7235 = dma.done.wait (!%p6327_p0), %s6050_s1, 256  }
 0x523   : > { %7237 = vsyncadd (!%p6327_p0), %s6050_s1, 4294967040  ;;  %s11772_s11 = sadd.s32 4294967294, %s11769_s28  }
 0x524   : > { %s6058_s20 = sand.u32 1, %s11772_s11  }
 0x525   : > { %s6059_s12 = scalar_lea.sflag [#allocation13], %s6058_s20 }
 0x526   : > { %7239 = dma.done.wait (!%p6327_p0), %s6059_s12, 288  }
 0x527   : > { %7241 = vsyncadd (!%p6327_p0), %s6059_s12, 4294967008  ;;  %s11773_s27 = sld [smem:[#allocation23_spill]]  ;;  %s11774_s16 = sld [smem:[#allocation21_spill]] }
 0x528   : > { %s11775_s26 = sld [smem:[#allocation24_spill]]  ;;  %s11776_s24 = smov %s7248_s25 }
 0x52d   : > { %p28_p12 = scmp.ge.s32.totalorder %s11773_s27, 4   ;;  %s11777_s25 = smov %s11774_s16 }
 0x52f   :  { %30 = sbr.rel (!%p28_p12) target bundleno = 15 (0xf), region = 145 }
 0x536   :  { %6073 = vsyncpa [#allocation4], 1 }
 0x537   :  { %6075 = vsyncpa [#allocation4 + $0x1], 1 }
 0x538   :  { %6076 = vsyncpa [#allocation7], 1 }
 0x539   :  { %6078 = vsyncpa [#allocation7 + $0x1], 1 }
 0x53a   :  { %6079 = vsyncpa [#allocation10], 1 }
 0x53b   :  { %6080 = vsyncpa [#allocation5], 1 }
 0x53c   :  { %6082 = vsyncpa [#allocation5 + $0x1], 1 }
 0x53d   :  { %6083 = vsyncpa [#allocation13], 1 }
 0x53e   :  { %6085 = vsyncpa [#allocation13 + $0x1], 1 }

</bundles_post_ra>
